<compile_context>
chip_gen: v5e
topology: v5e:2x2
jax: 0.10.0
libtpu: 0.0.40
codegen_flags: <defaults>
</compile_context>

<pallas_src>
import jax
import jax.numpy as jnp
from jax.experimental import pallas as pl
from jax.experimental.pallas import tpu as pltpu

H1 = 400
H2 = 1000

_LANE = 128
_N_H2_CHUNKS = 2  # split the padded H2 (1024) into 2 x 512 chunks


def _round_up(x, m):
    return ((x + m - 1) // m) * m


def _pad2(a, rows, cols, dtype):
    """Zero-pad a 2-D array up to (rows, cols) and cast."""
    r, c = a.shape
    return jnp.pad(a, ((0, rows - r), (0, cols - c))).astype(dtype)


def _decoder_kernel(z_ref, w1_ref, b1_ref, w2_ref, b2_ref, w3_ref, b3_ref,
                    out_ref):
    # ---- Layer 1: Linear + ReLU (bf16 matmul, f32 accumulate) ----
    h1 = jnp.dot(z_ref[...], w1_ref[...],
                 preferred_element_type=jnp.float32)
    h1 = jnp.maximum(h1 + b1_ref[...], 0.0).astype(jnp.bfloat16)

    # ---- Layers 2 + 3 fused, chunked over the H2 dimension ----
    #   logits = sum_c relu(h1 @ w2[:, c] + b2[c]) @ w3[c, :]
    # keeps the live f32 intermediate at (tb, 512) instead of (tb, 1024).
    h2p = w2_ref.shape[1]
    chunk = h2p // _N_H2_CHUNKS
    tb = out_ref.shape[0]
    dp = out_ref.shape[1]

    acc = jnp.zeros((tb, dp), jnp.float32)
    for c in range(_N_H2_CHUNKS):  # static, fully unrolled
        lo = c * chunk
        h2c = jnp.dot(h1, w2_ref[:, lo:lo + chunk],
                      preferred_element_type=jnp.float32)
        h2c = jnp.maximum(h2c + b2_ref[:, lo:lo + chunk],
                          0.0).astype(jnp.bfloat16)
        acc = acc + jnp.dot(h2c, w3_ref[lo:lo + chunk, :],
                            preferred_element_type=jnp.float32)

    out_ref[...] = jax.nn.sigmoid(acc + b3_ref[...]).astype(out_ref.dtype)


def decoder_oasis_forward(z, params, *, batch_tile=256):
    """Run the 3-layer MLP decoder with a Pallas kernel.

    z: (B, latent_dim) float32
    params: dict with w1 (L,400), b1 (1,400), w2 (400,1000), b2 (1,1000),
            w3 (1000,D), b3 (1,D)   (all float32)
    returns: (B, D) float32 reconstruction
    """
    w1, b1 = params["w1"], params["b1"]
    w2, b2 = params["w2"], params["b2"]
    w3, b3 = params["w3"], params["b3"]

    B, L = z.shape
    D = w3.shape[1]

    # Lane-aligned (x128) padded feature dims.
    H1p = _round_up(H1, _LANE)   # 512
    H2p = _round_up(H2, _LANE)   # 1024
    Dp = _round_up(D, _LANE)     # e.g. 784 -> 896

    # Zero-pad + cast weights to bf16 (padded columns/rows are zero, so they
    # contribute nothing and ReLU keeps them at zero). Biases stay f32.
    # NOTE: in a real deployment the padded bf16 weights would be stored once,
    # not re-padded per call.
    w1p = _pad2(w1, L, H1p, jnp.bfloat16)
    b1p = _pad2(b1, 1, H1p, jnp.float32)
    w2p = _pad2(w2, H1p, H2p, jnp.bfloat16)
    b2p = _pad2(b2, 1, H2p, jnp.float32)
    w3p = _pad2(w3, H2p, Dp, jnp.bfloat16)
    b3p = _pad2(b3, 1, Dp, jnp.float32)
    zb = z.astype(jnp.bfloat16)

    # ---- Batch tiling: big tiles, but >= 2 grid steps when possible so the
    # v7x megacore can split the batch across its two TensorCores. ----
    B_pad8 = _round_up(B, 8)
    tb = max(8, min(batch_tile, B_pad8))
    if B_pad8 > 8 and B_pad8 // tb < 2:
        tb = max(8, _round_up(B_pad8 // 2, 8))
    B_pad = _round_up(B, tb)
    if B_pad != B:
        zb = jnp.pad(zb, ((0, B_pad - B), (0, 0)))

    grid = (B_pad // tb,)

    flops = 2 * B_pad * (L * H1p + H1p * H2p + H2p * Dp)
    bytes_accessed = (
        2 * (w1p.size + w2p.size + w3p.size)          # bf16 weights
        + 4 * (b1p.size + b2p.size + b3p.size)        # f32 biases
        + 2 * zb.size                                 # bf16 input
        + 4 * B_pad * Dp                              # f32 output
    )
    cost = pl.CostEstimate(flops=flops,
                           transcendentals=B_pad * Dp,
                           bytes_accessed=bytes_accessed)

    out = pl.pallas_call(
        _decoder_kernel,
        out_shape=jax.ShapeDtypeStruct((B_pad, Dp), jnp.float32),
        grid_spec=pltpu.PrefetchScalarGridSpec(
            num_scalar_prefetch=0,
            grid=grid,
            in_specs=[
                # z tile: one batch tile per grid step
                pl.BlockSpec((tb, L), lambda i: (i, 0)),
                # weights / biases: full arrays, VMEM-resident across the grid
                pl.BlockSpec((L, H1p), lambda i: (0, 0)),
                pl.BlockSpec((1, H1p), lambda i: (0, 0)),
                pl.BlockSpec((H1p, H2p), lambda i: (0, 0)),
                pl.BlockSpec((1, H2p), lambda i: (0, 0)),
                pl.BlockSpec((H2p, Dp), lambda i: (0, 0)),
                pl.BlockSpec((1, Dp), lambda i: (0, 0)),
            ],
            out_specs=pl.BlockSpec((tb, Dp), lambda i: (i, 0)),
        ),
        compiler_params=pltpu.CompilerParams(
            dimension_semantics=("parallel",),
            vmem_limit_bytes=64 * 1024 * 1024,
        ),
        cost_estimate=cost,
    )(zb, w1p, b1p, w2p, b2p, w3p, b3p)

    # Strip batch padding and padded output lanes.
    return out[:B, :D]


def init_params(latent_dim, input_dim, key):
    """Deterministic parameter init (PyTorch nn.Linear-style uniform ranges)."""
    ks = jax.random.split(key, 6)

    def lin(kw, kb, fan_in, fan_out):
        bound = 1.0 / jnp.sqrt(fan_in)
        w = jax.random.uniform(kw, (fan_in, fan_out), jnp.float32,
                               minval=-bound, maxval=bound)
        b = jax.random.uniform(kb, (1, fan_out), jnp.float32,
                               minval=-bound, maxval=bound)
        return w, b

    w1, b1 = lin(ks[0], ks[1], latent_dim, H1)
    w2, b2 = lin(ks[2], ks[3], H1, H2)
    w3, b3 = lin(ks[4], ks[5], H2, input_dim)
    return dict(w1=w1, b1=b1, w2=w2, b2=b2, w3=w3, b3=b3)


if __name__ == "__main__":
    latent_dim = 16   # args.latent_dim
    input_dim = 784   # args.input_dim (e.g. flattened 28x28 image)
    batch = 2

    key = jax.random.PRNGKey(0)
    kz, kp = jax.random.split(key)
    z = jax.random.normal(kz, (batch, latent_dim), jnp.float32)
    params = init_params(latent_dim, input_dim, kp)

    recon = decoder_oasis_forward(z, params)
    recon = jax.block_until_ready(recon)

    # Pure-JAX f32 reference for a sanity check.
    def ref(z, p):
        h1 = jnp.maximum(z @ p["w1"] + p["b1"], 0.0)
        h2 = jnp.maximum(h1 @ p["w2"] + p["b2"], 0.0)
        return jax.nn.sigmoid(h2 @ p["w3"] + p["b3"])

    expected = ref(z, params)
    assert recon.shape == (batch, input_dim)
    # bf16 matmuls with f32 accumulation vs full-f32 reference -> loose tol.
    max_err = float(jnp.max(jnp.abs(recon - expected)))
    assert max_err < 2e-2, f"max abs err too large: {max_err}"

    print("KERNEL_OK")
</pallas_src>

<mosaic_0001>
module attributes {stable_mosaic.version = 11 : i64} {
  func.func @_decoder_kernel(%arg0: i32, %arg1: memref<8x16xbf16, #tpu.memory_space<vmem>>, %arg2: memref<16x512xbf16, #tpu.memory_space<vmem>>, %arg3: memref<1x512xf32, #tpu.memory_space<vmem>>, %arg4: memref<512x1024xbf16, #tpu.memory_space<vmem>>, %arg5: memref<1x1024xf32, #tpu.memory_space<vmem>>, %arg6: memref<1024x896xbf16, #tpu.memory_space<vmem>>, %arg7: memref<1x896xf32, #tpu.memory_space<vmem>>, %arg8: memref<8x896xf32, #tpu.memory_space<vmem>>) attributes {dimension_semantics = [#tpu.dimension_semantics<parallel>], iteration_bounds = array<i64: 1>, scalar_prefetch = 0 : i64, scratch_operands = 0 : i64, tpu.core_type = #tpu.core_type<tc>, window_params = [{transform_indices = @transform_0, window_bounds = array<i64: 8, 16>}, {pipeline_mode = #tpu.pipeline_mode<synchronous>, transform_indices = @transform_1, window_bounds = array<i64: 16, 512>}, {pipeline_mode = #tpu.pipeline_mode<synchronous>, transform_indices = @transform_2, window_bounds = array<i64: 1, 512>}, {pipeline_mode = #tpu.pipeline_mode<synchronous>, transform_indices = @transform_3, window_bounds = array<i64: 512, 1024>}, {pipeline_mode = #tpu.pipeline_mode<synchronous>, transform_indices = @transform_4, window_bounds = array<i64: 1, 1024>}, {pipeline_mode = #tpu.pipeline_mode<synchronous>, transform_indices = @transform_5, window_bounds = array<i64: 1024, 896>}, {pipeline_mode = #tpu.pipeline_mode<synchronous>, transform_indices = @transform_6, window_bounds = array<i64: 1, 896>}, {transform_indices = @transform_7, window_bounds = array<i64: 8, 896>}]} {
    %c0 = arith.constant 0 : index
    %c0_0 = arith.constant 0 : index
    %0 = vector.load %arg1[%c0, %c0_0] : memref<8x16xbf16, #tpu.memory_space<vmem>>, vector<8x16xbf16>
    %c0_1 = arith.constant 0 : index
    %c0_2 = arith.constant 0 : index
    %1 = vector.load %arg2[%c0_1, %c0_2] : memref<16x512xbf16, #tpu.memory_space<vmem>>, vector<16x512xbf16>
    %cst = arith.constant dense<0.000000e+00> : vector<8x512xf32>
    %2 = tpu.matmul %0, %1, %cst {dimension_numbers = #tpu.dot_dimension_numbers<[1], [0], [0], [1], [0, 0, 1, 1], [], []>} : vector<8x16xbf16>, vector<16x512xbf16>, vector<8x512xf32> -> vector<8x512xf32>
    %c0_3 = arith.constant 0 : index
    %c0_4 = arith.constant 0 : index
    %3 = vector.load %arg3[%c0_3, %c0_4] : memref<1x512xf32, #tpu.memory_space<vmem>>, vector<1x512xf32>
    %4 = vector.broadcast %3 : vector<1x512xf32> to vector<8x512xf32>
    %5 = arith.addf %2, %4 : vector<8x512xf32>
    %cst_5 = arith.constant 0.000000e+00 : f32
    %6 = vector.broadcast %cst_5 : f32 to vector<8x512xf32>
    %7 = arith.maximumf %5, %6 : vector<8x512xf32>
    %8 = arith.truncf %7 : vector<8x512xf32> to vector<8x512xbf16>
    %cst_6 = arith.constant 0.000000e+00 : f32
    %9 = vector.broadcast %cst_6 : f32 to vector<8x896xf32>
    %c0_7 = arith.constant 0 : index
    %c0_8 = arith.constant 0 : index
    %10 = vector.load %arg4[%c0_7, %c0_8] : memref<512x1024xbf16, #tpu.memory_space<vmem>>, vector<512x512xbf16>
    %cst_9 = arith.constant dense<0.000000e+00> : vector<8x512xf32>
    %11 = tpu.matmul %8, %10, %cst_9 {dimension_numbers = #tpu.dot_dimension_numbers<[1], [0], [0], [1], [0, 0, 1, 1], [], []>} : vector<8x512xbf16>, vector<512x512xbf16>, vector<8x512xf32> -> vector<8x512xf32>
    %c0_10 = arith.constant 0 : index
    %c0_11 = arith.constant 0 : index
    %12 = vector.load %arg5[%c0_10, %c0_11] : memref<1x1024xf32, #tpu.memory_space<vmem>>, vector<1x512xf32>
    %13 = vector.broadcast %12 : vector<1x512xf32> to vector<8x512xf32>
    %14 = arith.addf %11, %13 : vector<8x512xf32>
    %cst_12 = arith.constant 0.000000e+00 : f32
    %15 = vector.broadcast %cst_12 : f32 to vector<8x512xf32>
    %16 = arith.maximumf %14, %15 : vector<8x512xf32>
    %17 = arith.truncf %16 : vector<8x512xf32> to vector<8x512xbf16>
    %c0_13 = arith.constant 0 : index
    %c0_14 = arith.constant 0 : index
    %18 = vector.load %arg6[%c0_13, %c0_14] : memref<1024x896xbf16, #tpu.memory_space<vmem>>, vector<512x896xbf16>
    %cst_15 = arith.constant dense<0.000000e+00> : vector<8x896xf32>
    %19 = tpu.matmul %17, %18, %cst_15 {dimension_numbers = #tpu.dot_dimension_numbers<[1], [0], [0], [1], [0, 0, 1, 1], [], []>} : vector<8x512xbf16>, vector<512x896xbf16>, vector<8x896xf32> -> vector<8x896xf32>
    %20 = arith.addf %9, %19 : vector<8x896xf32>
    %c0_16 = arith.constant 0 : index
    %c512 = arith.constant 512 : index
    %21 = vector.load %arg4[%c0_16, %c512] : memref<512x1024xbf16, #tpu.memory_space<vmem>>, vector<512x512xbf16>
    %cst_17 = arith.constant dense<0.000000e+00> : vector<8x512xf32>
    %22 = tpu.matmul %8, %21, %cst_17 {dimension_numbers = #tpu.dot_dimension_numbers<[1], [0], [0], [1], [0, 0, 1, 1], [], []>} : vector<8x512xbf16>, vector<512x512xbf16>, vector<8x512xf32> -> vector<8x512xf32>
    %c0_18 = arith.constant 0 : index
    %c512_19 = arith.constant 512 : index
    %23 = vector.load %arg5[%c0_18, %c512_19] : memref<1x1024xf32, #tpu.memory_space<vmem>>, vector<1x512xf32>
    %24 = vector.broadcast %23 : vector<1x512xf32> to vector<8x512xf32>
    %25 = arith.addf %22, %24 : vector<8x512xf32>
    %cst_20 = arith.constant 0.000000e+00 : f32
    %26 = vector.broadcast %cst_20 : f32 to vector<8x512xf32>
    %27 = arith.maximumf %25, %26 : vector<8x512xf32>
    %28 = arith.truncf %27 : vector<8x512xf32> to vector<8x512xbf16>
    %c512_21 = arith.constant 512 : index
    %c0_22 = arith.constant 0 : index
    %29 = vector.load %arg6[%c512_21, %c0_22] : memref<1024x896xbf16, #tpu.memory_space<vmem>>, vector<512x896xbf16>
    %cst_23 = arith.constant dense<0.000000e+00> : vector<8x896xf32>
    %30 = tpu.matmul %28, %29, %cst_23 {dimension_numbers = #tpu.dot_dimension_numbers<[1], [0], [0], [1], [0, 0, 1, 1], [], []>} : vector<8x512xbf16>, vector<512x896xbf16>, vector<8x896xf32> -> vector<8x896xf32>
    %31 = arith.addf %20, %30 : vector<8x896xf32>
    %c0_24 = arith.constant 0 : index
    %c0_25 = arith.constant 0 : index
    %32 = vector.load %arg7[%c0_24, %c0_25] : memref<1x896xf32, #tpu.memory_space<vmem>>, vector<1x896xf32>
    %33 = vector.broadcast %32 : vector<1x896xf32> to vector<8x896xf32>
    %34 = arith.addf %31, %33 : vector<8x896xf32>
    %35 = arith.negf %34 : vector<8x896xf32>
    %36 = math.exp %35 : vector<8x896xf32>
    %cst_26 = arith.constant 1.000000e+00 : f32
    %37 = vector.broadcast %cst_26 : f32 to vector<8x896xf32>
    %38 = arith.addf %37, %36 : vector<8x896xf32>
    %39 = arith.divf %37, %38 : vector<8x896xf32>
    %c0_27 = arith.constant 0 : index
    %c0_28 = arith.constant 0 : index
    %40 = vector.load %arg8[%c0_27, %c0_28] : memref<8x896xf32, #tpu.memory_space<vmem>>, vector<8x896xf32>
    tpu.vector_store %arg8[%c0_27, %c0_28], %39 {strides = array<i32>} : memref<8x896xf32, #tpu.memory_space<vmem>>, vector<8x896xf32>,
    return
  }
  func.func @transform_0(%arg0: i32) -> (i32, i32) {
    %c0_i32 = arith.constant 0 : i32
    %c0_i32_0 = arith.constant 0 : i32
    return %arg0, %c0_i32 : i32, i32
  }
  func.func @transform_1(%arg0: i32) -> (i32, i32) {
    %c0_i32 = arith.constant 0 : i32
    %c0_i32_0 = arith.constant 0 : i32
    %c0_i32_1 = arith.constant 0 : i32
    return %c0_i32, %c0_i32_0 : i32, i32
  }
  func.func @transform_2(%arg0: i32) -> (i32, i32) {
    %c0_i32 = arith.constant 0 : i32
    %c0_i32_0 = arith.constant 0 : i32
    %c0_i32_1 = arith.constant 0 : i32
    return %c0_i32, %c0_i32_0 : i32, i32
  }
  func.func @transform_3(%arg0: i32) -> (i32, i32) {
    %c0_i32 = arith.constant 0 : i32
    %c0_i32_0 = arith.constant 0 : i32
    %c0_i32_1 = arith.constant 0 : i32
    return %c0_i32, %c0_i32_0 : i32, i32
  }
  func.func @transform_4(%arg0: i32) -> (i32, i32) {
    %c0_i32 = arith.constant 0 : i32
    %c0_i32_0 = arith.constant 0 : i32
    %c0_i32_1 = arith.constant 0 : i32
    return %c0_i32, %c0_i32_0 : i32, i32
  }
  func.func @transform_5(%arg0: i32) -> (i32, i32) {
    %c0_i32 = arith.constant 0 : i32
    %c0_i32_0 = arith.constant 0 : i32
    %c0_i32_1 = arith.constant 0 : i32
    return %c0_i32, %c0_i32_0 : i32, i32
  }
  func.func @transform_6(%arg0: i32) -> (i32, i32) {
    %c0_i32 = arith.constant 0 : i32
    %c0_i32_0 = arith.constant 0 : i32
    %c0_i32_1 = arith.constant 0 : i32
    return %c0_i32, %c0_i32_0 : i32, i32
  }
  func.func @transform_7(%arg0: i32) -> (i32, i32) {
    %c0_i32 = arith.constant 0 : i32
    %c0_i32_0 = arith.constant 0 : i32
    return %arg0, %c0_i32 : i32, i32
  }
}

</mosaic_0001>

<bundles_post_ra>
// kernel: tpu_custom_call.1
= control target key start
LH: loop header
LB: loop body
LE: loop exit
PB: predicated region body
PF: predicated region fallthrough
CT: control target
= control target key end

     0   :  { %12 = vsyncpa [#allocation3], 0  ;;  %s10094_s0 = inlined_call_operand.hbm [shape: bf16[8,16], index: 0, kind: input, shape index: {}]   ;;  %s10095_s1 = inlined_call_operand.hbm [shape: bf16[16,512], index: 1, kind: input, shape index: {}]   ;;  %s10096_s2 = inlined_call_operand.hbm [shape: f32[1,512], index: 2, kind: input, shape index: {}]   ;;  %s10097_s3 = inlined_call_operand.hbm [shape: bf16[512,1024], index: 3, kind: input, shape index: {}]   ;;  %s10098_s4 = inlined_call_operand.hbm [shape: f32[1,1024], index: 4, kind: input, shape index: {}]   ;;  %s10099_s5 = inlined_call_operand.hbm [shape: bf16[1024,896], index: 5, kind: input, shape index: {}]   ;;  %s10100_s6 = inlined_call_operand.hbm [shape: f32[1,896], index: 6, kind: input, shape index: {}]   ;;  %s10101_s7 = inlined_call_operand.hbm [shape: f32[8,896], index: 7, kind: output, shape index: {}]  }
   0x1   :  { %13 = vsyncpa [#allocation6], 0 }
   0x2   :  { %14 = vsyncpa [#allocation9], 0 }
   0x3   :  { %15 = vsyncpa [#allocation12], 0  ;;  %s32_s26 = sshll.u32 %s10095_s1, 4  ;;  %s33_s26 = int_to_ptr.hbm [resolvable:$true] %s32_s26 }
   0x4   :  { %16 = vsyncpa [#allocation4], 0  ;;  %s9738_s27 = smov [#allocation5]   ;;  %s56_s8 = sshll.u32 %s10097_s3, 4  ;;  %s57_s8 = int_to_ptr.hbm [resolvable:$true] %s56_s8 }
   0x5   :  { %s34_s28 = sshll.u32 %s9738_s27, 4  ;;  %s9739_s9 = smov 256   ;;  %s35_s28 = int_to_ptr.vmem [resolvable:$true] %s34_s28 }
   0x6   :  { %s9740_s10 = smov 16   ;;  %s9741_s11 = smov [#allocation8]  }
   0x7   :  { %40 = dma.hbm_to_vmem [thread:$0]  %s33_s26, 512, %s35_s28, [#allocation6], %s9739_s9, %s9739_s9, %s9740_s10  }
   0x8   :  { %s58_s12 = sshll.u32 %s9741_s11, 4  ;;  %s9742_s13 = smov 512   ;;  %s59_s12 = int_to_ptr.vmem [resolvable:$true] %s58_s12 }
   0x9   :  { %s9743_s14 = smov 32   ;;  %s80_s16 = sshll.u32 %s10099_s5, 4  ;;  %s81_s16 = int_to_ptr.hbm [resolvable:$true] %s80_s16 }
   0xa   :  { %64 = dma.hbm_to_vmem [thread:$0]  %s57_s8, 32768, %s59_s12, [#allocation9], %s9742_s13, %s9742_s13, %s9743_s14  }
   0xb   :  { %s9744_s17 = smov [#allocation11]   ;;  %s22_s20 = sshll.u32 %s10094_s0, 4  ;;  %s23_s20 = int_to_ptr.hbm [resolvable:$true] %s22_s20 }
   0xc   :  { %s82_s18 = sshll.u32 %s9744_s17, 4  ;;  %s9745_s21 = smov 448   ;;  %s83_s18 = int_to_ptr.vmem [resolvable:$true] %s82_s18 }
   0xd   :  { %s9746_s22 = smov 28   ;;  %s9747_s23 = smov [#allocation2]  }
   0xe   :  { %88 = dma.hbm_to_vmem [thread:$0]  %s81_s16, 57344, %s83_s18, [#allocation12], %s9745_s21, %s9745_s21, %s9746_s22  }
   0xf   :  { %s24_s24 = sshll.u32 %s9747_s23, 4  ;;  %s46_s27 = sshll.u32 %s10096_s2, 4  ;;  %s25_s24 = int_to_ptr.vmem [resolvable:$true] %s24_s24  ;;  %s47_s27 = int_to_ptr.hbm [resolvable:$true] %s46_s27 }
  0x10   :  { %27 = dma.hbm_to_vmem [thread:$0]  %s23_s20, 64, %s25_s24, [#allocation3]  }
  0x11   :  { %s70_s29 = sshll.u32 %s10098_s4, 4  ;;  %s9748_s30 = smov [#allocation7]   ;;  %s71_s29 = int_to_ptr.hbm [resolvable:$true] %s70_s29 }
  0x12   :  { %s48_s8 = sshll.u32 %s9748_s30, 4  ;;  %s9749_s0 = smov [#allocation10]   ;;  %s49_s8 = int_to_ptr.vmem [resolvable:$true] %s48_s8 }
  0x13   :  { %51 = dma.hbm_to_vmem [thread:$0]  %s47_s27, 64, %s49_s8, [#allocation6]  }
  0x14   :  { %s72_s9 = sshll.u32 %s9749_s0, 4  ;;  %s94_s12 = sshll.u32 %s10100_s6, 4  ;;  %s73_s9 = int_to_ptr.vmem [resolvable:$true] %s72_s9  ;;  %s95_s12 = int_to_ptr.hbm [resolvable:$true] %s94_s12 }
  0x15   :  { %75 = dma.hbm_to_vmem [thread:$0]  %s71_s29, 128, %s73_s9, [#allocation9]  }
  0x16   :  { %s9750_s2 = smov [#allocation13]  }
  0x17   :  { %s96_s13 = sshll.u32 %s9750_s2, 4  ;;  %s97_s13 = int_to_ptr.vmem [resolvable:$true] %s96_s13 }
  0x18   :  { %99 = dma.hbm_to_vmem [thread:$0]  %s95_s12, 112, %s97_s13, [#allocation12]  }
  0x19   :  { %9728 = dma.done.wait [#allocation3], 64  }
  0x1a   :  { %9729 = vsyncadd [#allocation3], 4294967232 }
  0x1b   :  { %9730 = dma.done.wait [#allocation6], 576  }
  0x1c   :  { %9731 = vsyncadd [#allocation6], 4294966720 }
  0x1d   :  { %9732 = dma.done.wait [#allocation9], 32896  }
  0x1e   :  { %9733 = vsyncadd [#allocation9], 4294934400 }
  0x1f   :  { %9734 = dma.done.wait [#allocation12], 57456  }
  0x20   :  { %9735 = vsyncadd [#allocation12], 4294909840  ;;  %vm164_vm0 = vcmask 130048   ;;  %v5945_v0 = vld [vmem:[#allocation5] sm:$0xf]  ;;  %s9751_s4 = smov [#allocation14]  }
  0x21   :  { %v8788_v1 = vld [vmem:[#allocation5 + $0xc] sm:$0xf0]  ;;  %v8786_v2 = vld [vmem:[#allocation5 + $0x4] sm:$0xf]  ;;  %v5947_v4 = vld [vmem:[#allocation5 + $0x10] sm:$0xf0] }
  0x22   :  { %v5946_v3 = vor.u32 %v8788_v1, %v5945_v0  ;;  %v5953_v5 = vld [vmem:[#allocation5 + $0x8] sm:$0xf]  ;;  %v8789_v6 = vld [vmem:[#allocation5 + $0x14] sm:$0xf0]  ;;  %v5950_v7 = vor.u32 %v8786_v2, %v5947_v4  ;;  %v8787_v9 = vld [vmem:[#allocation5 + $0xc] sm:$0xf] }
  0x23   :  { %v5954_v8 = vor.u32 %v8789_v6, %v5953_v5  ;;  %v5955_v10 = vld [vmem:[#allocation5 + $0x18] sm:$0xf0]  ;;  %v6077_v13 = vld [vmem:[#allocation8 + $0x1c0] sm:$0xf]  ;;  %s5928_s6 = sshll.u32 %s9751_s4, 4  ;;  %s5930_s15 = sshll.u32 %s10101_s7, 4  ;;  %s5929_s6 = int_to_ptr.vmem [resolvable:$true] %s5928_s6  ;;  %s5931_s15 = int_to_ptr.hbm [resolvable:$true] %s5930_s15 }
  0x24   :  { %v129_v11 = vld [vmem:[#allocation2] sm:$0xf]  ;;  %175 = vmatpush.bf16.msra.mxu0 %v5946_v3  ;;  %v5958_v12 = vor.u32 %v8787_v9, %v5955_v10  ;;  %v8820_v14 = vld [vmem:[#allocation8 + $0x1dc] sm:$0xf0]  ;;  %188 = vmatpush.bf16.msra.mxu1 %v5950_v7 }
  0x25   :  { %v6205_v15 = vld [vmem:[#allocation8 + $0x3c0] sm:$0xf]  ;;  %201 = vmatpush.bf16.msra.mxu2 %v5954_v8  ;;  %v6078_v16 = vor.u32 %v8820_v14, %v6077_v13 }
  0x26   :  { %v8852_v17 = vld [vmem:[#allocation8 + $0x3dc] sm:$0xf0]  ;;  %214 = vmatpush.bf16.msra.mxu3 %v5958_v12 }
  0x27   :  { %v6061_v18 = vld [vmem:[#allocation8 + $0x180] sm:$0xf]  ;;  %v6206_v20 = vor.u32 %v8852_v17, %v6205_v15  ;;  %5959 = vmatmul.msk.bf16.vlgmr.msra.gmra.mxu0 %vm164_vm0, %v129_v11  ;;  %5960 = vmatmul.msk.bf16.vlgmr.msra.gmra.mxu1 %vm164_vm0, %v129_v11 }
  0x28   :  { %v8816_v19 = vld [vmem:[#allocation8 + $0x19c] sm:$0xf0]  ;;  %5961 = vmatmul.msk.bf16.vlgmr.msra.gmra.mxu2 %vm164_vm0, %v129_v11  ;;  %1006 = vmatpush.bf16.msrb.mxu0 %v6078_v16 }
  0x29   :  { %v6189_v21 = vld [vmem:[#allocation8 + $0x380] sm:$0xf]  ;;  %5962 = vmatmul.msk.bf16.vlgmr.msra.gmra.mxu3 %vm164_vm0, %v129_v11  ;;  %v6062_v29 = vor.u32 %v8816_v19, %v6061_v18  ;;  %1019 = vmatpush.bf16.msrb.mxu1 %v6206_v20 }
  0x2a   :  { %v8848_v22 = vld [vmem:[#allocation8 + $0x39c] sm:$0xf0] }
  0x2b   :  { %v6333_v23 = vld [vmem:[#allocation8 + $0x5c0] sm:$0xf]  ;;  %v6190_v33 = vor.u32 %v8848_v22, %v6189_v21 }
  0x2c   :  { %v8884_v24 = vld [vmem:[#allocation8 + $0x5dc] sm:$0xf0]  ;;  %1007 = vmatpush.bf16.msrb.mxu0 %v6062_v29 }
  0x2d   :  { %v6461_v25 = vld [vmem:[#allocation8 + $0x7c0] sm:$0xf]  ;;  %v6334_v27 = vor.u32 %v8884_v24, %v6333_v23  ;;  %1020 = vmatpush.bf16.msrb.mxu1 %v6190_v33 }
  0x2e   :  { %v8916_v26 = vld [vmem:[#allocation8 + $0x7dc] sm:$0xf0] }
  0x2f   :  { %v6462_v28 = vor.u32 %v8916_v26, %v6461_v25  ;;  %v6045_v30 = vld [vmem:[#allocation8 + $0x140] sm:$0xf]  ;;  %1032 = vmatpush.bf16.msrb.mxu2 %v6334_v27 }
  0x30   :  { %v6317_v31 = vld [vmem:[#allocation8 + $0x580] sm:$0xf] }
  0x31   :  { %v8880_v32 = vld [vmem:[#allocation8 + $0x59c] sm:$0xf0]  ;;  %1045 = vmatpush.bf16.msrb.mxu3 %v6462_v28 }
  0x32   :  { %v8812_v34 = vld [vmem:[#allocation8 + $0x15c] sm:$0xf0]  ;;  %v6318_v35 = vor.u32 %v8880_v32, %v6317_v31 }
  0x33   :  { %v6445_v36 = vld [vmem:[#allocation8 + $0x780] sm:$0xf]  ;;  %v6046_v44 = vor.u32 %v8812_v34, %v6045_v30 }
  0x34   :  { %v8912_v37 = vld [vmem:[#allocation8 + $0x79c] sm:$0xf0]  ;;  %1033 = vmatpush.bf16.msrb.mxu2 %v6318_v35  ;;  %v8818_v35 = vld [vmem:[#allocation8 + $0x1c4] sm:$0xf] }
  0x35   :  { %v6173_v38 = vld [vmem:[#allocation8 + $0x340] sm:$0xf]  ;;  %v6446_v40 = vor.u32 %v8912_v37, %v6445_v36  ;;  %1008 = vmatpush.bf16.msrb.mxu0 %v6046_v44  ;;  %v6079_v37 = vld [vmem:[#allocation8 + $0x1e0] sm:$0xf0] }
  0x36   :  { %v8844_v39 = vld [vmem:[#allocation8 + $0x35c] sm:$0xf0] }
  0x37   :  { %v6301_v41 = vld [vmem:[#allocation8 + $0x540] sm:$0xf]  ;;  %v6174_v46 = vor.u32 %v8844_v39, %v6173_v38  ;;  %1046 = vmatpush.bf16.msrb.mxu3 %v6446_v40  ;;  %v8850_v38 = vld [vmem:[#allocation8 + $0x3c4] sm:$0xf] }
  0x38   :  { %v8876_v42 = vld [vmem:[#allocation8 + $0x55c] sm:$0xf0]  ;;  %v6207_v39 = vld [vmem:[#allocation8 + $0x3e0] sm:$0xf0] }
  0x39   :  { %v6429_v43 = vld [vmem:[#allocation8 + $0x740] sm:$0xf]  ;;  %v6302_v50 = vor.u32 %v8876_v42, %v6301_v41  ;;  %1021 = vmatpush.bf16.msrb.mxu1 %v6174_v46  ;;  %v8882_v46 = vld [vmem:[#allocation8 + $0x5c4] sm:$0xf] }
  0x3a   :  { %v8908_v45 = vld [vmem:[#allocation8 + $0x75c] sm:$0xf0] }
  0x3b   :  { %v6029_v47 = vld [vmem:[#allocation8 + $0x100] sm:$0xf]  ;;  %v6430_v52 = vor.u32 %v8908_v45, %v6429_v43  ;;  %1034 = vmatpush.bf16.msrb.mxu2 %v6302_v50  ;;  %v8914_v50 = vld [vmem:[#allocation8 + $0x7c4] sm:$0xf] }
  0x3c   :  { %v8808_v48 = vld [vmem:[#allocation8 + $0x11c] sm:$0xf0] }
  0x3d   :  { %v6157_v49 = vld [vmem:[#allocation8 + $0x300] sm:$0xf]  ;;  %v6030_v57 = vor.u32 %v8808_v48, %v6029_v47  ;;  %1047 = vmatpush.bf16.msrb.mxu3 %v6430_v52  ;;  %v6335_v47 = vld [vmem:[#allocation8 + $0x5e0] sm:$0xf0]  ;;  %v6210_v52 = vor.u32 %v8850_v38, %v6207_v39 }
  0x3e   :  { %v8840_v51 = vld [vmem:[#allocation8 + $0x31c] sm:$0xf0]  ;;  %v6127_v38 = vld [vmem:[#allocation8 + $0x2a0] sm:$0xf0] }
  0x3f   :  { %v6285_v53 = vld [vmem:[#allocation8 + $0x500] sm:$0xf]  ;;  %v6158_v58 = vor.u32 %v8840_v51, %v6157_v49  ;;  %1009 = vmatpush.bf16.msrb.mxu0 %v6030_v57  ;;  %v6082_v49 = vor.u32 %v8818_v35, %v6079_v37  ;;  %v6463_v51 = vld [vmem:[#allocation8 + $0x7e0] sm:$0xf0] }
  0x40   :  { %v8872_v54 = vld [vmem:[#allocation8 + $0x51c] sm:$0xf0]  ;;  %v6191_v57 = vld [vmem:[#allocation8 + $0x3a0] sm:$0xf0] }
  0x41   :  { %v6413_v55 = vld [vmem:[#allocation8 + $0x700] sm:$0xf]  ;;  %v6286_v62 = vor.u32 %v8872_v54, %v6285_v53  ;;  %1022 = vmatpush.bf16.msrb.mxu1 %v6158_v58  ;;  %v8814_v53 = vld [vmem:[#allocation8 + $0x184] sm:$0xf] }
  0x42   :  { %v8904_v56 = vld [vmem:[#allocation8 + $0x71c] sm:$0xf0]  ;;  %v6063_v54 = vld [vmem:[#allocation8 + $0x1a0] sm:$0xf0] }
  0x43   :  { %v6013_v59 = vld [vmem:[#allocation8 + $0xc0] sm:$0xf]  ;;  %v6414_v0 = vor.u32 %v8904_v56, %v6413_v55  ;;  %1035 = vmatpush.bf16.msrb.mxu2 %v6286_v62  ;;  %v8846_v56 = vld [vmem:[#allocation8 + $0x384] sm:$0xf] }
  0x44   :  { %v8804_v60 = vld [vmem:[#allocation8 + $0xdc] sm:$0xf0]  ;;  %v6319_v62 = vld [vmem:[#allocation8 + $0x5a0] sm:$0xf0] }
  0x45   :  { %v6141_v61 = vld [vmem:[#allocation8 + $0x2c0] sm:$0xf]  ;;  %v6014_v5 = vor.u32 %v8804_v60, %v6013_v59  ;;  %1048 = vmatpush.bf16.msrb.mxu3 %v6414_v0  ;;  %v6338_v59 = vor.u32 %v8882_v46, %v6335_v47  ;;  %v6466_v60 = vor.u32 %v8914_v50, %v6463_v51  ;;  %v8910_v0 = vld [vmem:[#allocation8 + $0x784] sm:$0xf] }
  0x46   :  { %v8836_v63 = vld [vmem:[#allocation8 + $0x2dc] sm:$0xf0]  ;;  %v8798_v35 = vld [vmem:[#allocation8 + $0x84] sm:$0xf] }
  0x47   :  { %v6269_v1 = vld [vmem:[#allocation8 + $0x4c0] sm:$0xf]  ;;  %v6142_v6 = vor.u32 %v8836_v63, %v6141_v61  ;;  %1010 = vmatpush.bf16.msrb.mxu0 %v6014_v5  ;;  %v8878_v61 = vld [vmem:[#allocation8 + $0x584] sm:$0xf]  ;;  %v6066_v63 = vor.u32 %v8814_v53, %v6063_v54 }
  0x48   :  { %v8868_v2 = vld [vmem:[#allocation8 + $0x4dc] sm:$0xf0]  ;;  %v8842_v5 = vld [vmem:[#allocation8 + $0x344] sm:$0xf] }
  0x49   :  { %v6397_v3 = vld [vmem:[#allocation8 + $0x6c0] sm:$0xf]  ;;  %v6270_v10 = vor.u32 %v8868_v2, %v6269_v1  ;;  %1023 = vmatpush.bf16.msrb.mxu1 %v6142_v6  ;;  %v6447_v1 = vld [vmem:[#allocation8 + $0x7a0] sm:$0xf0]  ;;  %v6194_v2 = vor.u32 %v8846_v56, %v6191_v57 }
  0x4a   :  { %v8900_v4 = vld [vmem:[#allocation8 + $0x6dc] sm:$0xf0]  ;;  %v6175_v6 = vld [vmem:[#allocation8 + $0x360] sm:$0xf0] }
  0x4b   :  { %v5997_v7 = vld [vmem:[#allocation8 + $0x80] sm:$0xf]  ;;  %v6398_v12 = vor.u32 %v8900_v4, %v6397_v3  ;;  %1036 = vmatpush.bf16.msrb.mxu2 %v6270_v10  ;;  %v8810_v3 = vld [vmem:[#allocation8 + $0x144] sm:$0xf] }
  0x4c   :  { %v8800_v8 = vld [vmem:[#allocation8 + $0x9c] sm:$0xf0]  ;;  %v6047_v4 = vld [vmem:[#allocation8 + $0x160] sm:$0xf0] }
  0x4d   :  { %v6125_v9 = vld [vmem:[#allocation8 + $0x280] sm:$0xf]  ;;  %v5998_v17 = vor.u32 %v8800_v8, %v5997_v7  ;;  %1049 = vmatpush.bf16.msrb.mxu3 %v6398_v12  ;;  %v6322_v7 = vor.u32 %v8878_v61, %v6319_v62  ;;  %v6450_v8 = vor.u32 %v8910_v0, %v6447_v1  ;;  %v6303_v10 = vld [vmem:[#allocation8 + $0x560] sm:$0xf0] }
  0x4e   :  { %v8832_v11 = vld [vmem:[#allocation8 + $0x29c] sm:$0xf0]  ;;  %v8906_v12 = vld [vmem:[#allocation8 + $0x744] sm:$0xf] }
  0x4f   :  { %v6253_v13 = vld [vmem:[#allocation8 + $0x480] sm:$0xf]  ;;  %v6126_v18 = vor.u32 %v8832_v11, %v6125_v9  ;;  %1011 = vmatpush.bf16.msrb.mxu0 %v5998_v17  ;;  %v8874_v9 = vld [vmem:[#allocation8 + $0x544] sm:$0xf]  ;;  %v6050_v11 = vor.u32 %v8810_v3, %v6047_v4 }
  0x50   :  { %v8864_v14 = vld [vmem:[#allocation8 + $0x49c] sm:$0xf0]  ;;  %v8838_v17 = vld [vmem:[#allocation8 + $0x304] sm:$0xf] }
  0x51   :  { %v6381_v15 = vld [vmem:[#allocation8 + $0x680] sm:$0xf]  ;;  %v6254_v22 = vor.u32 %v8864_v14, %v6253_v13  ;;  %1024 = vmatpush.bf16.msrb.mxu1 %v6126_v18  ;;  %v6431_v13 = vld [vmem:[#allocation8 + $0x760] sm:$0xf0]  ;;  %v6178_v14 = vor.u32 %v8842_v5, %v6175_v6 }
  0x52   :  { %v8896_v16 = vld [vmem:[#allocation8 + $0x69c] sm:$0xf0]  ;;  %v6159_v18 = vld [vmem:[#allocation8 + $0x320] sm:$0xf0] }
  0x53   :  { %v5981_v19 = vld [vmem:[#allocation8 + $0x40] sm:$0xf]  ;;  %v6382_v24 = vor.u32 %v8896_v16, %v6381_v15  ;;  %1037 = vmatpush.bf16.msrb.mxu2 %v6254_v22  ;;  %v8806_v15 = vld [vmem:[#allocation8 + $0x104] sm:$0xf] }
  0x54   :  { %v8796_v20 = vld [vmem:[#allocation8 + $0x5c] sm:$0xf0]  ;;  %v6031_v16 = vld [vmem:[#allocation8 + $0x120] sm:$0xf0] }
  0x55   :  { %v6109_v21 = vld [vmem:[#allocation8 + $0x240] sm:$0xf]  ;;  %v5982_v29 = vor.u32 %v8796_v20, %v5981_v19  ;;  %1050 = vmatpush.bf16.msrb.mxu3 %v6382_v24  ;;  %v6306_v19 = vor.u32 %v8874_v9, %v6303_v10  ;;  %v6434_v20 = vor.u32 %v8906_v12, %v6431_v13  ;;  %v6287_v22 = vld [vmem:[#allocation8 + $0x520] sm:$0xf0]  ;;  %v134_v13 = vld [vmem:[#allocation7] sm:$0xf] }
  0x56   :  { %v8828_v23 = vld [vmem:[#allocation8 + $0x25c] sm:$0xf0]  ;;  %v8902_v24 = vld [vmem:[#allocation8 + $0x704] sm:$0xf] }
  0x57   :  { %v6237_v25 = vld [vmem:[#allocation8 + $0x440] sm:$0xf]  ;;  %v6110_v32 = vor.u32 %v8828_v23, %v6109_v21  ;;  %1012 = vmatpush.bf16.msrb.mxu0 %v5982_v29  ;;  %v8870_v21 = vld [vmem:[#allocation8 + $0x504] sm:$0xf]  ;;  %v6034_v23 = vor.u32 %v8806_v15, %v6031_v16  ;;  %v137_v15 = vperm.slane %v134_v13, 1 }
  0x58   :  { %v8860_v26 = vld [vmem:[#allocation8 + $0x45c] sm:$0xf0]  ;;  %v8834_v29 = vld [vmem:[#allocation8 + $0x2c4] sm:$0xf] }
  0x59   :  { %v6365_v27 = vld [vmem:[#allocation8 + $0x640] sm:$0xf]  ;;  %v6238_v36 = vor.u32 %v8860_v26, %v6237_v25  ;;  %1025 = vmatpush.bf16.msrb.mxu1 %v6110_v32  ;;  %v6415_v25 = vld [vmem:[#allocation8 + $0x720] sm:$0xf0]  ;;  %v6162_v26 = vor.u32 %v8838_v17, %v6159_v18 }
  0x5a   :  { %v8892_v28 = vld [vmem:[#allocation8 + $0x65c] sm:$0xf0]  ;;  %v6418_v32 = vor.u32 %v8902_v24, %v6415_v25  ;;  %v8830_v37 = vld [vmem:[#allocation8 + $0x284] sm:$0xf] }
  0x5b   :  { %v5965_v30 = vld [vmem:[#allocation8] sm:$0xf]  ;;  %v6366_v40 = vor.u32 %v8892_v28, %v6365_v27  ;;  %1038 = vmatpush.bf16.msrb.mxu2 %v6238_v36  ;;  %v8802_v27 = vld [vmem:[#allocation8 + $0xc4] sm:$0xf] }
  0x5c   :  { %v8792_v31 = vld [vmem:[#allocation8 + $0x1c] sm:$0xf0]  ;;  %v6015_v28 = vld [vmem:[#allocation8 + $0xe0] sm:$0xf0] }
  0x5d   :  { %v6093_v33 = vld [vmem:[#allocation8 + $0x200] sm:$0xf]  ;;  %v5966_v44 = vor.u32 %v8792_v31, %v5965_v30  ;;  %1051 = vmatpush.bf16.msrb.mxu3 %v6366_v40  ;;  %v6143_v30 = vld [vmem:[#allocation8 + $0x2e0] sm:$0xf0]  ;;  %v6290_v31 = vor.u32 %v8870_v21, %v6287_v22  ;;  %v6130_v40 = vor.u32 %v8830_v37, %v6127_v38  ;;  %v6213_v22 = vld [vmem:[#allocation8 + $0x3c8] sm:$0xf] }
  0x5e   :  { %v8824_v34 = vld [vmem:[#allocation8 + $0x21c] sm:$0xf0]  ;;  %v5999_v36 = vld [vmem:[#allocation8 + $0xa0] sm:$0xf0] }
  0x5f   :  { %v6221_v41 = vld [vmem:[#allocation8 + $0x400] sm:$0xf]  ;;  %v6094_v48 = vor.u32 %v8824_v34, %v6093_v33  ;;  %1013 = vmatpush.bf16.msrb.mxu0 %v5966_v44  ;;  %v6018_v33 = vor.u32 %v8802_v27, %v6015_v28  ;;  %v6146_v34 = vor.u32 %v8834_v29, %v6143_v30  ;;  %v6002_v39 = vor.u32 %v8798_v35, %v5999_v36  ;;  %v8794_v47 = vld [vmem:[#allocation8 + $0x44] sm:$0xf]  ;;  %v8849_v35 = vld [vmem:[#allocation8 + $0x3a4] sm:$0xf0] }
  0x60   :  { %v8856_v42 = vld [vmem:[#allocation8 + $0x41c] sm:$0xf0]  ;;  %v8826_v50 = vld [vmem:[#allocation8 + $0x244] sm:$0xf]  ;;  %v139_v29 = vperm.slane %v134_v13, 3 }
  0x61   :  { %v6349_v43 = vld [vmem:[#allocation8 + $0x600] sm:$0xf]  ;;  %v6222_v55 = vor.u32 %v8856_v42, %v6221_v41  ;;  %1026 = vmatpush.bf16.msrb.mxu1 %v6094_v48  ;;  %v8866_v41 = vld [vmem:[#allocation8 + $0x4c4] sm:$0xf] }
  0x62   :  { %v8888_v45 = vld [vmem:[#allocation8 + $0x61c] sm:$0xf0]  ;;  %v6271_v42 = vld [vmem:[#allocation8 + $0x4e0] sm:$0xf0] }
  0x63   :  { %v6350_v58 = vor.u32 %v8888_v45, %v6349_v43  ;;  %1058 = vmatpush.bf16.msra.mxu0 %v6082_v49  ;;  %1039 = vmatpush.bf16.msrb.mxu2 %v6222_v55  ;;  %v8898_v43 = vld [vmem:[#allocation8 + $0x6c4] sm:$0xf]  ;;  %v6274_v44 = vor.u32 %v8866_v41, %v6271_v42  ;;  %v6341_v41 = vld [vmem:[#allocation8 + $0x5c8] sm:$0xf] }
  0x64   :  { %v6399_v45 = vld [vmem:[#allocation8 + $0x6e0] sm:$0xf0]  ;;  %v8885_v42 = vld [vmem:[#allocation8 + $0x5e4] sm:$0xf0] }
  0x65   :  { %1071 = vmatpush.bf16.msra.mxu1 %v6210_v52  ;;  %1052 = vmatpush.bf16.msrb.mxu3 %v6350_v58  ;;  %v6402_v46 = vor.u32 %v8898_v43, %v6399_v45  ;;  %v5983_v48 = vld [vmem:[#allocation8 + $0x60] sm:$0xf0]  ;;  %v6469_v43 = vld [vmem:[#allocation8 + $0x7c8] sm:$0xf] }
  0x66   :  { %v5986_v49 = vor.u32 %v8794_v47, %v5983_v48  ;;  %v6111_v51 = vld [vmem:[#allocation8 + $0x260] sm:$0xf0]  ;;  %v8917_v47 = vld [vmem:[#allocation8 + $0x7e4] sm:$0xf0] }
  0x67   :  { %1084 = vmatpush.bf16.msra.mxu2 %v6338_v59  ;;  %1059 = vmatpush.bf16.msra.mxu0 %v6066_v63  ;;  %v6114_v52 = vor.u32 %v8826_v50, %v6111_v51  ;;  %v8862_v53 = vld [vmem:[#allocation8 + $0x484] sm:$0xf]  ;;  %v6053_v48 = vld [vmem:[#allocation8 + $0x148] sm:$0xf] }
  0x68   :  { %v6255_v54 = vld [vmem:[#allocation8 + $0x4a0] sm:$0xf0]  ;;  %v6181_v51 = vld [vmem:[#allocation8 + $0x348] sm:$0xf] }
  0x69   :  { %1097 = vmatpush.bf16.msra.mxu3 %v6466_v60  ;;  %1072 = vmatpush.bf16.msra.mxu1 %v6194_v2  ;;  %v8894_v55 = vld [vmem:[#allocation8 + $0x684] sm:$0xf]  ;;  %v6258_v56 = vor.u32 %v8862_v53, %v6255_v54  ;;  %v6342_v54 = vor.u32 %v8885_v42, %v6341_v41  ;;  %v8797_v41 = vld [vmem:[#allocation8 + $0x64] sm:$0xf0] }
  0x6a   :  { %v6383_v57 = vld [vmem:[#allocation8 + $0x6a0] sm:$0xf0]  ;;  %v6117_v42 = vld [vmem:[#allocation8 + $0x248] sm:$0xf] }
  0x6b   :  { %1085 = vmatpush.bf16.msra.mxu2 %v6322_v7  ;;  %1060 = vmatpush.bf16.msra.mxu0 %v6050_v11  ;;  %v6386_v58 = vor.u32 %v8894_v55, %v6383_v57  ;;  %v8790_v59 = vld [vmem:[#allocation8 + $0x4] sm:$0xf] }
  0x6c   :  { %v5967_v60 = vld [vmem:[#allocation8 + $0x20] sm:$0xf0] }
  0x6d   :  { %1098 = vmatpush.bf16.msra.mxu3 %v6450_v8  ;;  %1073 = vmatpush.bf16.msra.mxu1 %v6178_v14  ;;  %v8822_v61 = vld [vmem:[#allocation8 + $0x204] sm:$0xf]  ;;  %v5970_v62 = vor.u32 %v8790_v59, %v5967_v60  ;;  %v136_v14 = vperm.slane %v134_v13, 0  ;;  %v8881_v59 = vld [vmem:[#allocation8 + $0x5a4] sm:$0xf0] }
  0x6e   :  { %v6095_v63 = vld [vmem:[#allocation8 + $0x220] sm:$0xf0]  ;;  %v6453_v60 = vld [vmem:[#allocation8 + $0x788] sm:$0xf] }
  0x6f   :  { %1086 = vmatpush.bf16.msra.mxu2 %v6306_v19  ;;  %1061 = vmatpush.bf16.msra.mxu0 %v6034_v23  ;;  %v6098_v0 = vor.u32 %v8822_v61, %v6095_v63  ;;  %v8858_v1 = vld [vmem:[#allocation8 + $0x444] sm:$0xf]  ;;  %v6085_v19 = vld [vmem:[#allocation8 + $0x1c8] sm:$0xf] }
  0x70   :  { %v6239_v2 = vld [vmem:[#allocation8 + $0x460] sm:$0xf0]  ;;  %v8853_v23 = vld [vmem:[#allocation8 + $0x3e4] sm:$0xf0] }
  0x71   :  { %1099 = vmatpush.bf16.msra.mxu3 %v6434_v20  ;;  %1074 = vmatpush.bf16.msra.mxu1 %v6162_v26  ;;  %v6242_v3 = vor.u32 %v8858_v1, %v6239_v2  ;;  %v8890_v4 = vld [vmem:[#allocation8 + $0x644] sm:$0xf]  ;;  %v8821_v20 = vld [vmem:[#allocation8 + $0x1e4] sm:$0xf0]  ;;  %v138_v26 = vperm.slane %v134_v13, 2  ;;  %v6214_v30 = vor.u32 %v8853_v23, %v6213_v22 }
  0x72   :  { %v6367_v5 = vld [vmem:[#allocation8 + $0x660] sm:$0xf0]  ;;  %v6086_v27 = vor.u32 %v8821_v20, %v6085_v19  ;;  %v8913_v63 = vld [vmem:[#allocation8 + $0x7a4] sm:$0xf0] }
  0x73   :  { %1087 = vmatpush.bf16.msra.mxu2 %v6290_v31  ;;  %1062 = vmatpush.bf16.msra.mxu0 %v6018_v33  ;;  %v6370_v6 = vor.u32 %v8890_v4, %v6367_v5  ;;  %v8854_v7 = vld [vmem:[#allocation8 + $0x404] sm:$0xf]  ;;  %v6069_v31 = vld [vmem:[#allocation8 + $0x188] sm:$0xf] }
  0x74   :  { %v6223_v8 = vld [vmem:[#allocation8 + $0x420] sm:$0xf0]  ;;  %v8809_v1 = vld [vmem:[#allocation8 + $0x124] sm:$0xf0] }
  0x75   :  { %1100 = vmatpush.bf16.msra.mxu3 %v6418_v32  ;;  %1075 = vmatpush.bf16.msra.mxu1 %v6146_v34  ;;  %v6226_v9 = vor.u32 %v8854_v7, %v6223_v8  ;;  %v8886_v10 = vld [vmem:[#allocation8 + $0x604] sm:$0xf]  ;;  %v8817_v32 = vld [vmem:[#allocation8 + $0x1a4] sm:$0xf0]  ;;  %v6454_v7 = vor.u32 %v8913_v63, %v6453_v60  ;;  %v8851_v60 = vld [vmem:[#allocation8 + $0x3cc] sm:$0xf] }
  0x76   :  { %v6351_v11 = vld [vmem:[#allocation8 + $0x620] sm:$0xf0]  ;;  %v6197_v34 = vld [vmem:[#allocation8 + $0x388] sm:$0xf] }
  0x77   :  { %1063 = vmatpush.bf16.msra.mxu0 %v6002_v39  ;;  %1088 = vmatpush.bf16.msra.mxu2 %v6274_v44  ;;  %v6354_v12 = vor.u32 %v8886_v10, %v6351_v11  ;;  %v6165_v2 = vld [vmem:[#allocation8 + $0x308] sm:$0xf] }
  0x78   :  { %v8877_v10 = vld [vmem:[#allocation8 + $0x564] sm:$0xf0] }
  0x79   :  { %1076 = vmatpush.bf16.msra.mxu1 %v6130_v40  ;;  %1101 = vmatpush.bf16.msra.mxu3 %v6402_v46  ;;  %v6070_v40 = vor.u32 %v8817_v32, %v6069_v31  ;;  %v6198_v46 = vor.u32 %v8849_v35, %v6197_v34  ;;  %v8909_v13 = vld [vmem:[#allocation8 + $0x764] sm:$0xf0] }
  0x7a   :  { %v6293_v20 = vld [vmem:[#allocation8 + $0x508] sm:$0xf] }
  0x7b   :  { %1064 = vmatpush.bf16.msra.mxu0 %v5986_v49  ;;  %1089 = vmatpush.bf16.msra.mxu2 %v6258_v56  ;;  %v8813_v49 = vld [vmem:[#allocation8 + $0x164] sm:$0xf0]  ;;  %v6470_v56 = vor.u32 %v8917_v47, %v6469_v43 }
  0x7c   :  { %v6054_v57 = vor.u32 %v8813_v49, %v6053_v48  ;;  %v6277_v34 = vld [vmem:[#allocation8 + $0x4c8] sm:$0xf] }
  0x7d   :  { %1077 = vmatpush.bf16.msra.mxu1 %v6114_v52  ;;  %1102 = vmatpush.bf16.msra.mxu3 %v6386_v58  ;;  %v8845_v52 = vld [vmem:[#allocation8 + $0x364] sm:$0xf0] }
  0x7e   :  { %v6325_v58 = vld [vmem:[#allocation8 + $0x588] sm:$0xf] }
  0x7f   :  { %1065 = vmatpush.bf16.msra.mxu0 %v5970_v62  ;;  %1090 = vmatpush.bf16.msra.mxu2 %v6242_v3  ;;  %v6182_v62 = vor.u32 %v8845_v52, %v6181_v51  ;;  %v8841_v3 = vld [vmem:[#allocation8 + $0x324] sm:$0xf0]  ;;  %v6326_v5 = vor.u32 %v8881_v59, %v6325_v58  ;;  %v6087_v59 = vld [vmem:[#allocation8 + $0x1e8] sm:$0xf0] }
  0x80   :  { %v6166_v11 = vor.u32 %v8841_v3, %v6165_v2  ;;  %v8869_v35 = vld [vmem:[#allocation8 + $0x4e4] sm:$0xf0] }
  0x81   :  { %1078 = vmatpush.bf16.msra.mxu1 %v6098_v0  ;;  %1103 = vmatpush.bf16.msra.mxu3 %v6370_v6  ;;  %v6037_v0 = vld [vmem:[#allocation8 + $0x108] sm:$0xf] }
  0x82   :  { %v6038_v8 = vor.u32 %v8809_v1, %v6037_v0  ;;  %v8829_v43 = vld [vmem:[#allocation8 + $0x264] sm:$0xf0] }
  0x83   :  { %1091 = vmatpush.bf16.msra.mxu2 %v6226_v9  ;;  %v6309_v9 = vld [vmem:[#allocation8 + $0x548] sm:$0xf] }
  0x84   :  { %v8865_v47 = vld [vmem:[#allocation8 + $0x4a4] sm:$0xf0] }
  0x85   :  { %1104 = vmatpush.bf16.msra.mxu3 %v6354_v12  ;;  %v6437_v12 = vld [vmem:[#allocation8 + $0x748] sm:$0xf] }
  0x86   :  { %v6438_v19 = vor.u32 %v8909_v13, %v6437_v12  ;;  %v6389_v48 = vld [vmem:[#allocation8 + $0x688] sm:$0xf]  ;;  %v6199_v12 = vld [vmem:[#allocation8 + $0x3a8] sm:$0xf0] }
  0x87   :  { %v8897_v51 = vld [vmem:[#allocation8 + $0x6a4] sm:$0xf0] }
  0x88   :  { %v5973_v52 = vld [vmem:[#allocation8 + $0x8] sm:$0xf]  ;;  %v6390_v63 = vor.u32 %v8897_v51, %v6389_v48  ;;  %v6439_v51 = vld [vmem:[#allocation8 + $0x768] sm:$0xf0] }
  0x89   :  { %v6245_v0 = vld [vmem:[#allocation8 + $0x448] sm:$0xf] }
  0x8a   :  { %v8861_v1 = vld [vmem:[#allocation8 + $0x464] sm:$0xf0] }
  0xa4   :  { %v177_v16 = vpop.f32.mrf.mxu0  ;;  %v190_v18 = vpop.f32.mrf.mxu1 }
  0xa5   :  { %v178_v17 = vadd.f32 %v177_v16, %v136_v14  ;;  %v191_v21 = vadd.f32 %v190_v18, %v137_v15  ;;  %v6021_v14 = vld [vmem:[#allocation8 + $0xc8] sm:$0xf]  ;;  %v6310_v18 = vor.u32 %v8877_v10, %v6309_v9  ;;  %v6246_v9 = vor.u32 %v8861_v1, %v6245_v0  ;;  %v6071_v10 = vld [vmem:[#allocation8 + $0x1a8] sm:$0xf0] }
  0xa6   :  { %v8805_v15 = vld [vmem:[#allocation8 + $0xe4] sm:$0xf0]  ;;  %v8903_v0 = vld [vmem:[#allocation8 + $0x70c] sm:$0xf] }
  0xa7   :  { %v220_v24 = vmax.f32 %v178_v17, 0.0  ;;  %v221_v25 = vmax.f32 %v191_v21, 0.0  ;;  %v6149_v16 = vld [vmem:[#allocation8 + $0x2c8] sm:$0xf]  ;;  %v6022_v22 = vor.u32 %v8805_v15, %v6021_v14  ;;  %v6423_v1 = vld [vmem:[#allocation8 + $0x728] sm:$0xf0] }
  0xa8   :  { %v8837_v17 = vld [vmem:[#allocation8 + $0x2e4] sm:$0xf0] }
  0xa9   :  { %v9817_v28 = vpack.c.bf16 %v220_v24, %v220_v24  ;;  %v9819_v33 = vpack.c.bf16 %v221_v25, %v221_v25  ;;  %v8873_v21 = vld [vmem:[#allocation8 + $0x524] sm:$0xf0]  ;;  %v6150_v23 = vor.u32 %v8837_v17, %v6149_v16 }
  0xaa   :  { %v6421_v24 = vld [vmem:[#allocation8 + $0x708] sm:$0xf]  ;;  %v6294_v31 = vor.u32 %v8873_v21, %v6293_v20 }
  0xab   :  { %v203_v36 = vpop.f32.mrf.mxu2  ;;  %1014 = vmatmul.bf16.vlgmr.msrb.gmra.mxu0 %v9817_v28  ;;  %1027 = vmatmul.bf16.vlgmr.msrb.gmra.mxu1 %v9819_v33  ;;  %v8905_v25 = vld [vmem:[#allocation8 + $0x724] sm:$0xf0] }
  0xac   :  { %v204_v37 = vadd.f32 %v203_v36, %v138_v26  ;;  %v216_v38 = vpop.f32.mrf.mxu3  ;;  %1110 = vmatpush.bf16.msrb.mxu0 %v6086_v27  ;;  %v179_v39 = vpop.f32.mrf.mxu0  ;;  %1123 = vmatpush.bf16.msrb.mxu1 %v6214_v30  ;;  %v6005_v26 = vld [vmem:[#allocation8 + $0x88] sm:$0xf]  ;;  %v6422_v32 = vor.u32 %v8905_v25, %v6421_v24  ;;  %v8811_v24 = vld [vmem:[#allocation8 + $0x14c] sm:$0xf] }
  0xad   :  { %v217_v44 = vadd.f32 %v216_v38, %v139_v29  ;;  %v192_v45 = vpop.f32.mrf.mxu1  ;;  %v8801_v27 = vld [vmem:[#allocation8 + $0xa4] sm:$0xf0] }
  0xae   :  { %v222_v50 = vmax.f32 %v204_v37, 0.0  ;;  %v6133_v29 = vld [vmem:[#allocation8 + $0x288] sm:$0xf]  ;;  %v6006_v36 = vor.u32 %v8801_v27, %v6005_v26  ;;  %v6055_v26 = vld [vmem:[#allocation8 + $0x168] sm:$0xf0] }
  0xaf   :  { %v223_v53 = vmax.f32 %v217_v44, 0.0  ;;  %v8833_v30 = vld [vmem:[#allocation8 + $0x2a4] sm:$0xf0]  ;;  %v6278_v44 = vor.u32 %v8869_v35, %v6277_v34  ;;  %v8843_v27 = vld [vmem:[#allocation8 + $0x34c] sm:$0xf] }
  0xb0   :  { %v9823_v55 = vpack.c.bf16 %v222_v50, %v222_v50  ;;  %1111 = vmatpush.bf16.msrb.mxu0 %v6070_v40  ;;  %1124 = vmatpush.bf16.msrb.mxu1 %v6198_v46  ;;  %v6134_v37 = vor.u32 %v8833_v30, %v6133_v29  ;;  %v6405_v38 = vld [vmem:[#allocation8 + $0x6c8] sm:$0xf]  ;;  %v6118_v50 = vor.u32 %v8829_v43, %v6117_v42  ;;  %v6183_v29 = vld [vmem:[#allocation8 + $0x368] sm:$0xf0] }
  0xb1   :  { %v9825_v61 = vpack.c.bf16 %v223_v53, %v223_v53  ;;  %v8901_v39 = vld [vmem:[#allocation8 + $0x6e4] sm:$0xf0]  ;;  %v8879_v34 = vld [vmem:[#allocation8 + $0x58c] sm:$0xf] }
  0xb2   :  { %1040 = vmatmul.bf16.vlgmr.msrb.gmra.mxu2 %v9823_v55  ;;  %v5989_v40 = vld [vmem:[#allocation8 + $0x48] sm:$0xf]  ;;  %v6406_v45 = vor.u32 %v8901_v39, %v6405_v38  ;;  %v6327_v35 = vld [vmem:[#allocation8 + $0x5a8] sm:$0xf0] }
  0xb3   :  { %1053 = vmatmul.bf16.vlgmr.msrb.gmra.mxu3 %v9825_v61  ;;  %1136 = vmatpush.bf16.msrb.mxu2 %v6342_v54  ;;  %v205_v4 = vpop.f32.mrf.mxu2  ;;  %v6261_v46 = vld [vmem:[#allocation8 + $0x488] sm:$0xf]  ;;  %v5990_v49 = vor.u32 %v8797_v41, %v5989_v40  ;;  %v8911_v38 = vld [vmem:[#allocation8 + $0x78c] sm:$0xf] }
  0xb4   :  { %1149 = vmatpush.bf16.msrb.mxu3 %v6470_v56  ;;  %v218_v6 = vpop.f32.mrf.mxu3  ;;  %1112 = vmatpush.bf16.msrb.mxu0 %v6054_v57  ;;  %v8793_v53 = vld [vmem:[#allocation8 + $0x24] sm:$0xf0]  ;;  %v8819_v57 = vld [vmem:[#allocation8 + $0x1cc] sm:$0xf]  ;;  %v6262_v58 = vor.u32 %v8865_v47, %v6261_v46 }
  0xb5   :  { %1125 = vmatpush.bf16.msrb.mxu1 %v6182_v62  ;;  %v6101_v54 = vld [vmem:[#allocation8 + $0x208] sm:$0xf]  ;;  %v6215_v62 = vld [vmem:[#allocation8 + $0x3e8] sm:$0xf0]  ;;  %v5974_v2 = vor.u32 %v8793_v53, %v5973_v52  ;;  %v6090_v6 = vor.u32 %v8819_v57, %v6087_v59 }
  0xb6   :  { %v8825_v56 = vld [vmem:[#allocation8 + $0x224] sm:$0xf0]  ;;  %v6455_v39 = vld [vmem:[#allocation8 + $0x7a8] sm:$0xf0] }
  0xb7   :  { %1137 = vmatpush.bf16.msrb.mxu2 %v6326_v5  ;;  %v6102_v3 = vor.u32 %v8825_v56, %v6101_v54  ;;  %v6373_v4 = vld [vmem:[#allocation8 + $0x648] sm:$0xf]  ;;  %v8807_v40 = vld [vmem:[#allocation8 + $0x10c] sm:$0xf] }
  0xb8   :  { %1150 = vmatpush.bf16.msrb.mxu3 %v6454_v7  ;;  %1113 = vmatpush.bf16.msrb.mxu0 %v6038_v8  ;;  %v8893_v5 = vld [vmem:[#allocation8 + $0x664] sm:$0xf0]  ;;  %v6218_v7 = vor.u32 %v8851_v60, %v6215_v62  ;;  %v8815_v8 = vld [vmem:[#allocation8 + $0x18c] sm:$0xf] }
  0xb9   :  { %1126 = vmatpush.bf16.msrb.mxu1 %v6166_v11  ;;  %v8847_v11 = vld [vmem:[#allocation8 + $0x38c] sm:$0xf]  ;;  %v6374_v13 = vor.u32 %v8893_v5, %v6373_v4  ;;  %v6229_v14 = vld [vmem:[#allocation8 + $0x408] sm:$0xf]  ;;  %v6074_v20 = vor.u32 %v8815_v8, %v6071_v10 }
  0xba   :  { %v8857_v15 = vld [vmem:[#allocation8 + $0x424] sm:$0xf0]  ;;  %v6202_v21 = vor.u32 %v8847_v11, %v6199_v12  ;;  %v6039_v41 = vld [vmem:[#allocation8 + $0x128] sm:$0xf0] }
  0xbb   :  { %1138 = vmatpush.bf16.msrb.mxu2 %v6310_v18  ;;  %1066 = vmatmul.bf16.vlgmr.msra.gmra.mxu0 %v9817_v28  ;;  %v6357_v16 = vld [vmem:[#allocation8 + $0x608] sm:$0xf]  ;;  %v8883_v18 = vld [vmem:[#allocation8 + $0x5cc] sm:$0xf]  ;;  %v6230_v25 = vor.u32 %v8857_v15, %v6229_v14  ;;  %v6042_v48 = vor.u32 %v8807_v40, %v6039_v41 }
  0xbc   :  { %1151 = vmatpush.bf16.msrb.mxu3 %v6438_v19  ;;  %1079 = vmatmul.bf16.vlgmr.msra.gmra.mxu1 %v9819_v33  ;;  %v8889_v17 = vld [vmem:[#allocation8 + $0x624] sm:$0xf0]  ;;  %v6343_v19 = vld [vmem:[#allocation8 + $0x5e8] sm:$0xf0] }
  0xbd   :  { %1114 = vmatpush.bf16.msrb.mxu0 %v6022_v22  ;;  %1127 = vmatpush.bf16.msrb.mxu1 %v6150_v23  ;;  %v8915_v22 = vld [vmem:[#allocation8 + $0x7cc] sm:$0xf]  ;;  %v6358_v30 = vor.u32 %v8889_v17, %v6357_v16 }
  0xbe   :  { %v6471_v23 = vld [vmem:[#allocation8 + $0x7e8] sm:$0xf0] }
  0xbf   :  { %1139 = vmatpush.bf16.msrb.mxu2 %v6294_v31  ;;  %v6346_v31 = vor.u32 %v8883_v18, %v6343_v19  ;;  %v8839_v42 = vld [vmem:[#allocation8 + $0x30c] sm:$0xf] }
  0xc0   :  { %1152 = vmatpush.bf16.msrb.mxu3 %v6422_v32  ;;  %v6474_v32 = vor.u32 %v8915_v22, %v6471_v23  ;;  %v6167_v43 = vld [vmem:[#allocation8 + $0x328] sm:$0xf0] }
  0xc1   :  { %1115 = vmatpush.bf16.msrb.mxu0 %v6006_v36  ;;  %1128 = vmatpush.bf16.msrb.mxu1 %v6134_v37  ;;  %v6058_v36 = vor.u32 %v8811_v24, %v6055_v26  ;;  %v6186_v37 = vor.u32 %v8843_v27, %v6183_v29  ;;  %v8875_v46 = vld [vmem:[#allocation8 + $0x54c] sm:$0xf] }
  0xc2   :  { %1092 = vmatmul.bf16.vlgmr.msra.gmra.mxu2 %v9823_v55  ;;  %v6311_v47 = vld [vmem:[#allocation8 + $0x568] sm:$0xf0] }
  0xc3   :  { %1105 = vmatmul.bf16.vlgmr.msra.gmra.mxu3 %v9825_v61  ;;  %1140 = vmatpush.bf16.msrb.mxu2 %v6278_v44  ;;  %v6330_v44 = vor.u32 %v8879_v34, %v6327_v35  ;;  %v8803_v52 = vld [vmem:[#allocation8 + $0xcc] sm:$0xf]  ;;  %v6314_v57 = vor.u32 %v8875_v46, %v6311_v47  ;;  %v9172_v34 = vld [vmem:[#allocation8 + $0x1ec] sm:$0xf0] }
  0xc4   :  { %1153 = vmatpush.bf16.msrb.mxu3 %v6406_v45  ;;  %v6458_v45 = vor.u32 %v8911_v38, %v6455_v39  ;;  %v6023_v53 = vld [vmem:[#allocation8 + $0xe8] sm:$0xf0]  ;;  %v6717_v35 = vld [vmem:[#allocation8 + $0x3d0] sm:$0xf] }
  0xc5   :  { %1116 = vmatpush.bf16.msrb.mxu0 %v5990_v49  ;;  %1129 = vmatpush.bf16.msrb.mxu1 %v6118_v50  ;;  %v6170_v49 = vor.u32 %v8839_v42, %v6167_v43  ;;  %v8907_v50 = vld [vmem:[#allocation8 + $0x74c] sm:$0xf]  ;;  %v6026_v62 = vor.u32 %v8803_v52, %v6023_v53  ;;  %v6573_v46 = vld [vmem:[#allocation8 + $0x190] sm:$0xf] }
  0xc6   :  { %v8835_v54 = vld [vmem:[#allocation8 + $0x2cc] sm:$0xf] }
  0xc7   :  { %1141 = vmatpush.bf16.msrb.mxu2 %v6262_v58  ;;  %v6151_v56 = vld [vmem:[#allocation8 + $0x2e8] sm:$0xf0]  ;;  %v6442_v58 = vor.u32 %v8907_v50, %v6439_v51  ;;  %v9200_v50 = vld [vmem:[#allocation8 + $0x3ac] sm:$0xf0] }
  0xc8   :  { %1154 = vmatpush.bf16.msrb.mxu3 %v6390_v63  ;;  %v8871_v59 = vld [vmem:[#allocation8 + $0x50c] sm:$0xf]  ;;  %v6154_v63 = vor.u32 %v8835_v54, %v6151_v56 }
  0xc9   :  { %1117 = vmatpush.bf16.msrb.mxu0 %v5974_v2  ;;  %1130 = vmatpush.bf16.msrb.mxu1 %v6102_v3  ;;  %v6295_v60 = vld [vmem:[#allocation8 + $0x528] sm:$0xf0] }
  0xca   :  { %v8799_v2 = vld [vmem:[#allocation8 + $0x8c] sm:$0xf] }
  0xcb   :  { %1142 = vmatpush.bf16.msrb.mxu2 %v6246_v9  ;;  %v6007_v3 = vld [vmem:[#allocation8 + $0xa8] sm:$0xf0] }
  0xcc   :  { %1155 = vmatpush.bf16.msrb.mxu3 %v6374_v13  ;;  %1118 = vmatmul.bf16.vlgmr.msrb.gmra.mxu0 %v9817_v28  ;;  %v8831_v4 = vld [vmem:[#allocation8 + $0x28c] sm:$0xf]  ;;  %v6010_v10 = vor.u32 %v8799_v2, %v6007_v3  ;;  %v9164_v2 = vld [vmem:[#allocation8 + $0x16c] sm:$0xf0] }
  0xcd   :  { %1162 = vmatpush.bf16.msra.mxu0 %v6090_v6  ;;  %1175 = vmatpush.bf16.msra.mxu1 %v6218_v7  ;;  %v6135_v5 = vld [vmem:[#allocation8 + $0x2a8] sm:$0xf0]  ;;  %v6298_v6 = vor.u32 %v8871_v59, %v6295_v60  ;;  %v6426_v7 = vor.u32 %v8903_v0, %v6423_v1  ;;  %v6557_v1 = vld [vmem:[#allocation8 + $0x150] sm:$0xf] }
  0xce   :  { %1131 = vmatmul.bf16.vlgmr.msrb.gmra.mxu1 %v9819_v33  ;;  %v8867_v8 = vld [vmem:[#allocation8 + $0x4cc] sm:$0xf]  ;;  %v6138_v11 = vor.u32 %v8831_v4, %v6135_v5  ;;  %v6685_v5 = vld [vmem:[#allocation8 + $0x350] sm:$0xf] }
  0xcf   :  { %1143 = vmatpush.bf16.msrb.mxu2 %v6230_v25  ;;  %v6279_v9 = vld [vmem:[#allocation8 + $0x4e8] sm:$0xf0] }
  0xd0   :  { %1156 = vmatpush.bf16.msrb.mxu3 %v6358_v30  ;;  %v8899_v12 = vld [vmem:[#allocation8 + $0x6cc] sm:$0xf]  ;;  %v6282_v18 = vor.u32 %v8867_v8, %v6279_v9  ;;  %v6829_v8 = vld [vmem:[#allocation8 + $0x590] sm:$0xf] }
  0xd1   :  { %1163 = vmatpush.bf16.msra.mxu0 %v6074_v20  ;;  %1176 = vmatpush.bf16.msra.mxu1 %v6202_v21  ;;  %v6407_v13 = vld [vmem:[#allocation8 + $0x6e8] sm:$0xf0]  ;;  %v9232_v9 = vld [vmem:[#allocation8 + $0x5ac] sm:$0xf0] }
  0xd2   :  { %1144 = vmatmul.bf16.vlgmr.msrb.gmra.mxu2 %v9823_v55  ;;  %v8795_v14 = vld [vmem:[#allocation8 + $0x4c] sm:$0xf]  ;;  %v6410_v19 = vor.u32 %v8899_v12, %v6407_v13  ;;  %v9264_v12 = vld [vmem:[#allocation8 + $0x7ac] sm:$0xf0] }
  0xd3   :  { %1188 = vmatpush.bf16.msra.mxu2 %v6346_v31  ;;  %1157 = vmatmul.bf16.vlgmr.msrb.gmra.mxu3 %v9825_v61  ;;  %v5991_v15 = vld [vmem:[#allocation8 + $0x68] sm:$0xf0]  ;;  %v6589_v31 = vld [vmem:[#allocation8 + $0x1d0] sm:$0xf] }
  0xd4   :  { %1201 = vmatpush.bf16.msra.mxu3 %v6474_v32  ;;  %v8827_v16 = vld [vmem:[#allocation8 + $0x24c] sm:$0xf]  ;;  %v5994_v23 = vor.u32 %v8795_v14, %v5991_v15  ;;  %v6541_v14 = vld [vmem:[#allocation8 + $0x110] sm:$0xf] }
  0xd5   :  { %1164 = vmatpush.bf16.msra.mxu0 %v6058_v36  ;;  %1177 = vmatpush.bf16.msra.mxu1 %v6186_v37  ;;  %v6119_v17 = vld [vmem:[#allocation8 + $0x268] sm:$0xf0]  ;;  %v9204_v36 = vld [vmem:[#allocation8 + $0x3ec] sm:$0xf0] }
  0xd6   :  { %v8863_v20 = vld [vmem:[#allocation8 + $0x48c] sm:$0xf]  ;;  %v6122_v24 = vor.u32 %v8827_v16, %v6119_v17  ;;  %v9160_v15 = vld [vmem:[#allocation8 + $0x12c] sm:$0xf0]  ;;  %v6830_v16 = vor.u32 %v9232_v9, %v6829_v8  ;;  %v6591_v8 = vld [vmem:[#allocation8 + $0x1f0] sm:$0xf0] }
  0xd7   :  { %1189 = vmatpush.bf16.msra.mxu2 %v6330_v44  ;;  %v6263_v21 = vld [vmem:[#allocation8 + $0x4a8] sm:$0xf0]  ;;  %v6590_v44 = vor.u32 %v9172_v34, %v6589_v31  ;;  %v6669_v17 = vld [vmem:[#allocation8 + $0x310] sm:$0xf]  ;;  %v9202_v9 = vld [vmem:[#allocation8 + $0x3d4] sm:$0xf] }
  0xd8   :  { %1202 = vmatpush.bf16.msra.mxu3 %v6458_v45  ;;  %v8895_v22 = vld [vmem:[#allocation8 + $0x68c] sm:$0xf]  ;;  %v6266_v32 = vor.u32 %v8863_v20, %v6263_v21  ;;  %v6718_v45 = vor.u32 %v9204_v36, %v6717_v35  ;;  %v6813_v20 = vld [vmem:[#allocation8 + $0x550] sm:$0xf] }
  0xd9   :  { %1165 = vmatpush.bf16.msra.mxu0 %v6042_v48  ;;  %1178 = vmatpush.bf16.msra.mxu1 %v6170_v49  ;;  %v6391_v25 = vld [vmem:[#allocation8 + $0x6a8] sm:$0xf0]  ;;  %v9168_v48 = vld [vmem:[#allocation8 + $0x1ac] sm:$0xf0] }
  0xda   :  { %v8791_v26 = vld [vmem:[#allocation8 + $0xc] sm:$0xf]  ;;  %v6394_v37 = vor.u32 %v8895_v22, %v6391_v25  ;;  %v6701_v49 = vld [vmem:[#allocation8 + $0x390] sm:$0xf]  ;;  %v6574_v59 = vor.u32 %v9168_v48, %v6573_v46  ;;  %v6542_v22 = vor.u32 %v9160_v15, %v6541_v14 }
  0xdb   :  { %1190 = vmatpush.bf16.msra.mxu2 %v6314_v57  ;;  %v5975_v27 = vld [vmem:[#allocation8 + $0x28] sm:$0xf0]  ;;  %v6845_v57 = vld [vmem:[#allocation8 + $0x5d0] sm:$0xf]  ;;  %v6702_v60 = vor.u32 %v9200_v50, %v6701_v49 }
  0xdc   :  { %1203 = vmatpush.bf16.msra.mxu3 %v6442_v58  ;;  %v8823_v29 = vld [vmem:[#allocation8 + $0x20c] sm:$0xf]  ;;  %v5978_v40 = vor.u32 %v8791_v26, %v5975_v27  ;;  %v9236_v58 = vld [vmem:[#allocation8 + $0x5ec] sm:$0xf0] }
  0xdd   :  { %1166 = vmatpush.bf16.msra.mxu0 %v6026_v62  ;;  %1179 = vmatpush.bf16.msra.mxu1 %v6154_v63  ;;  %v6103_v30 = vld [vmem:[#allocation8 + $0x228] sm:$0xf0]  ;;  %v6973_v62 = vld [vmem:[#allocation8 + $0x7d0] sm:$0xf]  ;;  %v6846_v4 = vor.u32 %v9236_v58, %v6845_v57 }
  0xde   :  { %v8859_v38 = vld [vmem:[#allocation8 + $0x44c] sm:$0xf]  ;;  %v6106_v41 = vor.u32 %v8823_v29, %v6103_v30  ;;  %v9268_v63 = vld [vmem:[#allocation8 + $0x7ec] sm:$0xf0] }
  0xdf   :  { %1191 = vmatpush.bf16.msra.mxu2 %v6298_v6  ;;  %v6247_v39 = vld [vmem:[#allocation8 + $0x468] sm:$0xf0]  ;;  %v9196_v6 = vld [vmem:[#allocation8 + $0x36c] sm:$0xf0] }
  0xe0   :  { %1204 = vmatpush.bf16.msra.mxu3 %v6426_v7  ;;  %v8891_v42 = vld [vmem:[#allocation8 + $0x64c] sm:$0xf]  ;;  %v6250_v47 = vor.u32 %v8859_v38, %v6247_v39  ;;  %v6974_v7 = vor.u32 %v9268_v63, %v6973_v62  ;;  %v6686_v13 = vor.u32 %v9196_v6, %v6685_v5  ;;  %v9228_v21 = vld [vmem:[#allocation8 + $0x56c] sm:$0xf0] }
  0xe1   :  { %1167 = vmatpush.bf16.msra.mxu0 %v6010_v10  ;;  %1180 = vmatpush.bf16.msra.mxu1 %v6138_v11  ;;  %v6375_v43 = vld [vmem:[#allocation8 + $0x668] sm:$0xf0]  ;;  %v6558_v10 = vor.u32 %v9164_v2, %v6557_v1  ;;  %v6957_v11 = vld [vmem:[#allocation8 + $0x790] sm:$0xf]  ;;  %v6814_v29 = vor.u32 %v9228_v21, %v6813_v20 }
  0xe2   :  { %v6378_v51 = vor.u32 %v8891_v42, %v6375_v43  ;;  %v8855_v52 = vld [vmem:[#allocation8 + $0x40c] sm:$0xf]  ;;  %v6525_v26 = vld [vmem:[#allocation8 + $0xd0] sm:$0xf] }
  0xe3   :  { %1192 = vmatpush.bf16.msra.mxu2 %v6282_v18  ;;  %v6231_v53 = vld [vmem:[#allocation8 + $0x428] sm:$0xf0]  ;;  %v9192_v18 = vld [vmem:[#allocation8 + $0x32c] sm:$0xf0] }
  0xe4   :  { %1205 = vmatpush.bf16.msra.mxu3 %v6410_v19  ;;  %v8887_v54 = vld [vmem:[#allocation8 + $0x60c] sm:$0xf]  ;;  %v6234_v0 = vor.u32 %v8855_v52, %v6231_v53  ;;  %v6958_v19 = vor.u32 %v9264_v12, %v6957_v11  ;;  %v6670_v25 = vor.u32 %v9192_v18, %v6669_v17  ;;  %v9156_v27 = vld [vmem:[#allocation8 + $0xec] sm:$0xf0]  ;;  %v6719_v11 = vld [vmem:[#allocation8 + $0x3f0] sm:$0xf0] }
  0xe5   :  { %1168 = vmatpush.bf16.msra.mxu0 %v5994_v23  ;;  %1181 = vmatpush.bf16.msra.mxu1 %v6122_v24  ;;  %v6359_v56 = vld [vmem:[#allocation8 + $0x628] sm:$0xf0]  ;;  %v6941_v23 = vld [vmem:[#allocation8 + $0x750] sm:$0xf]  ;;  %v6526_v36 = vor.u32 %v9156_v27, %v6525_v26  ;;  %v6722_v20 = vor.u32 %v9202_v9, %v6719_v11  ;;  %v6799_v9 = vld [vmem:[#allocation8 + $0x530] sm:$0xf0] }
  0xe6   :  { %v6362_v3 = vor.u32 %v8887_v54, %v6359_v56  ;;  %v9260_v24 = vld [vmem:[#allocation8 + $0x76c] sm:$0xf0]  ;;  %v9254_v11 = vld [vmem:[#allocation8 + $0x714] sm:$0xf] }
  0xe7   :  { %1193 = vmatpush.bf16.msra.mxu2 %v6266_v32  ;;  %v6653_v30 = vld [vmem:[#allocation8 + $0x2d0] sm:$0xf]  ;;  %v6942_v32 = vor.u32 %v9260_v24, %v6941_v23  ;;  %v9198_v23 = vld [vmem:[#allocation8 + $0x394] sm:$0xf] }
  0xe8   :  { %1206 = vmatpush.bf16.msra.mxu3 %v6394_v37  ;;  %v9188_v31 = vld [vmem:[#allocation8 + $0x2ec] sm:$0xf0]  ;;  %v6703_v24 = vld [vmem:[#allocation8 + $0x3b0] sm:$0xf0] }
  0xe9   :  { %1169 = vmatpush.bf16.msra.mxu0 %v5978_v40  ;;  %1182 = vmatpush.bf16.msra.mxu1 %v6106_v41  ;;  %v6797_v34 = vld [vmem:[#allocation8 + $0x510] sm:$0xf]  ;;  %v6654_v39 = vor.u32 %v9188_v31, %v6653_v30  ;;  %v9234_v31 = vld [vmem:[#allocation8 + $0x5d4] sm:$0xf] }
  0xea   :  { %v9224_v35 = vld [vmem:[#allocation8 + $0x52c] sm:$0xf0] }
  0xeb   :  { %1194 = vmatpush.bf16.msra.mxu2 %v6250_v47  ;;  %v6925_v37 = vld [vmem:[#allocation8 + $0x710] sm:$0xf]  ;;  %v6798_v42 = vor.u32 %v9224_v35, %v6797_v34  ;;  %v9266_v35 = vld [vmem:[#allocation8 + $0x7d4] sm:$0xf] }
  0xec   :  { %1207 = vmatpush.bf16.msra.mxu3 %v6378_v51  ;;  %1170 = vmatmul.bf16.vlgmr.msra.gmra.mxu0 %v9817_v28  ;;  %v9256_v38 = vld [vmem:[#allocation8 + $0x72c] sm:$0xf0] }
  0xed   :  { %2256 = vmatpush.bf16.msrb.mxu0 %v6590_v44  ;;  %2269 = vmatpush.bf16.msrb.mxu1 %v6718_v45  ;;  %v6509_v40 = vld [vmem:[#allocation8 + $0x90] sm:$0xf]  ;;  %v6926_v45 = vor.u32 %v9256_v38, %v6925_v37  ;;  %v6706_v37 = vor.u32 %v9198_v23, %v6703_v24  ;;  %v9250_v23 = vld [vmem:[#allocation8 + $0x6d4] sm:$0xf] }
  0xee   :  { %1183 = vmatmul.bf16.vlgmr.msra.gmra.mxu1 %v9819_v33  ;;  %v9152_v41 = vld [vmem:[#allocation8 + $0xac] sm:$0xf0]  ;;  %v6911_v24 = vld [vmem:[#allocation8 + $0x6f0] sm:$0xf0] }
  0xef   :  { %1195 = vmatpush.bf16.msra.mxu2 %v6234_v0  ;;  %v6637_v43 = vld [vmem:[#allocation8 + $0x290] sm:$0xf]  ;;  %v6510_v48 = vor.u32 %v9152_v41, %v6509_v40  ;;  %v6559_v40 = vld [vmem:[#allocation8 + $0x170] sm:$0xf0] }
  0xf0   :  { %1208 = vmatpush.bf16.msra.mxu3 %v6362_v3  ;;  %v9184_v44 = vld [vmem:[#allocation8 + $0x2ac] sm:$0xf0] }
  0xf1   :  { %2257 = vmatpush.bf16.msrb.mxu0 %v6574_v59  ;;  %2270 = vmatpush.bf16.msrb.mxu1 %v6702_v60  ;;  %v6781_v46 = vld [vmem:[#allocation8 + $0x4d0] sm:$0xf]  ;;  %v6638_v51 = vor.u32 %v9184_v44, %v6637_v43  ;;  %v9194_v43 = vld [vmem:[#allocation8 + $0x354] sm:$0xf] }
  0xf2   :  { %1196 = vmatmul.bf16.vlgmr.msra.gmra.mxu2 %v9823_v55  ;;  %v9220_v47 = vld [vmem:[#allocation8 + $0x4ec] sm:$0xf0]  ;;  %v6687_v44 = vld [vmem:[#allocation8 + $0x370] sm:$0xf0] }
  0xf3   :  { %2282 = vmatpush.bf16.msrb.mxu2 %v6846_v4  ;;  %1209 = vmatmul.bf16.vlgmr.msra.gmra.mxu3 %v9825_v61  ;;  %v6909_v49 = vld [vmem:[#allocation8 + $0x6d0] sm:$0xf]  ;;  %v6782_v54 = vor.u32 %v9220_v47, %v6781_v46  ;;  %v9230_v46 = vld [vmem:[#allocation8 + $0x594] sm:$0xf] }
  0xf4   :  { %2295 = vmatpush.bf16.msrb.mxu3 %v6974_v7  ;;  %v9252_v50 = vld [vmem:[#allocation8 + $0x6ec] sm:$0xf0]  ;;  %v9170_v7 = vld [vmem:[#allocation8 + $0x1d4] sm:$0xf] }
  0xf5   :  { %2258 = vmatpush.bf16.msrb.mxu0 %v6558_v10  ;;  %2271 = vmatpush.bf16.msrb.mxu1 %v6686_v13  ;;  %v6493_v52 = vld [vmem:[#allocation8 + $0x50] sm:$0xf]  ;;  %v6910_v58 = vor.u32 %v9252_v50, %v6909_v49  ;;  %v6594_v18 = vor.u32 %v9170_v7, %v6591_v8  ;;  %v6831_v47 = vld [vmem:[#allocation8 + $0x5b0] sm:$0xf0] }
  0xf6   :  { %v9148_v53 = vld [vmem:[#allocation8 + $0x6c] sm:$0xf0]  ;;  %v9262_v49 = vld [vmem:[#allocation8 + $0x794] sm:$0xf] }
  0xf7   :  { %2283 = vmatpush.bf16.msrb.mxu2 %v6830_v16  ;;  %v6621_v56 = vld [vmem:[#allocation8 + $0x250] sm:$0xf]  ;;  %v6494_v62 = vor.u32 %v9148_v53, %v6493_v52  ;;  %v6959_v50 = vld [vmem:[#allocation8 + $0x7b0] sm:$0xf0] }
  0xf8   :  { %2296 = vmatpush.bf16.msrb.mxu3 %v6958_v19  ;;  %v9180_v57 = vld [vmem:[#allocation8 + $0x26c] sm:$0xf0]  ;;  %v9166_v19 = vld [vmem:[#allocation8 + $0x194] sm:$0xf] }
  0xf9   :  { %2259 = vmatpush.bf16.msrb.mxu0 %v6542_v22  ;;  %2272 = vmatpush.bf16.msrb.mxu1 %v6670_v25  ;;  %v6765_v59 = vld [vmem:[#allocation8 + $0x490] sm:$0xf]  ;;  %v6622_v2 = vor.u32 %v9180_v57, %v6621_v56  ;;  %v6575_v22 = vld [vmem:[#allocation8 + $0x1b0] sm:$0xf0] }
  0xfa   :  { %v9216_v60 = vld [vmem:[#allocation8 + $0x4ac] sm:$0xf0]  ;;  %v6578_v34 = vor.u32 %v9166_v19, %v6575_v22  ;;  %v9158_v52 = vld [vmem:[#allocation8 + $0x114] sm:$0xf] }
  0xfb   :  { %2284 = vmatpush.bf16.msrb.mxu2 %v6814_v29  ;;  %v6893_v63 = vld [vmem:[#allocation8 + $0x690] sm:$0xf]  ;;  %v6766_v6 = vor.u32 %v9216_v60, %v6765_v59  ;;  %v6543_v53 = vld [vmem:[#allocation8 + $0x130] sm:$0xf0] }
  0xfc   :  { %2297 = vmatpush.bf16.msrb.mxu3 %v6942_v32  ;;  %v9248_v0 = vld [vmem:[#allocation8 + $0x6ac] sm:$0xf0]  ;;  %v6847_v32 = vld [vmem:[#allocation8 + $0x5f0] sm:$0xf0] }
  0xfd   :  { %2260 = vmatpush.bf16.msrb.mxu0 %v6526_v36  ;;  %2273 = vmatpush.bf16.msrb.mxu1 %v6654_v39  ;;  %v6477_v1 = vld [vmem:[#allocation8 + $0x10] sm:$0xf]  ;;  %v6894_v10 = vor.u32 %v9248_v0, %v6893_v63  ;;  %v6975_v36 = vld [vmem:[#allocation8 + $0x7f0] sm:$0xf0] }
  0xfe   :  { %v9144_v3 = vld [vmem:[#allocation8 + $0x2c] sm:$0xf0]  ;;  %v9162_v39 = vld [vmem:[#allocation8 + $0x154] sm:$0xf] }
  0xff   :  { %2285 = vmatpush.bf16.msrb.mxu2 %v6798_v42  ;;  %v6605_v4 = vld [vmem:[#allocation8 + $0x210] sm:$0xf]  ;;  %v6478_v14 = vor.u32 %v9144_v3, %v6477_v1  ;;  %v6850_v42 = vor.u32 %v9234_v31, %v6847_v32  ;;  %v9190_v56 = vld [vmem:[#allocation8 + $0x314] sm:$0xf]  ;;  %v6914_v32 = vor.u32 %v9250_v23, %v6911_v24 }
 0x100   :  { %2298 = vmatpush.bf16.msrb.mxu3 %v6926_v45  ;;  %v9176_v5 = vld [vmem:[#allocation8 + $0x22c] sm:$0xf0]  ;;  %v6978_v45 = vor.u32 %v9266_v35, %v6975_v36  ;;  %v6671_v57 = vld [vmem:[#allocation8 + $0x330] sm:$0xf0] }
 0x101   :  { %2261 = vmatpush.bf16.msrb.mxu0 %v6510_v48  ;;  %2274 = vmatpush.bf16.msrb.mxu1 %v6638_v51  ;;  %v6749_v12 = vld [vmem:[#allocation8 + $0x450] sm:$0xf]  ;;  %v6606_v17 = vor.u32 %v9176_v5, %v6605_v4  ;;  %v6562_v48 = vor.u32 %v9162_v39, %v6559_v40  ;;  %v6690_v51 = vor.u32 %v9194_v43, %v6687_v44  ;;  %v9226_v59 = vld [vmem:[#allocation8 + $0x554] sm:$0xf] }
 0x102   :  { %v9212_v13 = vld [vmem:[#allocation8 + $0x46c] sm:$0xf0]  ;;  %v6815_v60 = vld [vmem:[#allocation8 + $0x570] sm:$0xf0]  ;;  %v6674_v1 = vor.u32 %v9190_v56, %v6671_v57 }
 0x103   :  { %2286 = vmatpush.bf16.msrb.mxu2 %v6782_v54  ;;  %v6877_v15 = vld [vmem:[#allocation8 + $0x650] sm:$0xf]  ;;  %v6750_v21 = vor.u32 %v9212_v13, %v6749_v12  ;;  %v6834_v54 = vor.u32 %v9230_v46, %v6831_v47  ;;  %v9258_v63 = vld [vmem:[#allocation8 + $0x754] sm:$0xf]  ;;  %v6818_v4 = vor.u32 %v9226_v59, %v6815_v60  ;;  %v9173_v46 = vld [vmem:[#allocation8 + $0x1f4] sm:$0xf0] }
 0x104   :  { %2299 = vmatpush.bf16.msrb.mxu3 %v6910_v58  ;;  %v9244_v16 = vld [vmem:[#allocation8 + $0x66c] sm:$0xf0]  ;;  %v6962_v58 = vor.u32 %v9262_v49, %v6959_v50  ;;  %v6943_v0 = vld [vmem:[#allocation8 + $0x770] sm:$0xf0]  ;;  %v6725_v47 = vld [vmem:[#allocation8 + $0x3d8] sm:$0xf] }
 0x105   :  { %2262 = vmatpush.bf16.msrb.mxu0 %v6494_v62  ;;  %2275 = vmatpush.bf16.msrb.mxu1 %v6622_v2  ;;  %v6878_v25 = vor.u32 %v9244_v16, %v6877_v15  ;;  %v6733_v26 = vld [vmem:[#allocation8 + $0x410] sm:$0xf]  ;;  %v6546_v62 = vor.u32 %v9158_v52, %v6543_v53  ;;  %v9154_v2 = vld [vmem:[#allocation8 + $0xd4] sm:$0xf]  ;;  %v6946_v7 = vor.u32 %v9258_v63, %v6943_v0  ;;  %v9205_v49 = vld [vmem:[#allocation8 + $0x3f4] sm:$0xf0] }
 0x106   :  { %v9208_v27 = vld [vmem:[#allocation8 + $0x42c] sm:$0xf0]  ;;  %v6527_v3 = vld [vmem:[#allocation8 + $0xf0] sm:$0xf0]  ;;  %v6726_v59 = vor.u32 %v9205_v49, %v6725_v47  ;;  %v6709_v63 = vld [vmem:[#allocation8 + $0x398] sm:$0xf] }
 0x107   :  { %2287 = vmatpush.bf16.msrb.mxu2 %v6766_v6  ;;  %v6861_v29 = vld [vmem:[#allocation8 + $0x610] sm:$0xf]  ;;  %v6734_v38 = vor.u32 %v9208_v27, %v6733_v26  ;;  %v9186_v5 = vld [vmem:[#allocation8 + $0x2d4] sm:$0xf]  ;;  %v9201_v0 = vld [vmem:[#allocation8 + $0x3b4] sm:$0xf0] }
 0x108   :  { %2300 = vmatpush.bf16.msrb.mxu3 %v6894_v10  ;;  %v9240_v30 = vld [vmem:[#allocation8 + $0x62c] sm:$0xf0]  ;;  %v6655_v6 = vld [vmem:[#allocation8 + $0x2f0] sm:$0xf0]  ;;  %v6530_v10 = vor.u32 %v9154_v2, %v6527_v3  ;;  %v6661_v49 = vld [vmem:[#allocation8 + $0x2d8] sm:$0xf] }
 0x109   :  { %2263 = vmatpush.bf16.msrb.mxu0 %v6478_v14  ;;  %2276 = vmatpush.bf16.msrb.mxu1 %v6606_v17  ;;  %v6862_v41 = vor.u32 %v9240_v30, %v6861_v29  ;;  %v9222_v8 = vld [vmem:[#allocation8 + $0x514] sm:$0xf]  ;;  %v6658_v13 = vor.u32 %v9186_v5, %v6655_v6  ;;  %v6853_v6 = vld [vmem:[#allocation8 + $0x5d8] sm:$0xf] }
 0x10a   :  { %v6927_v12 = vld [vmem:[#allocation8 + $0x730] sm:$0xf0]  ;;  %v6802_v16 = vor.u32 %v9222_v8, %v6799_v9  ;;  %v6981_v9 = vld [vmem:[#allocation8 + $0x7d8] sm:$0xf] }
 0x10b   :  { %2288 = vmatpush.bf16.msrb.mxu2 %v6750_v21  ;;  %v9150_v14 = vld [vmem:[#allocation8 + $0x94] sm:$0xf]  ;;  %v6930_v19 = vor.u32 %v9254_v11, %v6927_v12  ;;  %v6710_v11 = vor.u32 %v9201_v0, %v6709_v63  ;;  %v6645_v63 = vld [vmem:[#allocation8 + $0x298] sm:$0xf] }
 0x10c   :  { %2301 = vmatpush.bf16.msrb.mxu3 %v6878_v25  ;;  %2264 = vmatmul.bf16.vlgmr.msrb.gmra.mxu0 %v9817_v28  ;;  %v6511_v15 = vld [vmem:[#allocation8 + $0xb0] sm:$0xf0]  ;;  %v9185_v0 = vld [vmem:[#allocation8 + $0x2b4] sm:$0xf0] }
 0x10d   :  { %2308 = vmatpush.bf16.msra.mxu0 %v6594_v18  ;;  %2321 = vmatpush.bf16.msra.mxu1 %v6722_v20  ;;  %v9182_v17 = vld [vmem:[#allocation8 + $0x294] sm:$0xf]  ;;  %v6514_v22 = vor.u32 %v9150_v14, %v6511_v15  ;;  %v9165_v14 = vld [vmem:[#allocation8 + $0x174] sm:$0xf0]  ;;  %v9845_v15 = vld [vmem:[#allocation10] sm:$0xf] }
 0x10e   :  { %2277 = vmatmul.bf16.vlgmr.msrb.gmra.mxu1 %v9819_v33  ;;  %v6639_v18 = vld [vmem:[#allocation8 + $0x2b0] sm:$0xf0]  ;;  %v358_v24 = vperm.slane %v9845_v15, 0 }
 0x10f   :  { %2289 = vmatpush.bf16.msrb.mxu2 %v6734_v38  ;;  %v9218_v20 = vld [vmem:[#allocation8 + $0x4d4] sm:$0xf]  ;;  %v6642_v25 = vor.u32 %v9182_v17, %v6639_v18  ;;  %v6693_v18 = vld [vmem:[#allocation8 + $0x358] sm:$0xf] }
 0x110   :  { %2302 = vmatpush.bf16.msrb.mxu3 %v6862_v41  ;;  %v6783_v21 = vld [vmem:[#allocation8 + $0x4f0] sm:$0xf0] }
 0x111   :  { %2309 = vmatpush.bf16.msra.mxu0 %v6578_v34  ;;  %2322 = vmatpush.bf16.msra.mxu1 %v6706_v37  ;;  %v9146_v26 = vld [vmem:[#allocation8 + $0x54] sm:$0xf]  ;;  %v6786_v29 = vor.u32 %v9218_v20, %v6783_v21  ;;  %v6837_v21 = vld [vmem:[#allocation8 + $0x598] sm:$0xf] }
 0x112   :  { %2290 = vmatmul.bf16.vlgmr.msrb.gmra.mxu2 %v9823_v55  ;;  %v6495_v27 = vld [vmem:[#allocation8 + $0x70] sm:$0xf0] }
 0x113   :  { %2334 = vmatpush.bf16.msra.mxu2 %v6850_v42  ;;  %2303 = vmatmul.bf16.vlgmr.msrb.gmra.mxu3 %v9825_v61  ;;  %v9178_v30 = vld [vmem:[#allocation8 + $0x254] sm:$0xf]  ;;  %v6498_v36 = vor.u32 %v9146_v26, %v6495_v27  ;;  %v9265_v26 = vld [vmem:[#allocation8 + $0x7b4] sm:$0xf0] }
 0x114   :  { %2347 = vmatpush.bf16.msra.mxu3 %v6978_v45  ;;  %v6623_v31 = vld [vmem:[#allocation8 + $0x270] sm:$0xf0]  ;;  %v6597_v45 = vld [vmem:[#allocation8 + $0x1d8] sm:$0xf] }
 0x115   :  { %2310 = vmatpush.bf16.msra.mxu0 %v6562_v48  ;;  %2323 = vmatpush.bf16.msra.mxu1 %v6690_v51  ;;  %v9214_v34 = vld [vmem:[#allocation8 + $0x494] sm:$0xf]  ;;  %v6626_v40 = vor.u32 %v9178_v30, %v6623_v31  ;;  %v6598_v57 = vor.u32 %v9173_v46, %v6597_v45  ;;  %v9161_v30 = vld [vmem:[#allocation8 + $0x134] sm:$0xf0] }
 0x116   :  { %v6767_v35 = vld [vmem:[#allocation8 + $0x4b0] sm:$0xf0]  ;;  %v6533_v45 = vld [vmem:[#allocation8 + $0xd8] sm:$0xf] }
 0x117   :  { %2335 = vmatpush.bf16.msra.mxu2 %v6834_v54  ;;  %v9246_v37 = vld [vmem:[#allocation8 + $0x694] sm:$0xf]  ;;  %v6770_v44 = vor.u32 %v9214_v34, %v6767_v35  ;;  %v9193_v34 = vld [vmem:[#allocation8 + $0x334] sm:$0xf0] }
 0x118   :  { %2348 = vmatpush.bf16.msra.mxu3 %v6962_v58  ;;  %v6895_v38 = vld [vmem:[#allocation8 + $0x6b0] sm:$0xf0]  ;;  %v6581_v58 = vld [vmem:[#allocation8 + $0x198] sm:$0xf] }
 0x119   :  { %2311 = vmatpush.bf16.msra.mxu0 %v6546_v62  ;;  %2324 = vmatpush.bf16.msra.mxu1 %v6674_v1  ;;  %v9142_v39 = vld [vmem:[#allocation8 + $0x14] sm:$0xf]  ;;  %v6898_v48 = vor.u32 %v9246_v37, %v6895_v38  ;;  %v9169_v62 = vld [vmem:[#allocation8 + $0x1b4] sm:$0xf0] }
 0x11a   :  { %v6479_v41 = vld [vmem:[#allocation8 + $0x30] sm:$0xf0]  ;;  %v6582_v8 = vor.u32 %v9169_v62, %v6581_v58  ;;  %v6821_v37 = vld [vmem:[#allocation8 + $0x558] sm:$0xf] }
 0x11b   :  { %2336 = vmatpush.bf16.msra.mxu2 %v6818_v4  ;;  %v9174_v42 = vld [vmem:[#allocation8 + $0x214] sm:$0xf]  ;;  %v6482_v52 = vor.u32 %v9142_v39, %v6479_v41  ;;  %v9229_v38 = vld [vmem:[#allocation8 + $0x574] sm:$0xf0] }
 0x11c   :  { %2349 = vmatpush.bf16.msra.mxu3 %v6946_v7  ;;  %v6607_v43 = vld [vmem:[#allocation8 + $0x230] sm:$0xf0]  ;;  %v9237_v7 = vld [vmem:[#allocation8 + $0x5f4] sm:$0xf0] }
 0x11d   :  { %2312 = vmatpush.bf16.msra.mxu0 %v6530_v10  ;;  %2325 = vmatpush.bf16.msra.mxu1 %v6658_v13  ;;  %v9210_v50 = vld [vmem:[#allocation8 + $0x454] sm:$0xf]  ;;  %v6610_v56 = vor.u32 %v9174_v42, %v6607_v43  ;;  %v9269_v10 = vld [vmem:[#allocation8 + $0x7f4] sm:$0xf0]  ;;  %v6854_v17 = vor.u32 %v9237_v7, %v6853_v6 }
 0x11e   :  { %v6751_v51 = vld [vmem:[#allocation8 + $0x470] sm:$0xf0]  ;;  %v6565_v13 = vld [vmem:[#allocation8 + $0x158] sm:$0xf]  ;;  %v6982_v20 = vor.u32 %v9269_v10, %v6981_v9  ;;  %v6646_v9 = vor.u32 %v9185_v0, %v6645_v63 }
 0x11f   :  { %2337 = vmatpush.bf16.msra.mxu2 %v6802_v16  ;;  %v9242_v53 = vld [vmem:[#allocation8 + $0x654] sm:$0xf]  ;;  %v6754_v60 = vor.u32 %v9210_v50, %v6751_v51  ;;  %v6566_v23 = vor.u32 %v9165_v14, %v6565_v13  ;;  %v6949_v42 = vld [vmem:[#allocation8 + $0x758] sm:$0xf] }
 0x120   :  { %2350 = vmatpush.bf16.msra.mxu3 %v6930_v19  ;;  %v6879_v54 = vld [vmem:[#allocation8 + $0x670] sm:$0xf0]  ;;  %v9197_v19 = vld [vmem:[#allocation8 + $0x374] sm:$0xf0] }
 0x121   :  { %2313 = vmatpush.bf16.msra.mxu0 %v6514_v22  ;;  %2326 = vmatpush.bf16.msra.mxu1 %v6642_v25  ;;  %v6882_v1 = vor.u32 %v9242_v53, %v6879_v54  ;;  %v9206_v2 = vld [vmem:[#allocation8 + $0x414] sm:$0xf]  ;;  %v9233_v22 = vld [vmem:[#allocation8 + $0x5b4] sm:$0xf0]  ;;  %v6694_v27 = vor.u32 %v9197_v19, %v6693_v18 }
 0x122   :  { %v6735_v3 = vld [vmem:[#allocation8 + $0x430] sm:$0xf0]  ;;  %v6965_v25 = vld [vmem:[#allocation8 + $0x798] sm:$0xf]  ;;  %v6838_v31 = vor.u32 %v9233_v22, %v6837_v21  ;;  %v359_v22 = vperm.slane %v9845_v15, 1 }
 0x123   :  { %2338 = vmatpush.bf16.msra.mxu2 %v6786_v29  ;;  %v9238_v4 = vld [vmem:[#allocation8 + $0x614] sm:$0xf]  ;;  %v6738_v12 = vor.u32 %v9206_v2, %v6735_v3  ;;  %v6549_v29 = vld [vmem:[#allocation8 + $0x118] sm:$0xf] }
 0x124   :  { %2351 = vmatpush.bf16.msra.mxu3 %v6914_v32  ;;  %v6863_v5 = vld [vmem:[#allocation8 + $0x630] sm:$0xf0]  ;;  %v6677_v32 = vld [vmem:[#allocation8 + $0x318] sm:$0xf]  ;;  %v6550_v41 = vor.u32 %v9161_v30, %v6549_v29 }
 0x125   :  { %2314 = vmatpush.bf16.msra.mxu0 %v6498_v36  ;;  %2327 = vmatpush.bf16.msra.mxu1 %v6626_v40  ;;  %v6866_v16 = vor.u32 %v9238_v4, %v6863_v5  ;;  %v6966_v36 = vor.u32 %v9265_v26, %v6965_v25  ;;  %v9261_v43 = vld [vmem:[#allocation8 + $0x774] sm:$0xf0] }
 0x126   :  { %v9157_v46 = vld [vmem:[#allocation8 + $0xf4] sm:$0xf0]  ;;  %v6950_v51 = vor.u32 %v9261_v43, %v6949_v42 }
 0x127   :  { %2339 = vmatpush.bf16.msra.mxu2 %v6770_v44  ;;  %v6678_v44 = vor.u32 %v9193_v34, %v6677_v32  ;;  %v9189_v50 = vld [vmem:[#allocation8 + $0x2f4] sm:$0xf0]  ;;  %v6534_v54 = vor.u32 %v9157_v46, %v6533_v45  ;;  %v9171_v34 = vld [vmem:[#allocation8 + $0x1dc] sm:$0xf] }
 0x128   :  { %2352 = vmatpush.bf16.msra.mxu3 %v6898_v48  ;;  %v1015_v35 = vpop.f32.mrf.mxu0  ;;  %v1028_v40 = vpop.f32.mrf.mxu1  ;;  %v6822_v48 = vor.u32 %v9229_v38, %v6821_v37  ;;  %v9225_v53 = vld [vmem:[#allocation8 + $0x534] sm:$0xf0]  ;;  %v6662_v58 = vor.u32 %v9189_v50, %v6661_v49  ;;  %v9167_v50 = vld [vmem:[#allocation8 + $0x19c] sm:$0xf] }
 0x129   :  { %2315 = vmatpush.bf16.msra.mxu0 %v6482_v52  ;;  %2328 = vmatpush.bf16.msra.mxu1 %v6610_v56  ;;  %v1016_v39 = vadd.f32 %v1015_v35, %v358_v24  ;;  %v6805_v52 = vld [vmem:[#allocation8 + $0x518] sm:$0xf]  ;;  %v6599_v35 = vld [vmem:[#allocation8 + $0x1f8] sm:$0xf0] }
 0x12a   :  { %v6933_v56 = vld [vmem:[#allocation8 + $0x718] sm:$0xf]  ;;  %v6806_v62 = vor.u32 %v9225_v53, %v6805_v52  ;;  %v6602_v49 = vor.u32 %v9171_v34, %v6599_v35  ;;  %v9227_v34 = vld [vmem:[#allocation8 + $0x55c] sm:$0xf] }
 0x12b   :  { %2340 = vmatpush.bf16.msra.mxu2 %v6754_v60  ;;  %v1029_v47 = vadd.f32 %v1028_v40, %v1016_v39  ;;  %v9153_v60 = vld [vmem:[#allocation8 + $0xb4] sm:$0xf0]  ;;  %v6727_v40 = vld [vmem:[#allocation8 + $0x3f8] sm:$0xf0] }
 0x12c   :  { %2353 = vmatpush.bf16.msra.mxu3 %v6882_v1  ;;  %2316 = vmatmul.bf16.vlgmr.msra.gmra.mxu0 %v9817_v28  ;;  %v6789_v3 = vld [vmem:[#allocation8 + $0x4d8] sm:$0xf]  ;;  %v6823_v35 = vld [vmem:[#allocation8 + $0x578] sm:$0xf0] }
 0x12d   :  { %2360 = vmatpush.bf16.msrb.mxu0 %v6598_v57  ;;  %2373 = vmatpush.bf16.msrb.mxu1 %v6726_v59  ;;  %v9257_v57 = vld [vmem:[#allocation8 + $0x734] sm:$0xf0] }
 0x12e   :  { %2329 = vmatmul.bf16.vlgmr.msra.gmra.mxu1 %v9819_v33  ;;  %v6517_v59 = vld [vmem:[#allocation8 + $0x98] sm:$0xf]  ;;  %v6934_v2 = vor.u32 %v9257_v57, %v6933_v56  ;;  %v9199_v56 = vld [vmem:[#allocation8 + $0x39c] sm:$0xf] }
 0x12f   :  { %2341 = vmatpush.bf16.msra.mxu2 %v6738_v12  ;;  %v9221_v4 = vld [vmem:[#allocation8 + $0x4f4] sm:$0xf0]  ;;  %v6518_v6 = vor.u32 %v9153_v60, %v6517_v59  ;;  %v6711_v57 = vld [vmem:[#allocation8 + $0x3b8] sm:$0xf0] }
 0x130   :  { %2354 = vmatpush.bf16.msra.mxu3 %v6866_v16  ;;  %v1017_v1 = vpop.f32.mrf.mxu0  ;;  %v1030_v5 = vpop.f32.mrf.mxu1  ;;  %v6917_v7 = vld [vmem:[#allocation8 + $0x6d8] sm:$0xf]  ;;  %v6790_v12 = vor.u32 %v9221_v4, %v6789_v3 }
 0x131   :  { %2361 = vmatpush.bf16.msrb.mxu0 %v6582_v8  ;;  %2374 = vmatpush.bf16.msrb.mxu1 %v6710_v11  ;;  %v9253_v8 = vld [vmem:[#allocation8 + $0x6f4] sm:$0xf0]  ;;  %v9235_v1 = vld [vmem:[#allocation8 + $0x5dc] sm:$0xf] }
 0x132   :  { %2342 = vmatmul.bf16.vlgmr.msra.gmra.mxu2 %v9823_v55  ;;  %v6501_v10 = vld [vmem:[#allocation8 + $0x58] sm:$0xf]  ;;  %v6918_v16 = vor.u32 %v9253_v8, %v6917_v7  ;;  %v9267_v5 = vld [vmem:[#allocation8 + $0x7dc] sm:$0xf]  ;;  %v6714_v7 = vor.u32 %v9199_v56, %v6711_v57 }
 0x133   :  { %2386 = vmatpush.bf16.msrb.mxu2 %v6854_v17  ;;  %2355 = vmatmul.bf16.vlgmr.msra.gmra.mxu3 %v9825_v61  ;;  %v9149_v11 = vld [vmem:[#allocation8 + $0x74] sm:$0xf0] }
 0x134   :  { %2399 = vmatpush.bf16.msrb.mxu3 %v6982_v20  ;;  %v6629_v13 = vld [vmem:[#allocation8 + $0x258] sm:$0xf]  ;;  %v6502_v21 = vor.u32 %v9149_v11, %v6501_v10  ;;  %v6567_v10 = vld [vmem:[#allocation8 + $0x178] sm:$0xf0] }
 0x135   :  { %2362 = vmatpush.bf16.msrb.mxu0 %v6566_v23  ;;  %2375 = vmatpush.bf16.msrb.mxu1 %v6694_v27  ;;  %v9181_v14 = vld [vmem:[#allocation8 + $0x274] sm:$0xf0]  ;;  %v1041_v20 = vpop.f32.mrf.mxu2 }
 0x136   :  { %v6773_v17 = vld [vmem:[#allocation8 + $0x498] sm:$0xf]  ;;  %v1042_v25 = vadd.f32 %v1041_v20, %v1029_v47  ;;  %v1054_v26 = vpop.f32.mrf.mxu3  ;;  %v6630_v27 = vor.u32 %v9181_v14, %v6629_v13  ;;  %v9195_v14 = vld [vmem:[#allocation8 + $0x35c] sm:$0xf] }
 0x137   :  { %2387 = vmatpush.bf16.msrb.mxu2 %v6838_v31  ;;  %v9217_v18 = vld [vmem:[#allocation8 + $0x4b4] sm:$0xf0]  ;;  %v6839_v20 = vld [vmem:[#allocation8 + $0x5b8] sm:$0xf0] }
 0x138   :  { %2400 = vmatpush.bf16.msrb.mxu3 %v6966_v36  ;;  %v6901_v19 = vld [vmem:[#allocation8 + $0x698] sm:$0xf]  ;;  %v6774_v32 = vor.u32 %v9217_v18, %v6773_v17  ;;  %v9203_v36 = vld [vmem:[#allocation8 + $0x3dc] sm:$0xf]  ;;  %v9853_v37 = vadd.f32 %v1054_v26, %v1042_v25  ;;  %v1067_v38 = vpop.f32.mrf.mxu0 }
 0x139   :  { %2363 = vmatpush.bf16.msrb.mxu0 %v6550_v41  ;;  %2376 = vmatpush.bf16.msrb.mxu1 %v6678_v44  ;;  %v9249_v23 = vld [vmem:[#allocation8 + $0x6b4] sm:$0xf0]  ;;  %v1068_v43 = vadd.f32 %v1067_v38, %v359_v22  ;;  %v1080_v44 = vpop.f32.mrf.mxu1  ;;  %v6730_v52 = vor.u32 %v9203_v36, %v6727_v40  ;;  %v9263_v22 = vld [vmem:[#allocation8 + $0x79c] sm:$0xf] }
 0x13a   :  { %v6485_v24 = vld [vmem:[#allocation8 + $0x18] sm:$0xf]  ;;  %v6902_v39 = vor.u32 %v9249_v23, %v6901_v19  ;;  %v9231_v19 = vld [vmem:[#allocation8 + $0x59c] sm:$0xf] }
 0x13b   :  { %2388 = vmatpush.bf16.msrb.mxu2 %v6822_v48  ;;  %v9145_v29 = vld [vmem:[#allocation8 + $0x34] sm:$0xf0]  ;;  %v6967_v23 = vld [vmem:[#allocation8 + $0x7b8] sm:$0xf0] }
 0x13c   :  { %2401 = vmatpush.bf16.msrb.mxu3 %v6950_v51  ;;  %v6613_v30 = vld [vmem:[#allocation8 + $0x218] sm:$0xf]  ;;  %v6486_v45 = vor.u32 %v9145_v29, %v6485_v24  ;;  %v1081_v51 = vadd.f32 %v1080_v44, %v1068_v43  ;;  %v9159_v25 = vld [vmem:[#allocation8 + $0x11c] sm:$0xf] }
 0x13d   :  { %2364 = vmatpush.bf16.msrb.mxu0 %v6534_v54  ;;  %2377 = vmatpush.bf16.msrb.mxu1 %v6662_v58  ;;  %v9177_v31 = vld [vmem:[#allocation8 + $0x234] sm:$0xf0]  ;;  %v6583_v54 = vld [vmem:[#allocation8 + $0x1b8] sm:$0xf0]  ;;  %v1043_v63 = vpop.f32.mrf.mxu2 }
 0x13e   :  { %v6757_v41 = vld [vmem:[#allocation8 + $0x458] sm:$0xf]  ;;  %v6614_v48 = vor.u32 %v9177_v31, %v6613_v30  ;;  %v1056_v3 = vpop.f32.mrf.mxu3  ;;  %v6586_v4 = vor.u32 %v9167_v50, %v6583_v54  ;;  %v6551_v26 = vld [vmem:[#allocation8 + $0x138] sm:$0xf0] }
 0x13f   :  { %2389 = vmatpush.bf16.msrb.mxu2 %v6806_v62  ;;  %v9213_v42 = vld [vmem:[#allocation8 + $0x474] sm:$0xf0]  ;;  %v9191_v29 = vld [vmem:[#allocation8 + $0x31c] sm:$0xf]  ;;  %v6554_v40 = vor.u32 %v9159_v25, %v6551_v26 }
 0x140   :  { %2402 = vmatpush.bf16.msrb.mxu3 %v6934_v2  ;;  %v6885_v46 = vld [vmem:[#allocation8 + $0x658] sm:$0xf]  ;;  %v6758_v53 = vor.u32 %v9213_v42, %v6757_v41  ;;  %v6855_v2 = vld [vmem:[#allocation8 + $0x5f8] sm:$0xf0]  ;;  %v1069_v11 = vpop.f32.mrf.mxu0 }
 0x141   :  { %2365 = vmatpush.bf16.msrb.mxu0 %v6518_v6  ;;  %2378 = vmatpush.bf16.msrb.mxu1 %v6646_v9  ;;  %v9245_v47 = vld [vmem:[#allocation8 + $0x674] sm:$0xf0]  ;;  %v6983_v6 = vld [vmem:[#allocation8 + $0x7f8] sm:$0xf0]  ;;  %v6858_v13 = vor.u32 %v9235_v1, %v6855_v2  ;;  %v1082_v17 = vpop.f32.mrf.mxu1 }
 0x142   :  { %v6886_v58 = vor.u32 %v9245_v47, %v6885_v46  ;;  %v6741_v59 = vld [vmem:[#allocation8 + $0x418] sm:$0xf]  ;;  %v9163_v9 = vld [vmem:[#allocation8 + $0x15c] sm:$0xf]  ;;  %v6986_v18 = vor.u32 %v9267_v5, %v6983_v6  ;;  %v6826_v47 = vor.u32 %v9227_v34, %v6823_v35  ;;  %v7185_v35 = vld [vmem:[#allocation11 + $0x888] sm:$0xf] }
 0x143   :  { %2390 = vmatpush.bf16.msrb.mxu2 %v6790_v12  ;;  %v9209_v60 = vld [vmem:[#allocation8 + $0x434] sm:$0xf0]  ;;  %v6679_v30 = vld [vmem:[#allocation8 + $0x338] sm:$0xf0] }
 0x144   :  { %2403 = vmatpush.bf16.msrb.mxu3 %v6918_v16  ;;  %v6869_v62 = vld [vmem:[#allocation8 + $0x618] sm:$0xf]  ;;  %v6742_v8 = vor.u32 %v9209_v60, %v6741_v59  ;;  %v6695_v16 = vld [vmem:[#allocation8 + $0x378] sm:$0xf0]  ;;  %v6682_v43 = vor.u32 %v9191_v29, %v6679_v30 }
 0x145   :  { %2366 = vmatpush.bf16.msrb.mxu0 %v6502_v21  ;;  %2379 = vmatpush.bf16.msrb.mxu1 %v6630_v27  ;;  %v9241_v0 = vld [vmem:[#allocation8 + $0x634] sm:$0xf0]  ;;  %v6570_v21 = vor.u32 %v9163_v9, %v6567_v10  ;;  %v6698_v24 = vor.u32 %v9195_v14, %v6695_v16  ;;  %v6842_v27 = vor.u32 %v9231_v19, %v6839_v20  ;;  %v1093_v31 = vpop.f32.mrf.mxu2  ;;  %v9259_v41 = vld [vmem:[#allocation8 + $0x75c] sm:$0xf] }
 0x146   :  { %v6870_v12 = vor.u32 %v9241_v0, %v6869_v62  ;;  %v1094_v36 = vadd.f32 %v1093_v31, %v1081_v51  ;;  %v1106_v38 = vpop.f32.mrf.mxu3  ;;  %v6951_v42 = vld [vmem:[#allocation8 + $0x778] sm:$0xf0] }
 0x147   :  { %2391 = vmatpush.bf16.msrb.mxu2 %v6774_v32  ;;  %v6970_v32 = vor.u32 %v9263_v22, %v6967_v23  ;;  %v9155_v44 = vld [vmem:[#allocation8 + $0xdc] sm:$0xf]  ;;  %v6954_v51 = vor.u32 %v9259_v41, %v6951_v42 }
 0x148   :  { %2404 = vmatpush.bf16.msrb.mxu3 %v6902_v39  ;;  %v360_v39 = vperm.slane %v9845_v15, 2  ;;  %v9860_v46 = vadd.f32 %v1106_v38, %v1094_v36  ;;  %v6935_v59 = vld [vmem:[#allocation8 + $0x738] sm:$0xf0]  ;;  %v9322_v36 = vld [vmem:[#allocation11 + $0x8a0] sm:$0xf0] }
 0x149   :  { %2367 = vmatpush.bf16.msrb.mxu0 %v6486_v45  ;;  %2380 = vmatpush.bf16.msrb.mxu1 %v6614_v48  ;;  %v6535_v45 = vld [vmem:[#allocation8 + $0xf8] sm:$0xf0]  ;;  %v1119_v50 = vpop.f32.mrf.mxu0 }
 0x14a   :  { %v9187_v48 = vld [vmem:[#allocation8 + $0x2dc] sm:$0xf]  ;;  %v1120_v54 = vadd.f32 %v1119_v50, %v360_v39  ;;  %v6538_v57 = vor.u32 %v9155_v44, %v6535_v45 }
 0x14b   :  { %2392 = vmatpush.bf16.msrb.mxu2 %v6758_v53  ;;  %v6807_v53 = vld [vmem:[#allocation8 + $0x538] sm:$0xf0]  ;;  %v1132_v56 = vpop.f32.mrf.mxu1 }
 0x14c   :  { %2405 = vmatpush.bf16.msrb.mxu3 %v6886_v58  ;;  %2368 = vmatmul.bf16.vlgmr.msrb.gmra.mxu0 %v9817_v28  ;;  %v9255_v58 = vld [vmem:[#allocation8 + $0x71c] sm:$0xf]  ;;  %v1133_v0 = vadd.f32 %v1132_v56, %v1120_v54 }
 0x14d   :  { %2412 = vmatpush.bf16.msra.mxu0 %v6602_v49  ;;  %2425 = vmatpush.bf16.msra.mxu1 %v6730_v52  ;;  %v6663_v49 = vld [vmem:[#allocation8 + $0x2f8] sm:$0xf0]  ;;  %v6938_v5 = vor.u32 %v9255_v58, %v6935_v59  ;;  %v7409_v58 = vld [vmem:[#allocation11 + $0xa48] sm:$0xf]  ;;  %v9378_v59 = vld [vmem:[#allocation11 + $0xa60] sm:$0xf0] }
 0x14e   :  { %2381 = vmatmul.bf16.vlgmr.msrb.gmra.mxu1 %v9819_v33  ;;  %v9223_v52 = vld [vmem:[#allocation8 + $0x51c] sm:$0xf]  ;;  %v6666_v60 = vor.u32 %v9187_v48, %v6663_v49  ;;  %v7186_v49 = vor.u32 %v9322_v36, %v7185_v35  ;;  %v9343_v35 = vld [vmem:[#allocation11 + $0x948] sm:$0xf0] }
 0x14f   :  { %2393 = vmatpush.bf16.msrb.mxu2 %v6742_v8  ;;  %v9151_v62 = vld [vmem:[#allocation8 + $0x9c] sm:$0xf]  ;;  %v6810_v1 = vor.u32 %v9223_v52, %v6807_v53  ;;  %v1108_v8 = vpop.f32.mrf.mxu3  ;;  %v7157_v52 = vld [vmem:[#allocation11 + $0x850] sm:$0xf]  ;;  %v9315_v53 = vld [vmem:[#allocation11 + $0x868] sm:$0xf0] }
 0x150   :  { %2406 = vmatpush.bf16.msrb.mxu3 %v6870_v12  ;;  %v6519_v63 = vld [vmem:[#allocation8 + $0xb8] sm:$0xf0] }
 0x151   :  { %2413 = vmatpush.bf16.msra.mxu0 %v6586_v4  ;;  %2426 = vmatpush.bf16.msra.mxu1 %v6714_v7  ;;  %v9183_v2 = vld [vmem:[#allocation8 + $0x29c] sm:$0xf]  ;;  %v1095_v4 = vpop.f32.mrf.mxu2  ;;  %v6522_v9 = vor.u32 %v9151_v62, %v6519_v63  ;;  %v1121_v19 = vpop.f32.mrf.mxu0  ;;  %v7410_v63 = vor.u32 %v9378_v59, %v7409_v58  ;;  %v7159_v58 = vld [vmem:[#allocation11 + $0x86c] sm:$0xf0]  ;;  %v7213_v59 = vld [vmem:[#allocation11 + $0x8c0] sm:$0xf] }
 0x152   :  { %2394 = vmatmul.bf16.vlgmr.msrb.gmra.mxu2 %v9823_v55  ;;  %v6647_v3 = vld [vmem:[#allocation8 + $0x2b8] sm:$0xf0]  ;;  %v7129_v4 = vld [vmem:[#allocation11 + $0x818] sm:$0xf]  ;;  %v7325_v19 = vld [vmem:[#allocation11 + $0x9a0] sm:$0xf] }
 0x153   :  { %2438 = vmatpush.bf16.msra.mxu2 %v6858_v13  ;;  %2407 = vmatmul.bf16.vlgmr.msrb.gmra.mxu3 %v9825_v61  ;;  %v9219_v6 = vld [vmem:[#allocation8 + $0x4dc] sm:$0xf]  ;;  %v6650_v12 = vor.u32 %v9183_v2, %v6647_v3  ;;  %v1134_v23 = vpop.f32.mrf.mxu1  ;;  %v9371_v2 = vld [vmem:[#allocation11 + $0xa28] sm:$0xf0] }
 0x154   :  { %2451 = vmatpush.bf16.msra.mxu3 %v6986_v18  ;;  %v6791_v7 = vld [vmem:[#allocation8 + $0x4f8] sm:$0xf0] }
 0x155   :  { %2414 = vmatpush.bf16.msra.mxu0 %v6570_v21  ;;  %2427 = vmatpush.bf16.msra.mxu1 %v6698_v24  ;;  %v9251_v10 = vld [vmem:[#allocation8 + $0x6dc] sm:$0xf]  ;;  %v6794_v16 = vor.u32 %v9219_v6, %v6791_v7 }
 0x156   :  { %v6919_v11 = vld [vmem:[#allocation8 + $0x6f8] sm:$0xf0] }
 0x157   :  { %2439 = vmatpush.bf16.msra.mxu2 %v6842_v27  ;;  %v9147_v13 = vld [vmem:[#allocation8 + $0x5c] sm:$0xf]  ;;  %v6922_v20 = vor.u32 %v9251_v10, %v6919_v11  ;;  %v1158_v42 = vpop.f32.mrf.mxu3  ;;  %v7101_v11 = vld [vmem:[#allocation11 + $0x7e0] sm:$0xf] }
 0x158   :  { %2452 = vmatpush.bf16.msra.mxu3 %v6970_v32  ;;  %v6503_v14 = vld [vmem:[#allocation8 + $0x78] sm:$0xf0] }
 0x159   :  { %2415 = vmatpush.bf16.msra.mxu0 %v6554_v40  ;;  %2428 = vmatpush.bf16.msra.mxu1 %v6682_v43  ;;  %v9179_v17 = vld [vmem:[#allocation8 + $0x25c] sm:$0xf]  ;;  %v6506_v24 = vor.u32 %v9147_v13, %v6503_v14  ;;  %v1145_v41 = vpop.f32.mrf.mxu2  ;;  %v7353_v13 = vld [vmem:[#allocation11 + $0x9d8] sm:$0xf] }
 0x15a   :  { %v6631_v18 = vld [vmem:[#allocation8 + $0x278] sm:$0xf0] }
 0x15b   :  { %2440 = vmatpush.bf16.msra.mxu2 %v6826_v47  ;;  %v9215_v21 = vld [vmem:[#allocation8 + $0x49c] sm:$0xf]  ;;  %v6634_v27 = vor.u32 %v9179_v17, %v6631_v18  ;;  %v1146_v47 = vadd.f32 %v1145_v41, %v1133_v0  ;;  %v7158_v0 = vor.u32 %v9315_v53, %v7157_v52  ;;  %v361_v17 = vperm.slane %v9845_v15, 3  ;;  %v9294_v18 = vld [vmem:[#allocation11 + $0x7c0] sm:$0xf0] }
 0x15c   :  { %2453 = vmatpush.bf16.msra.mxu3 %v6954_v51  ;;  %v6775_v22 = vld [vmem:[#allocation8 + $0x4b8] sm:$0xf0]  ;;  %v7297_v15 = vld [vmem:[#allocation11 + $0x968] sm:$0xf]  ;;  %v6989_v41 = vld [vmem:[#allocation11 + $0x700] sm:$0xf] }
 0x15d   :  { %2416 = vmatpush.bf16.msra.mxu0 %v6538_v57  ;;  %2429 = vmatpush.bf16.msra.mxu1 %v6666_v60  ;;  %v9247_v25 = vld [vmem:[#allocation8 + $0x69c] sm:$0xf]  ;;  %v6778_v32 = vor.u32 %v9215_v21, %v6775_v22  ;;  %v9862_v54 = vadd.f32 %v1158_v42, %v1146_v47  ;;  %v9273_v42 = vld [vmem:[#allocation11 + $0x718] sm:$0xf0] }
 0x15e   :  { %v6903_v26 = vld [vmem:[#allocation8 + $0x6b8] sm:$0xf0]  ;;  %v6990_v52 = vor.u32 %v9273_v42, %v6989_v41  ;;  %v9406_v41 = vld [vmem:[#allocation11 + $0xb40] sm:$0xf0]  ;;  %v9347_v42 = vld [vmem:[#allocation11 + $0x96c] sm:$0xf] }
 0x15f   :  { %2441 = vmatpush.bf16.msra.mxu2 %v6810_v1  ;;  %v9143_v29 = vld [vmem:[#allocation8 + $0x1c] sm:$0xf]  ;;  %v6906_v38 = vor.u32 %v9247_v25, %v6903_v26  ;;  %v7381_v1 = vld [vmem:[#allocation11 + $0xa10] sm:$0xf] }
 0x160   :  { %2454 = vmatpush.bf16.msra.mxu3 %v6938_v5  ;;  %v6487_v30 = vld [vmem:[#allocation8 + $0x38] sm:$0xf0]  ;;  %v7382_v6 = vor.u32 %v9371_v2, %v7381_v1  ;;  %v7045_v26 = vld [vmem:[#allocation11 + $0x770] sm:$0xf]  ;;  %v9375_v2 = vld [vmem:[#allocation11 + $0xa4c] sm:$0xf] }
 0x161   :  { %2417 = vmatpush.bf16.msra.mxu0 %v6522_v9  ;;  %2430 = vmatpush.bf16.msra.mxu1 %v6650_v12  ;;  %v9175_v31 = vld [vmem:[#allocation8 + $0x21c] sm:$0xf]  ;;  %v6490_v43 = vor.u32 %v9143_v29, %v6487_v30  ;;  %v1147_v8 = vpop.f32.mrf.mxu2  ;;  %v1160_v9 = vpop.f32.mrf.mxu3  ;;  %v9301_v12 = vld [vmem:[#allocation11 + $0x7f8] sm:$0xf0]  ;;  %v9350_v29 = vld [vmem:[#allocation11 + $0x980] sm:$0xf0] }
 0x162   :  { %v6615_v34 = vld [vmem:[#allocation8 + $0x238] sm:$0xf0]  ;;  %v7298_v30 = vor.u32 %v9350_v29, %v7297_v15  ;;  %v7605_v8 = vld [vmem:[#allocation11 + $0xbd0] sm:$0xf]  ;;  %v9427_v9 = vld [vmem:[#allocation11 + $0xbe8] sm:$0xf0] }
 0x163   :  { %2442 = vmatpush.bf16.msra.mxu2 %v6794_v16  ;;  %v9211_v39 = vld [vmem:[#allocation8 + $0x45c] sm:$0xf]  ;;  %v6618_v48 = vor.u32 %v9175_v31, %v6615_v34  ;;  %v7017_v31 = vld [vmem:[#allocation11 + $0x738] sm:$0xf]  ;;  %v7269_v34 = vld [vmem:[#allocation11 + $0x930] sm:$0xf] }
 0x164   :  { %2455 = vmatpush.bf16.msra.mxu3 %v6922_v20  ;;  %v6759_v40 = vld [vmem:[#allocation8 + $0x478] sm:$0xf0]  ;;  %v9357_v20 = vld [vmem:[#allocation11 + $0x9b8] sm:$0xf0]  ;;  %v9354_v29 = vld [vmem:[#allocation11 + $0x9a4] sm:$0xf] }
 0x165   :  { %2418 = vmatpush.bf16.msra.mxu0 %v6506_v24  ;;  %v9243_v44 = vld [vmem:[#allocation8 + $0x65c] sm:$0xf]  ;;  %2431 = vmatpush.bf16.msra.mxu1 %v6634_v27  ;;  %v6762_v50 = vor.u32 %v9211_v39, %v6759_v40  ;;  %v7326_v22 = vor.u32 %v9357_v20, %v7325_v19  ;;  %v9287_v27 = vld [vmem:[#allocation11 + $0x788] sm:$0xf0]  ;;  %v9361_v20 = vld [vmem:[#allocation11 + $0x9dc] sm:$0xf] }
 0x166   :  { %v6887_v45 = vld [vmem:[#allocation8 + $0x678] sm:$0xf0]  ;;  %v9413_v15 = vld [vmem:[#allocation11 + $0xb78] sm:$0xf0] }
 0x167   :  { %2443 = vmatpush.bf16.msra.mxu2 %v6778_v32  ;;  %v9207_v51 = vld [vmem:[#allocation8 + $0x41c] sm:$0xf]  ;;  %v6890_v56 = vor.u32 %v9243_v44, %v6887_v45  ;;  %v7187_v44 = vld [vmem:[#allocation11 + $0x8a4] sm:$0xf0]  ;;  %v7241_v45 = vld [vmem:[#allocation11 + $0x8f8] sm:$0xf] }
 0x168   :  { %2456 = vmatpush.bf16.msra.mxu3 %v6906_v38  ;;  %v6743_v57 = vld [vmem:[#allocation8 + $0x438] sm:$0xf0]  ;;  %v7270_v38 = vor.u32 %v9343_v35, %v7269_v34 }
 0x169   :  { %2419 = vmatpush.bf16.msra.mxu0 %v6490_v43  ;;  %v9239_v60 = vld [vmem:[#allocation8 + $0x61c] sm:$0xf]  ;;  %2432 = vmatpush.bf16.msra.mxu1 %v6618_v48  ;;  %v6746_v3 = vor.u32 %v9207_v51, %v6743_v57  ;;  %v1171_v21 = vpop.f32.mrf.mxu0  ;;  %v9319_v43 = vld [vmem:[#allocation11 + $0x88c] sm:$0xf] }
 0x16a   :  { %v6871_v62 = vld [vmem:[#allocation8 + $0x638] sm:$0xf0]  ;;  %v1172_v23 = vadd.f32 %v1171_v21, %v361_v17  ;;  %v7190_v53 = vor.u32 %v9319_v43, %v7187_v44  ;;  %v7299_v44 = vld [vmem:[#allocation11 + $0x984] sm:$0xf0] }
 0x16b   :  { %2444 = vmatpush.bf16.msra.mxu2 %v6762_v50  ;;  %v9308_v5 = vld [vmem:[#allocation11 + $0x830] sm:$0xf0]  ;;  %v6874_v7 = vor.u32 %v9239_v60, %v6871_v62  ;;  %v1184_v24 = vpop.f32.mrf.mxu1  ;;  %v9329_v60 = vld [vmem:[#allocation11 + $0x8d8] sm:$0xf0] }
 0x16c   :  { %2457 = vmatpush.bf16.msra.mxu3 %v6890_v56  ;;  %2420 = vmatmul.bf16.vlgmr.msra.gmra.mxu0 %v9817_v28  ;;  %v7130_v10 = vor.u32 %v9308_v5, %v7129_v4  ;;  %v9364_v14 = vld [vmem:[#allocation11 + $0x9f0] sm:$0xf0]  ;;  %v7102_v28 = vor.u32 %v9301_v12, %v7101_v11  ;;  %v7214_v62 = vor.u32 %v9329_v60, %v7213_v59  ;;  %v9305_v5 = vld [vmem:[#allocation11 + $0x81c] sm:$0xf]  ;;  %v7271_v59 = vld [vmem:[#allocation11 + $0x94c] sm:$0xf0] }
 0x16d   :  { %3880 = vmatpush.bf16.msrb.mxu0 %v7186_v49  ;;  %3893 = vmatpush.bf16.msrb.mxu1 %v7410_v63  ;;  %v7354_v16 = vor.u32 %v9364_v14, %v7353_v13  ;;  %v9280_v32 = vld [vmem:[#allocation11 + $0x750] sm:$0xf0]  ;;  %v7633_v63 = vld [vmem:[#allocation11 + $0xc08] sm:$0xf]  ;;  %v7606_v12 = vor.u32 %v9427_v9, %v7605_v8  ;;  %v7383_v13 = vld [vmem:[#allocation11 + $0xa2c] sm:$0xf0] }
 0x16e   :  { %2433 = vmatmul.bf16.vlgmr.msra.gmra.mxu1 %v9819_v33  ;;  %v7073_v33 = vld [vmem:[#allocation11 + $0x7a8] sm:$0xf]  ;;  %v7018_v40 = vor.u32 %v9280_v32, %v7017_v31  ;;  %v9336_v47 = vld [vmem:[#allocation11 + $0x910] sm:$0xf0]  ;;  %v7327_v31 = vld [vmem:[#allocation11 + $0x9bc] sm:$0xf0] }
 0x16f   :  { %2445 = vmatpush.bf16.msra.mxu2 %v6746_v3  ;;  %v7074_v25 = vor.u32 %v9294_v18, %v7073_v33  ;;  %v7242_v49 = vor.u32 %v9336_v47, %v7241_v45  ;;  %v9312_v56 = vld [vmem:[#allocation11 + $0x854] sm:$0xf]  ;;  %v7411_v3 = vld [vmem:[#allocation11 + $0xa64] sm:$0xf0]  ;;  %v7103_v33 = vld [vmem:[#allocation11 + $0x7fc] sm:$0xf0]  ;;  %v7330_v35 = vor.u32 %v9354_v29, %v7327_v31  ;;  %v7302_v47 = vor.u32 %v9347_v42, %v7299_v44 }
 0x170   :  { %2458 = vmatpush.bf16.msra.mxu3 %v6874_v7  ;;  %v7162_v4 = vor.u32 %v9312_v56, %v7159_v58  ;;  %v7414_v7 = vor.u32 %v9375_v2, %v7411_v3  ;;  %v7577_v18 = vld [vmem:[#allocation11 + $0xb98] sm:$0xf]  ;;  %v9420_v19 = vld [vmem:[#allocation11 + $0xbb0] sm:$0xf0]  ;;  %v7137_v42 = vld [vmem:[#allocation11 + $0x820] sm:$0xf] }
 0x171   :  { %3881 = vmatpush.bf16.msrb.mxu0 %v7158_v0  ;;  %3894 = vmatpush.bf16.msrb.mxu1 %v7382_v6  ;;  %v1173_v36 = vpop.f32.mrf.mxu0  ;;  %v9434_v0 = vld [vmem:[#allocation11 + $0xc20] sm:$0xf0]  ;;  %v7131_v6 = vld [vmem:[#allocation11 + $0x834] sm:$0xf0]  ;;  %v7578_v21 = vor.u32 %v9420_v19, %v7577_v18  ;;  %v7215_v19 = vld [vmem:[#allocation11 + $0x8dc] sm:$0xf0] }
 0x172   :  { %2446 = vmatmul.bf16.vlgmr.msra.gmra.mxu2 %v9823_v55  ;;  %v1185_v55 = vadd.f32 %v1184_v24, %v1172_v23  ;;  %v7634_v1 = vor.u32 %v9434_v0, %v7633_v63  ;;  %v7134_v17 = vor.u32 %v9305_v5, %v7131_v6  ;;  %v9270_v0 = vld [vmem:[#allocation11 + $0x704] sm:$0xf]  ;;  %v7465_v3 = vld [vmem:[#allocation11 + $0xab8] sm:$0xf]  ;;  %v9333_v5 = vld [vmem:[#allocation11 + $0x8fc] sm:$0xf] }
 0x173   :  { %2459 = vmatmul.bf16.vlgmr.msra.gmra.mxu3 %v9825_v61  ;;  %v7046_v61 = vor.u32 %v9287_v27, %v7045_v26  ;;  %v1186_v39 = vpop.f32.mrf.mxu1  ;;  %v9291_v26 = vld [vmem:[#allocation11 + $0x7ac] sm:$0xf]  ;;  %v7075_v27 = vld [vmem:[#allocation11 + $0x7c4] sm:$0xf0]  ;;  %v7243_v8 = vld [vmem:[#allocation11 + $0x914] sm:$0xf0] }
 0x174   :  { %3906 = vmatpush.bf16.msrb.mxu2 %v7634_v1  ;;  %v7078_v34 = vor.u32 %v9291_v26, %v7075_v27  ;;  %v7047_v39 = vld [vmem:[#allocation11 + $0x78c] sm:$0xf0]  ;;  %v6991_v1 = vld [vmem:[#allocation11 + $0x71c] sm:$0xf0]  ;;  %v9431_v27 = vld [vmem:[#allocation11 + $0xc0c] sm:$0xf] }
 0x175   :  { %3882 = vmatpush.bf16.msrb.mxu0 %v7130_v10  ;;  %3895 = vmatpush.bf16.msrb.mxu1 %v7354_v16  ;;  %v1197_v48 = vpop.f32.mrf.mxu2  ;;  %v9368_v10 = vld [vmem:[#allocation11 + $0xa14] sm:$0xf]  ;;  %v7165_v29 = vld [vmem:[#allocation11 + $0x858] sm:$0xf] }
 0x176   :  { %v1198_v50 = vadd.f32 %v1197_v48, %v1185_v55  ;;  %v1210_v51 = vpop.f32.mrf.mxu3  ;;  %v7386_v16 = vor.u32 %v9368_v10, %v7383_v13  ;;  %v7549_v55 = vld [vmem:[#allocation11 + $0xb60] sm:$0xf]  ;;  %v9277_v48 = vld [vmem:[#allocation11 + $0x73c] sm:$0xf]  ;;  %v7193_v13 = vld [vmem:[#allocation11 + $0x890] sm:$0xf] }
 0x177   :  { %v7801_v44 = vld [vmem:[#allocation11 + $0xd58] sm:$0xf] }
 0x178   :  { %v9869_v57 = vadd.f32 %v1210_v51, %v1198_v50  ;;  %3907 = vmatpush.bf16.msrb.mxu2 %v7606_v12  ;;  %v7493_v51 = vld [vmem:[#allocation11 + $0xaf0] sm:$0xf]  ;;  %v7246_v12 = vor.u32 %v9333_v5, %v7243_v8  ;;  %v9295_v5 = vld [vmem:[#allocation11 + $0x7c8] sm:$0xf0] }
 0x179   :  { %3883 = vmatpush.bf16.msrb.mxu0 %v7102_v28  ;;  %3896 = vmatpush.bf16.msrb.mxu1 %v7326_v22  ;;  %v9298_v28 = vld [vmem:[#allocation11 + $0x7e4] sm:$0xf]  ;;  %v7355_v22 = vld [vmem:[#allocation11 + $0x9f4] sm:$0xf0]  ;;  %v9403_v8 = vld [vmem:[#allocation11 + $0xb2c] sm:$0xf] }
 0x17a   :  { %v7106_v23 = vor.u32 %v9298_v28, %v7103_v33  ;;  %v7358_v24 = vor.u32 %v9361_v20, %v7355_v22  ;;  %v9385_v28 = vld [vmem:[#allocation11 + $0xa98] sm:$0xf0]  ;;  %v9326_v33 = vld [vmem:[#allocation11 + $0x8c4] sm:$0xf]  ;;  %v7857_v22 = vld [vmem:[#allocation11 + $0xdc8] sm:$0xf] }
 0x17c   :  { %3908 = vmatpush.bf16.msrb.mxu2 %v7578_v21  ;;  %v7218_v21 = vor.u32 %v9326_v33, %v7215_v19  ;;  %v9396_v33 = vld [vmem:[#allocation11 + $0xaf4] sm:$0xf] }
 0x17d   :  { %3884 = vmatpush.bf16.msrb.mxu0 %v7074_v25  ;;  %3897 = vmatpush.bf16.msrb.mxu1 %v7298_v30  ;;  %v1199_v11 = vpop.f32.mrf.mxu2  ;;  %v9871_v25 = vld [vmem:[#allocation10 + $0x4] sm:$0xf] }
 0x17e   :  { %v1212_v14 = vpop.f32.mrf.mxu3  ;;  %v1608_v36 = vperm.slane %v9871_v25, 0  ;;  %v6994_v11 = vor.u32 %v9270_v0, %v6991_v1 }
 0x17f   :  { %v9323_v14 = vld [vmem:[#allocation11 + $0x8a8] sm:$0xf0] }
 0x181   :  { %3885 = vmatpush.bf16.msrb.mxu0 %v7046_v61  ;;  %3898 = vmatpush.bf16.msrb.mxu1 %v7270_v38  ;;  %v7550_v61 = vor.u32 %v9413_v15, %v7549_v55  ;;  %v9284_v38 = vld [vmem:[#allocation11 + $0x774] sm:$0xf]  ;;  %v7635_v55 = vld [vmem:[#allocation11 + $0xc24] sm:$0xf0] }
 0x182   :  { %v7050_v45 = vor.u32 %v9284_v38, %v7047_v39  ;;  %v7607_v39 = vld [vmem:[#allocation11 + $0xbec] sm:$0xf0] }
 0x183   :  { %3909 = vmatpush.bf16.msrb.mxu2 %v7550_v61  ;;  %v7638_v61 = vor.u32 %v9431_v27, %v7635_v55  ;;  %v7689_v55 = vld [vmem:[#allocation11 + $0xc78] sm:$0xf] }
 0x185   :  { %3886 = vmatpush.bf16.msrb.mxu0 %v7018_v40  ;;  %3899 = vmatpush.bf16.msrb.mxu1 %v7242_v49  ;;  %v7521_v40 = vld [vmem:[#allocation11 + $0xb28] sm:$0xf]  ;;  %v7019_v49 = vld [vmem:[#allocation11 + $0x754] sm:$0xf0] }
 0x186   :  { %v7522_v43 = vor.u32 %v9406_v41, %v7521_v40 }
 0x188   :  { %3910 = vmatpush.bf16.msrb.mxu2 %v7522_v43  ;;  %v9309_v43 = vld [vmem:[#allocation11 + $0x838] sm:$0xf0] }
 0x189   :  { %3887 = vmatpush.bf16.msrb.mxu0 %v6990_v52  ;;  %3900 = vmatpush.bf16.msrb.mxu1 %v7214_v62  ;;  %v2265_v30 = vpop.f32.mrf.mxu0  ;;  %v9399_v52 = vld [vmem:[#allocation11 + $0xb08] sm:$0xf0]  ;;  %v7022_v62 = vor.u32 %v9277_v48, %v7019_v49  ;;  %v7579_v49 = vld [vmem:[#allocation11 + $0xbb4] sm:$0xf0] }
 0x18a   :  { %v2266_v50 = vadd.f32 %v2265_v30, %v1608_v36  ;;  %v7494_v58 = vor.u32 %v9399_v52, %v7493_v51  ;;  %v9316_v30 = vld [vmem:[#allocation11 + $0x870] sm:$0xf0]  ;;  %v7109_v52 = vld [vmem:[#allocation11 + $0x7e8] sm:$0xf] }
 0x18b   :  { %v2278_v32 = vpop.f32.mrf.mxu1  ;;  %v7166_v40 = vor.u32 %v9316_v30, %v7165_v29  ;;  %v9448_v29 = vld [vmem:[#allocation11 + $0xc90] sm:$0xf0]  ;;  %v9389_v30 = vld [vmem:[#allocation11 + $0xabc] sm:$0xf] }
 0x18c   :  { %3911 = vmatpush.bf16.msrb.mxu2 %v7494_v58  ;;  %v2279_v2 = vadd.f32 %v2278_v32, %v2266_v50  ;;  %v7829_v32 = vld [vmem:[#allocation11 + $0xd90] sm:$0xf]  ;;  %v7138_v50 = vor.u32 %v9309_v43, %v7137_v42  ;;  %v9469_v58 = vld [vmem:[#allocation11 + $0xd38] sm:$0xf0]  ;;  %v9379_v42 = vld [vmem:[#allocation11 + $0xa68] sm:$0xf0] }
 0x18d   :  { %3932 = vmatpush.bf16.msra.mxu0 %v7190_v53  ;;  %3945 = vmatpush.bf16.msra.mxu1 %v7414_v7  ;;  %v9340_v53 = vld [vmem:[#allocation11 + $0x934] sm:$0xf] }
 0x18e   :  { %v7274_v63 = vor.u32 %v9340_v53, %v7271_v59  ;;  %v9302_v53 = vld [vmem:[#allocation11 + $0x800] sm:$0xf0]  ;;  %v9320_v43 = vld [vmem:[#allocation11 + $0x894] sm:$0xf] }
 0x18f   :  { %v9410_v59 = vld [vmem:[#allocation11 + $0xb64] sm:$0xf]  ;;  %v7110_v1 = vor.u32 %v9302_v53, %v7109_v52 }
 0x191   :  { %3933 = vmatpush.bf16.msra.mxu0 %v7162_v4  ;;  %3946 = vmatpush.bf16.msra.mxu1 %v7386_v16  ;;  %v2267_v56 = vpop.f32.mrf.mxu0  ;;  %v9392_v4 = vld [vmem:[#allocation11 + $0xad0] sm:$0xf0] }
 0x192   :  { %v7466_v7 = vor.u32 %v9392_v4, %v7465_v3  ;;  %v7773_v56 = vld [vmem:[#allocation11 + $0xd20] sm:$0xf]  ;;  %v1609_v3 = vperm.slane %v9871_v25, 1  ;;  %v7081_v4 = vld [vmem:[#allocation11 + $0x7b0] sm:$0xf] }
 0x193   :  { %v2280_v60 = vpop.f32.mrf.mxu1 }
 0x194   :  { %3912 = vmatpush.bf16.msrb.mxu2 %v7466_v7  ;;  %v9462_v7 = vld [vmem:[#allocation11 + $0xd00] sm:$0xf0] }
 0x195   :  { %3934 = vmatpush.bf16.msra.mxu0 %v7134_v17  ;;  %3947 = vmatpush.bf16.msra.mxu1 %v7358_v24  ;;  %v2291_v6 = vpop.f32.mrf.mxu2  ;;  %v7437_v17 = vld [vmem:[#allocation11 + $0xa80] sm:$0xf]  ;;  %v7194_v24 = vor.u32 %v9323_v14, %v7193_v13  ;;  %v7053_v13 = vld [vmem:[#allocation11 + $0x778] sm:$0xf]  ;;  %v9288_v14 = vld [vmem:[#allocation11 + $0x790] sm:$0xf0] }
 0x196   :  { %v2292_v9 = vadd.f32 %v2291_v6, %v2279_v2  ;;  %v2304_v10 = vpop.f32.mrf.mxu3  ;;  %v7438_v18 = vor.u32 %v9385_v28, %v7437_v17  ;;  %v7745_v6 = vld [vmem:[#allocation11 + $0xce8] sm:$0xf]  ;;  %v7717_v17 = vld [vmem:[#allocation11 + $0xcb0] sm:$0xf]  ;;  %v9455_v28 = vld [vmem:[#allocation11 + $0xcc8] sm:$0xf0] }
 0x197   :  { %v7718_v19 = vor.u32 %v9455_v28, %v7717_v17  ;;  %v9473_v17 = vld [vmem:[#allocation11 + $0xd5c] sm:$0xf]  ;;  %v7803_v28 = vld [vmem:[#allocation11 + $0xd74] sm:$0xf0] }
 0x198   :  { %v2305_v16 = vadd.f32 %v2304_v10, %v2292_v9  ;;  %3913 = vmatpush.bf16.msrb.mxu2 %v7438_v18  ;;  %v7746_v9 = vor.u32 %v9462_v7, %v7745_v6  ;;  %v7523_v10 = vld [vmem:[#allocation11 + $0xb44] sm:$0xf0]  ;;  %v9480_v7 = vld [vmem:[#allocation11 + $0xd94] sm:$0xf] }
 0x199   :  { %3935 = vmatpush.bf16.msra.mxu0 %v7106_v23  ;;  %3948 = vmatpush.bf16.msra.mxu1 %v7330_v35  ;;  %v9490_v23 = vld [vmem:[#allocation11 + $0xde0] sm:$0xf0]  ;;  %v9424_v35 = vld [vmem:[#allocation11 + $0xbd4] sm:$0xf] }
 0x19a   :  { %v2464_v20 = vmax.f32 %v2305_v16, 0.0  ;;  %v7858_v26 = vor.u32 %v9490_v23, %v7857_v22  ;;  %v7610_v41 = vor.u32 %v9424_v35, %v7607_v39  ;;  %v7054_v22 = vor.u32 %v9288_v14, %v7053_v13  ;;  %v9274_v39 = vld [vmem:[#allocation11 + $0x720] sm:$0xf0]  ;;  %v7139_v14 = vld [vmem:[#allocation11 + $0x83c] sm:$0xf0] }
 0x19b   :  { %v9306_v13 = vld [vmem:[#allocation11 + $0x824] sm:$0xf] }
 0x19c   :  { %v9874_v15 = vpack.c.bf16 %v2464_v20, %v2464_v20  ;;  %3919 = vmatpush.bf16.msrb.mxu3 %v7858_v26  ;;  %3958 = vmatpush.bf16.msra.mxu2 %v7638_v61  ;;  %v7495_v20 = vld [vmem:[#allocation11 + $0xb0c] sm:$0xf0]  ;;  %v9281_v26 = vld [vmem:[#allocation11 + $0x758] sm:$0xf0] }
 0x19d   :  { %3936 = vmatpush.bf16.msra.mxu0 %v7078_v34  ;;  %3949 = vmatpush.bf16.msra.mxu1 %v7302_v47  ;;  %v2293_v31 = vpop.f32.mrf.mxu2  ;;  %v9483_v34 = vld [vmem:[#allocation11 + $0xda8] sm:$0xf0]  ;;  %v9417_v47 = vld [vmem:[#allocation11 + $0xb9c] sm:$0xf]  ;;  %v7498_v23 = vor.u32 %v9396_v33, %v7495_v20  ;;  %v9358_v20 = vld [vmem:[#allocation11 + $0x9c0] sm:$0xf0] }
 0x19e   :  { %v2306_v36 = vpop.f32.mrf.mxu3  ;;  %3888 = vmatmul.bf16.vlgmr.msrb.gmra.mxu0 %v9874_v15  ;;  %v7830_v38 = vor.u32 %v9483_v34, %v7829_v32  ;;  %v7582_v51 = vor.u32 %v9417_v47, %v7579_v49  ;;  %v7690_v31 = vor.u32 %v9448_v29, %v7689_v55  ;;  %v7467_v32 = vld [vmem:[#allocation11 + $0xad4] sm:$0xf0]  ;;  %v7661_v47 = vld [vmem:[#allocation11 + $0xc40] sm:$0xf]  ;;  %v9382_v49 = vld [vmem:[#allocation11 + $0xa84] sm:$0xf] }
 0x1a0   :  { %3920 = vmatpush.bf16.msrb.mxu3 %v7830_v38  ;;  %3959 = vmatpush.bf16.msra.mxu2 %v7610_v41  ;;  %v6997_v38 = vld [vmem:[#allocation11 + $0x708] sm:$0xf]  ;;  %v7470_v41 = vor.u32 %v9389_v30, %v7467_v32  ;;  %v9292_v32 = vld [vmem:[#allocation11 + $0x7b4] sm:$0xf] }
 0x1a1   :  { %3937 = vmatpush.bf16.msra.mxu0 %v7050_v45  ;;  %3950 = vmatpush.bf16.msra.mxu1 %v7274_v63  ;;  %v9476_v45 = vld [vmem:[#allocation11 + $0xd70] sm:$0xf0]  ;;  %v7551_v63 = vld [vmem:[#allocation11 + $0xb7c] sm:$0xf0]  ;;  %v6998_v53 = vor.u32 %v9274_v39, %v6997_v38  ;;  %v9459_v38 = vld [vmem:[#allocation11 + $0xcec] sm:$0xf] }
 0x1a2   :  { %v7802_v48 = vor.u32 %v9476_v45, %v7801_v44  ;;  %v7554_v2 = vor.u32 %v9410_v59, %v7551_v63  ;;  %v7195_v44 = vld [vmem:[#allocation11 + $0x8ac] sm:$0xf0]  ;;  %v7859_v63 = vld [vmem:[#allocation11 + $0xde4] sm:$0xf0] }
 0x1a3   :  { %v7198_v59 = vor.u32 %v9320_v43, %v7195_v44  ;;  %v7747_v39 = vld [vmem:[#allocation11 + $0xd04] sm:$0xf0]  ;;  %v9344_v43 = vld [vmem:[#allocation11 + $0x950] sm:$0xf0]  ;;  %v9285_v44 = vld [vmem:[#allocation11 + $0x77c] sm:$0xf] }
 0x1a4   :  { %3921 = vmatpush.bf16.msrb.mxu3 %v7802_v48  ;;  %3960 = vmatpush.bf16.msra.mxu2 %v7582_v51  ;;  %v9441_v48 = vld [vmem:[#allocation11 + $0xc58] sm:$0xf0]  ;;  %v7439_v51 = vld [vmem:[#allocation11 + $0xa9c] sm:$0xf0] }
 0x1a5   :  { %3938 = vmatpush.bf16.msra.mxu0 %v7022_v62  ;;  %3951 = vmatpush.bf16.msra.mxu1 %v7246_v12  ;;  %v7774_v62 = vor.u32 %v9469_v58, %v7773_v56  ;;  %v7526_v12 = vor.u32 %v9403_v8, %v7523_v10  ;;  %v7442_v56 = vor.u32 %v9382_v49, %v7439_v51  ;;  %v7831_v8 = vld [vmem:[#allocation11 + $0xdac] sm:$0xf0] }
 0x1a6   :  { %v7719_v51 = vld [vmem:[#allocation11 + $0xccc] sm:$0xf0] }
 0x1a8   :  { %3922 = vmatpush.bf16.msrb.mxu3 %v7774_v62  ;;  %3961 = vmatpush.bf16.msra.mxu2 %v7554_v2  ;;  %v9487_v62 = vld [vmem:[#allocation11 + $0xdcc] sm:$0xf]  ;;  %v9313_v2 = vld [vmem:[#allocation11 + $0x85c] sm:$0xf] }
 0x1a9   :  { %3939 = vmatpush.bf16.msra.mxu0 %v6994_v11  ;;  %3952 = vmatpush.bf16.msra.mxu1 %v7218_v21  ;;  %v2317_v60 = vpop.f32.mrf.mxu0  ;;  %v7082_v11 = vor.u32 %v9295_v5, %v7081_v4  ;;  %v7862_v4 = vor.u32 %v9487_v62, %v7859_v63  ;;  %v7027_v62 = vld [vmem:[#allocation11 + $0x75c] sm:$0xf0] }
 0x1aa   :  { %v2318_v16 = vadd.f32 %v2317_v60, %v1609_v3  ;;  %v7389_v60 = vld [vmem:[#allocation11 + $0xa18] sm:$0xf] }
 0x1ab   :  { %v2330_v0 = vpop.f32.mrf.mxu1  ;;  %v7167_v3 = vld [vmem:[#allocation11 + $0x874] sm:$0xf0] }
 0x1ac   :  { %3923 = vmatpush.bf16.msrb.mxu3 %v7746_v9  ;;  %3962 = vmatpush.bf16.msra.mxu2 %v7526_v12  ;;  %v2331_v27 = vadd.f32 %v2330_v0, %v2318_v16  ;;  %v7170_v10 = vor.u32 %v9313_v2, %v7167_v3  ;;  %v9365_v12 = vld [vmem:[#allocation11 + $0x9f8] sm:$0xf0]  ;;  %v7834_v16 = vor.u32 %v9480_v7, %v7831_v8 }
 0x1ad   :  { %3984 = vmatpush.bf16.msrb.mxu0 %v7194_v24  ;;  %v7025_v24 = vld [vmem:[#allocation11 + $0x740] sm:$0xf]  ;;  %v9445_v3 = vld [vmem:[#allocation11 + $0xc7c] sm:$0xf] }
 0x1ae   :  { %3940 = vmatmul.bf16.vlgmr.msra.gmra.mxu0 %v9874_v15  ;;  %v7026_v36 = vor.u32 %v9281_v26, %v7025_v24  ;;  %v9466_v26 = vld [vmem:[#allocation11 + $0xd24] sm:$0xf] }
 0x1b0   :  { %3924 = vmatpush.bf16.msrb.mxu3 %v7718_v19  ;;  %3963 = vmatpush.bf16.msra.mxu2 %v7498_v23  ;;  %v7333_v19 = vld [vmem:[#allocation11 + $0x9a8] sm:$0xf]  ;;  %v7806_v23 = vor.u32 %v9473_v17, %v7803_v28  ;;  %v9376_v17 = vld [vmem:[#allocation11 + $0xa54] sm:$0xf]  ;;  %v7419_v28 = vld [vmem:[#allocation11 + $0xa6c] sm:$0xf0] }
 0x1b1   :  { %3985 = vmatpush.bf16.msrb.mxu0 %v7166_v40  ;;  %v2319_v18 = vpop.f32.mrf.mxu0  ;;  %v7417_v40 = vld [vmem:[#allocation11 + $0xa50] sm:$0xf]  ;;  %v7334_v29 = vor.u32 %v9358_v20, %v7333_v19  ;;  %v9324_v19 = vld [vmem:[#allocation11 + $0x8b0] sm:$0xf0] }
 0x1b2   :  { %v7418_v58 = vor.u32 %v9379_v42, %v7417_v40  ;;  %v7142_v18 = vor.u32 %v9306_v13, %v7139_v14  ;;  %v7277_v42 = vld [vmem:[#allocation11 + $0x938] sm:$0xf] }
 0x1b3   :  { %v2332_v21 = vpop.f32.mrf.mxu1 }
 0x1b4   :  { %3925 = vmatpush.bf16.msrb.mxu3 %v7690_v31  ;;  %3964 = vmatpush.bf16.msra.mxu2 %v7470_v41  ;;  %v9299_v21 = vld [vmem:[#allocation11 + $0x7ec] sm:$0xf] }
 0x1b5   :  { %3986 = vmatpush.bf16.msrb.mxu0 %v7138_v50  ;;  %v2343_v61 = vpop.f32.mrf.mxu2  ;;  %v7662_v50 = vor.u32 %v9441_v48, %v7661_v47  ;;  %v9351_v31 = vld [vmem:[#allocation11 + $0x988] sm:$0xf0]  ;;  %v7750_v47 = vor.u32 %v9459_v38, %v7747_v39 }
 0x1b6   :  { %v2344_v34 = vadd.f32 %v2343_v61, %v2331_v27  ;;  %v2356_v35 = vpop.f32.mrf.mxu3  ;;  %v7775_v27 = vld [vmem:[#allocation11 + $0xd3c] sm:$0xf0]  ;;  %v7305_v61 = vld [vmem:[#allocation11 + $0x970] sm:$0xf] }
 0x1b7   :  { %v7306_v40 = vor.u32 %v9351_v31, %v7305_v61  ;;  %v9369_v61 = vld [vmem:[#allocation11 + $0xa1c] sm:$0xf]  ;;  %v7391_v31 = vld [vmem:[#allocation11 + $0xa34] sm:$0xf0] }
 0x1b8   :  { %v2357_v45 = vadd.f32 %v2356_v35, %v2344_v34  ;;  %3926 = vmatpush.bf16.msrb.mxu3 %v7662_v50  ;;  %3965 = vmatpush.bf16.msra.mxu2 %v7442_v56  ;;  %v7083_v34 = vld [vmem:[#allocation11 + $0x7cc] sm:$0xf0]  ;;  %v7778_v35 = vor.u32 %v9466_v26, %v7775_v27  ;;  %v9452_v50 = vld [vmem:[#allocation11 + $0xcb4] sm:$0xf]  ;;  %v7663_v26 = vld [vmem:[#allocation11 + $0xc5c] sm:$0xf0] }
 0x1b9   :  { %3987 = vmatpush.bf16.msrb.mxu0 %v7110_v1  ;;  %v9372_v1 = vld [vmem:[#allocation11 + $0xa30] sm:$0xf0]  ;;  %v7086_v41 = vor.u32 %v9292_v32, %v7083_v34  ;;  %v7722_v63 = vor.u32 %v9452_v50, %v7719_v51 }
 0x1ba   :  { %v2465_v52 = vmax.f32 %v2357_v45, 0.0  ;;  %v7390_v9 = vor.u32 %v9372_v1, %v7389_v60  ;;  %v7055_v45 = vld [vmem:[#allocation11 + $0x794] sm:$0xf0]  ;;  %v9278_v60 = vld [vmem:[#allocation11 + $0x744] sm:$0xf] }
 0x1bb   :  { %v7058_v56 = vor.u32 %v9285_v44, %v7055_v45  ;;  %v7030_v8 = vor.u32 %v9278_v60, %v7027_v62  ;;  %v9428_v34 = vld [vmem:[#allocation11 + $0xbf0] sm:$0xf0]  ;;  %v9362_v44 = vld [vmem:[#allocation11 + $0x9e4] sm:$0xf]  ;;  %v7363_v45 = vld [vmem:[#allocation11 + $0x9fc] sm:$0xf0] }
 0x1bc   :  { %v9879_v0 = vpack.c.bf16 %v2465_v52, %v2465_v52  ;;  %3971 = vmatpush.bf16.msra.mxu3 %v7862_v4  ;;  %v7691_v4 = vld [vmem:[#allocation11 + $0xc94] sm:$0xf0]  ;;  %v7366_v50 = vor.u32 %v9362_v44, %v7363_v45  ;;  %v7117_v60 = vld [vmem:[#allocation11 + $0x7f0] sm:$0xf]  ;;  %v9303_v62 = vld [vmem:[#allocation11 + $0x808] sm:$0xf0] }
 0x1bd   :  { %3988 = vmatpush.bf16.msrb.mxu0 %v7082_v11  ;;  %v2345_v5 = vpop.f32.mrf.mxu2  ;;  %v7361_v11 = vld [vmem:[#allocation11 + $0x9e0] sm:$0xf]  ;;  %v7694_v13 = vor.u32 %v9445_v3, %v7691_v4  ;;  %v7223_v44 = vld [vmem:[#allocation11 + $0x8e4] sm:$0xf0]  ;;  %v7005_v45 = vld [vmem:[#allocation11 + $0x710] sm:$0xf] }
 0x1be   :  { %v2358_v6 = vpop.f32.mrf.mxu3  ;;  %3901 = vmatmul.bf16.vlgmr.msrb.gmra.mxu1 %v9879_v0  ;;  %v7362_v33 = vor.u32 %v9365_v12, %v7361_v11  ;;  %v9271_v11 = vld [vmem:[#allocation11 + $0x70c] sm:$0xf]  ;;  %v6999_v12 = vld [vmem:[#allocation11 + $0x724] sm:$0xf0] }
 0x1bf   :  { %3997 = vmatpush.bf16.msrb.mxu1 %v7418_v58  ;;  %v7249_v58 = vld [vmem:[#allocation11 + $0x900] sm:$0xf] }
 0x1c0   :  { %3972 = vmatpush.bf16.msra.mxu3 %v7834_v16  ;;  %v7641_v16 = vld [vmem:[#allocation11 + $0xc10] sm:$0xf] }
 0x1c1   :  { %3989 = vmatpush.bf16.msrb.mxu0 %v7054_v22  ;;  %v7111_v22 = vld [vmem:[#allocation11 + $0x804] sm:$0xf0] }
 0x1c2   :  { %v7114_v30 = vor.u32 %v9299_v21, %v7111_v22  ;;  %v7002_v22 = vor.u32 %v9271_v11, %v6999_v12  ;;  %v9296_v11 = vld [vmem:[#allocation11 + $0x7d0] sm:$0xf0] }
 0x1c3   :  { %3998 = vmatpush.bf16.msrb.mxu1 %v7390_v9  ;;  %v7221_v9 = vld [vmem:[#allocation11 + $0x8c8] sm:$0xf] }
 0x1c4   :  { %3973 = vmatpush.bf16.msra.mxu3 %v7806_v23  ;;  %v7422_v23 = vor.u32 %v9376_v17, %v7419_v28  ;;  %v7279_v17 = vld [vmem:[#allocation11 + $0x954] sm:$0xf0] }
 0x1c5   :  { %3990 = vmatpush.bf16.msrb.mxu0 %v7026_v36  ;;  %v1610_v36 = vperm.slane %v9871_v25, 2 }
 0x1c7   :  { %3999 = vmatpush.bf16.msrb.mxu1 %v7362_v33  ;;  %v9435_v33 = vld [vmem:[#allocation11 + $0xc28] sm:$0xf0] }
 0x1c8   :  { %3974 = vmatpush.bf16.msra.mxu3 %v7778_v35  ;;  %v7173_v35 = vld [vmem:[#allocation11 + $0x860] sm:$0xf] }
 0x1c9   :  { %3991 = vmatpush.bf16.msrb.mxu0 %v6998_v53  ;;  %v2369_v24 = vpop.f32.mrf.mxu0  ;;  %v7278_v53 = vor.u32 %v9344_v43, %v7277_v42  ;;  %v7585_v43 = vld [vmem:[#allocation11 + $0xba0] sm:$0xf] }
 0x1ca   :  { %v2370_v48 = vadd.f32 %v2369_v24, %v1610_v36  ;;  %v9438_v24 = vld [vmem:[#allocation11 + $0xc44] sm:$0xf]  ;;  %v9317_v36 = vld [vmem:[#allocation11 + $0x878] sm:$0xf0] }
 0x1cb   :  { %v2382_v55 = vpop.f32.mrf.mxu1  ;;  %4000 = vmatpush.bf16.msrb.mxu1 %v7334_v29  ;;  %v7666_v39 = vor.u32 %v9438_v24, %v7663_v26  ;;  %v7174_v42 = vor.u32 %v9317_v36, %v7173_v35  ;;  %v7473_v26 = vld [vmem:[#allocation11 + $0xac0] sm:$0xf] }
 0x1cc   :  { %3992 = vmatmul.bf16.vlgmr.msrb.gmra.mxu0 %v9874_v15  ;;  %3975 = vmatpush.bf16.msra.mxu3 %v7750_v47  ;;  %v2383_v1 = vadd.f32 %v2382_v55, %v2370_v48  ;;  %v7642_v55 = vor.u32 %v9435_v33, %v7641_v16  ;;  %v9421_v47 = vld [vmem:[#allocation11 + $0xbb8] sm:$0xf0]  ;;  %v7145_v48 = vld [vmem:[#allocation11 + $0x828] sm:$0xf]  ;;  %v9400_v33 = vld [vmem:[#allocation11 + $0xb10] sm:$0xf0] }
 0x1cd   :  { %4036 = vmatpush.bf16.msra.mxu0 %v7198_v59  ;;  %v9337_v59 = vld [vmem:[#allocation11 + $0x918] sm:$0xf0]  ;;  %v7586_v51 = vor.u32 %v9421_v47, %v7585_v43  ;;  %v9275_v47 = vld [vmem:[#allocation11 + $0x728] sm:$0xf0] }
 0x1ce   :  { %3953 = vmatmul.bf16.vlgmr.msra.gmra.mxu1 %v9879_v0  ;;  %v7250_v7 = vor.u32 %v9337_v59, %v7249_v58  ;;  %v7335_v58 = vld [vmem:[#allocation11 + $0x9c4] sm:$0xf0]  ;;  %v9414_v59 = vld [vmem:[#allocation11 + $0xb80] sm:$0xf0]  ;;  %v9341_v16 = vld [vmem:[#allocation11 + $0x93c] sm:$0xf] }
 0x1cf   :  { %4001 = vmatpush.bf16.msrb.mxu1 %v7306_v40  ;;  %v7394_v40 = vor.u32 %v9369_v61, %v7391_v31  ;;  %v9393_v61 = vld [vmem:[#allocation11 + $0xad8] sm:$0xf0]  ;;  %v7033_v31 = vld [vmem:[#allocation11 + $0x748] sm:$0xf] }
 0x1d0   :  { %3976 = vmatpush.bf16.msra.mxu3 %v7722_v63 }
 0x1d1   :  { %4037 = vmatpush.bf16.msra.mxu0 %v7170_v10  ;;  %v2371_v49 = vpop.f32.mrf.mxu0  ;;  %v9330_v10 = vld [vmem:[#allocation11 + $0x8e0] sm:$0xf0] }
 0x1d2   :  { %v7222_v21 = vor.u32 %v9330_v10, %v7221_v9  ;;  %v9310_v49 = vld [vmem:[#allocation11 + $0x840] sm:$0xf0]  ;;  %v9407_v9 = vld [vmem:[#allocation11 + $0xb48] sm:$0xf0]  ;;  %v7089_v10 = vld [vmem:[#allocation11 + $0x7b8] sm:$0xf] }
 0x1d3   :  { %v2384_v52 = vpop.f32.mrf.mxu1  ;;  %4002 = vmatpush.bf16.msrb.mxu1 %v7278_v53  ;;  %v7557_v53 = vld [vmem:[#allocation11 + $0xb68] sm:$0xf] }
 0x1d4   :  { %3977 = vmatpush.bf16.msra.mxu3 %v7694_v13  ;;  %v7146_v52 = vor.u32 %v9310_v49, %v7145_v48  ;;  %v7558_v4 = vor.u32 %v9414_v59, %v7557_v53  ;;  %v7865_v49 = vld [vmem:[#allocation11 + $0xdd0] sm:$0xf]  ;;  %v7425_v53 = vld [vmem:[#allocation11 + $0xa58] sm:$0xf] }
 0x1d5   :  { %4038 = vmatpush.bf16.msra.mxu0 %v7142_v18  ;;  %v2395_v2 = vpop.f32.mrf.mxu2  ;;  %v7201_v18 = vld [vmem:[#allocation11 + $0x898] sm:$0xf] }
 0x1d6   :  { %v2396_v5 = vadd.f32 %v2395_v2, %v2383_v1  ;;  %v2408_v6 = vpop.f32.mrf.mxu3  ;;  %v7202_v29 = vor.u32 %v9324_v19, %v7201_v18  ;;  %v1611_v1 = vperm.slane %v9871_v25, 3  ;;  %v7501_v25 = vld [vmem:[#allocation11 + $0xaf8] sm:$0xf]  ;;  %v7061_v18 = vld [vmem:[#allocation11 + $0x780] sm:$0xf] }
 0x1d7   :  { %4003 = vmatpush.bf16.msrb.mxu1 %v7250_v7  ;;  %v9348_v7 = vld [vmem:[#allocation11 + $0x974] sm:$0xf]  ;;  %v9289_v19 = vld [vmem:[#allocation11 + $0x798] sm:$0xf0] }
 0x1d8   :  { %v2409_v14 = vadd.f32 %v2408_v6, %v2396_v5  ;;  %3978 = vmatpush.bf16.msra.mxu3 %v7666_v39  ;;  %v7118_v5 = vor.u32 %v9303_v62, %v7117_v60  ;;  %v7529_v6 = vld [vmem:[#allocation11 + $0xb30] sm:$0xf]  ;;  %v7062_v24 = vor.u32 %v9289_v19, %v7061_v18  ;;  %v7445_v39 = vld [vmem:[#allocation11 + $0xa88] sm:$0xf]  ;;  %v9321_v60 = vld [vmem:[#allocation11 + $0x89c] sm:$0xf] }
 0x1d9   :  { %4039 = vmatpush.bf16.msra.mxu0 %v7114_v30  ;;  %v7613_v30 = vld [vmem:[#allocation11 + $0xbd8] sm:$0xf]  ;;  %v7530_v13 = vor.u32 %v9407_v9, %v7529_v6  ;;  %v9484_v6 = vld [vmem:[#allocation11 + $0xdb0] sm:$0xf0]  ;;  %v9477_v18 = vld [vmem:[#allocation11 + $0xd78] sm:$0xf0] }
 0x1da   :  { %v2466_v20 = vmax.f32 %v2409_v14, 0.0  ;;  %v7090_v14 = vor.u32 %v9296_v11, %v7089_v10  ;;  %v7203_v62 = vld [vmem:[#allocation11 + $0x8b4] sm:$0xf0]  ;;  %v9425_v10 = vld [vmem:[#allocation11 + $0xbdc] sm:$0xf] }
 0x1db   :  { %4004 = vmatpush.bf16.msrb.mxu1 %v7222_v21  ;;  %v7206_v9 = vor.u32 %v9321_v60, %v7203_v62  ;;  %v7615_v11 = vld [vmem:[#allocation11 + $0xbf4] sm:$0xf0]  ;;  %v9456_v62 = vld [vmem:[#allocation11 + $0xcd0] sm:$0xf0] }
 0x1dc   :  { %v9885_v27 = vpack.c.bf16 %v2466_v20, %v2466_v20  ;;  %v7725_v60 = vld [vmem:[#allocation11 + $0xcb8] sm:$0xf] }
 0x1dd   :  { %4040 = vmatpush.bf16.msra.mxu0 %v7086_v41  ;;  %v2397_v32 = vpop.f32.mrf.mxu2  ;;  %v7614_v41 = vor.u32 %v9428_v34, %v7613_v30 }
 0x1de   :  { %v2410_v38 = vpop.f32.mrf.mxu3  ;;  %3914 = vmatmul.bf16.vlgmr.msrb.gmra.mxu2 %v9885_v27  ;;  %4005 = vmatmul.bf16.vlgmr.msrb.gmra.mxu1 %v9879_v0  ;;  %v9282_v32 = vld [vmem:[#allocation11 + $0x760] sm:$0xf0] }
 0x1df   :  { %4049 = vmatpush.bf16.msra.mxu1 %v7422_v23  ;;  %4010 = vmatpush.bf16.msrb.mxu2 %v7642_v55  ;;  %v7502_v23 = vor.u32 %v9400_v33, %v7501_v25  ;;  %v9334_v55 = vld [vmem:[#allocation11 + $0x904] sm:$0xf]  ;;  %v7034_v43 = vor.u32 %v9282_v32, %v7033_v31  ;;  %v7809_v33 = vld [vmem:[#allocation11 + $0xd60] sm:$0xf] }
 0x1e0   :  { %v9314_v25 = vld [vmem:[#allocation11 + $0x864] sm:$0xf] }
 0x1e1   :  { %4041 = vmatpush.bf16.msra.mxu0 %v7058_v56  ;;  %v9355_v56 = vld [vmem:[#allocation11 + $0x9ac] sm:$0xf]  ;;  %v9470_v31 = vld [vmem:[#allocation11 + $0xd40] sm:$0xf0] }
 0x1e2   :  { %v7338_v3 = vor.u32 %v9355_v56, %v7335_v58  ;;  %v9380_v56 = vld [vmem:[#allocation11 + $0xa70] sm:$0xf0] }
 0x1e3   :  { %4050 = vmatpush.bf16.msra.mxu1 %v7394_v40  ;;  %4011 = vmatpush.bf16.msrb.mxu2 %v7614_v41  ;;  %v9386_v40 = vld [vmem:[#allocation11 + $0xaa0] sm:$0xf0]  ;;  %v9327_v41 = vld [vmem:[#allocation11 + $0x8cc] sm:$0xf] }
 0x1e4   :  { %v7226_v59 = vor.u32 %v9327_v41, %v7223_v44  ;;  %v7119_v41 = vld [vmem:[#allocation11 + $0x80c] sm:$0xf0] }
 0x1e5   :  { %4042 = vmatpush.bf16.msra.mxu0 %v7030_v8  ;;  %v7307_v8 = vld [vmem:[#allocation11 + $0x98c] sm:$0xf0] }
 0x1e6   :  { %v7310_v12 = vor.u32 %v9348_v7, %v7307_v8  ;;  %v7426_v8 = vor.u32 %v9380_v56, %v7425_v53  ;;  %v7753_v44 = vld [vmem:[#allocation11 + $0xcf0] sm:$0xf]  ;;  %v9293_v53 = vld [vmem:[#allocation11 + $0x7bc] sm:$0xf]  ;;  %v7091_v56 = vld [vmem:[#allocation11 + $0x7d4] sm:$0xf0] }
 0x1e7   :  { %4051 = vmatpush.bf16.msra.mxu1 %v7366_v50  ;;  %4012 = vmatpush.bf16.msrb.mxu2 %v7586_v51  ;;  %v9491_v50 = vld [vmem:[#allocation11 + $0xde8] sm:$0xf0]  ;;  %v9432_v51 = vld [vmem:[#allocation11 + $0xc14] sm:$0xf] }
 0x1e9   :  { %4043 = vmatpush.bf16.msra.mxu0 %v7002_v22  ;;  %v2421_v63 = vpop.f32.mrf.mxu0  ;;  %v7282_v22 = vor.u32 %v9341_v16, %v7279_v17  ;;  %v7175_v16 = vld [vmem:[#allocation11 + $0x87c] sm:$0xf0] }
 0x1ea   :  { %v2422_v28 = vadd.f32 %v2421_v63, %v1611_v1  ;;  %v7446_v63 = vor.u32 %v9386_v40, %v7445_v39  ;;  %v7006_v1 = vor.u32 %v9275_v47, %v7005_v45  ;;  %v9359_v39 = vld [vmem:[#allocation11 + $0x9c8] sm:$0xf0]  ;;  %v9300_v40 = vld [vmem:[#allocation11 + $0x7f4] sm:$0xf] }
 0x1eb   :  { %v2434_v2 = vpop.f32.mrf.mxu1  ;;  %4052 = vmatpush.bf16.msra.mxu1 %v7338_v3  ;;  %4013 = vmatpush.bf16.msrb.mxu2 %v7558_v4  ;;  %v7866_v3 = vor.u32 %v9491_v50, %v7865_v49  ;;  %v9463_v45 = vld [vmem:[#allocation11 + $0xd08] sm:$0xf0]  ;;  %v9404_v49 = vld [vmem:[#allocation11 + $0xb34] sm:$0xf]  ;;  %v7531_v50 = vld [vmem:[#allocation11 + $0xb4c] sm:$0xf0] }
 0x1ec   :  { %4044 = vmatmul.bf16.vlgmr.msra.gmra.mxu0 %v9874_v15  ;;  %v2435_v30 = vadd.f32 %v2434_v2, %v2422_v28  ;;  %v7618_v28 = vor.u32 %v9425_v10, %v7615_v11  ;;  %v7697_v11 = vld [vmem:[#allocation11 + $0xc80] sm:$0xf] }
 0x1ed   :  { %4088 = vmatpush.bf16.msrb.mxu0 %v7202_v29  ;;  %v7251_v29 = vld [vmem:[#allocation11 + $0x91c] sm:$0xf0] }
 0x1ee   :  { %3966 = vmatmul.bf16.vlgmr.msra.gmra.mxu2 %v9885_v27  ;;  %v7254_v38 = vor.u32 %v9334_v55, %v7251_v29  ;;  %v7147_v55 = vld [vmem:[#allocation11 + $0x844] sm:$0xf0]  ;;  %v7810_v29 = vor.u32 %v9477_v18, %v7809_v33  ;;  %v9279_v33 = vld [vmem:[#allocation11 + $0x74c] sm:$0xf] }
 0x1ef   :  { %4053 = vmatpush.bf16.msra.mxu1 %v7310_v12  ;;  %4014 = vmatpush.bf16.msrb.mxu2 %v7530_v13  ;;  %v7397_v12 = vld [vmem:[#allocation11 + $0xa20] sm:$0xf]  ;;  %v7035_v18 = vld [vmem:[#allocation11 + $0x764] sm:$0xf0] }
 0x1f1   :  { %4089 = vmatpush.bf16.msrb.mxu0 %v7174_v42  ;;  %v2423_v20 = vpop.f32.mrf.mxu0  ;;  %v7474_v42 = vor.u32 %v9393_v61, %v7473_v26  ;;  %v9307_v26 = vld [vmem:[#allocation11 + $0x82c] sm:$0xf]  ;;  %v7781_v61 = vld [vmem:[#allocation11 + $0xd28] sm:$0xf] }
 0x1f2   :  { %v7178_v20 = vor.u32 %v9314_v25, %v7175_v16  ;;  %v9390_v25 = vld [vmem:[#allocation11 + $0xac4] sm:$0xf]  ;;  %v7475_v16 = vld [vmem:[#allocation11 + $0xadc] sm:$0xf0] }
 0x1f3   :  { %v2436_v21 = vpop.f32.mrf.mxu1  ;;  %4054 = vmatpush.bf16.msra.mxu1 %v7282_v22  ;;  %4015 = vmatpush.bf16.msrb.mxu2 %v7502_v23  ;;  %v7587_v22 = vld [vmem:[#allocation11 + $0xbbc] sm:$0xf0]  ;;  %v7369_v23 = vld [vmem:[#allocation11 + $0x9e8] sm:$0xf] }
 0x1f4   :  { %v9418_v21 = vld [vmem:[#allocation11 + $0xba4] sm:$0xf] }
 0x1f5   :  { %4090 = vmatpush.bf16.msrb.mxu0 %v7146_v52  ;;  %v2447_v34 = vpop.f32.mrf.mxu2  ;;  %v7643_v52 = vld [vmem:[#allocation11 + $0xc2c] sm:$0xf0] }
 0x1f6   :  { %v2448_v35 = vadd.f32 %v2447_v34, %v2435_v30  ;;  %v2460_v36 = vpop.f32.mrf.mxu3  ;;  %v7646_v4 = vor.u32 %v9432_v51, %v7643_v52  ;;  %v7590_v30 = vor.u32 %v9418_v21, %v7587_v22  ;;  %v7150_v34 = vor.u32 %v9307_v26, %v7147_v55  ;;  %v7313_v51 = vld [vmem:[#allocation11 + $0x978] sm:$0xf]  ;;  %v9352_v52 = vld [vmem:[#allocation11 + $0x990] sm:$0xf0]  ;;  %v9442_v22 = vld [vmem:[#allocation11 + $0xc60] sm:$0xf0] }
 0x1f7   :  { %4055 = vmatpush.bf16.msra.mxu1 %v7254_v38  ;;  %4016 = vmatpush.bf16.msrb.mxu2 %v7474_v42  ;;  %v7341_v38 = vld [vmem:[#allocation11 + $0x9b0] sm:$0xf]  ;;  %v7782_v42 = vor.u32 %v9470_v31, %v7781_v61  ;;  %v7478_v21 = vor.u32 %v9390_v25, %v7475_v16  ;;  %v7038_v55 = vor.u32 %v9279_v33, %v7035_v18  ;;  %v9272_v61 = vld [vmem:[#allocation11 + $0x714] sm:$0xf]  ;;  %v9467_v25 = vld [vmem:[#allocation11 + $0xd2c] sm:$0xf] }
 0x1f8   :  { %v2461_v48 = vadd.f32 %v2460_v36, %v2448_v35  ;;  %v9411_v35 = vld [vmem:[#allocation11 + $0xb6c] sm:$0xf]  ;;  %v7559_v36 = vld [vmem:[#allocation11 + $0xb84] sm:$0xf0]  ;;  %v7342_v47 = vor.u32 %v9359_v39, %v7341_v38  ;;  %v7007_v31 = vld [vmem:[#allocation11 + $0x72c] sm:$0xf0] }
 0x1f9   :  { %4091 = vmatpush.bf16.msrb.mxu0 %v7118_v5  ;;  %v7837_v5 = vld [vmem:[#allocation11 + $0xd98] sm:$0xf]  ;;  %v9377_v38 = vld [vmem:[#allocation11 + $0xa5c] sm:$0xf]  ;;  %v7783_v16 = vld [vmem:[#allocation11 + $0xd44] sm:$0xf0] }
 0x1fa   :  { %v2467_v58 = vmax.f32 %v2461_v48, 0.0  ;;  %v7838_v17 = vor.u32 %v9484_v6, %v7837_v5  ;;  %v7122_v48 = vor.u32 %v9300_v40, %v7119_v41  ;;  %v7285_v5 = vld [vmem:[#allocation11 + $0x940] sm:$0xf]  ;;  %v9345_v6 = vld [vmem:[#allocation11 + $0x958] sm:$0xf0] }
 0x1fb   :  { %4056 = vmatpush.bf16.msra.mxu1 %v7226_v59  ;;  %4017 = vmatpush.bf16.msrb.mxu2 %v7446_v63  ;;  %v7534_v59 = vor.u32 %v9404_v49, %v7531_v50  ;;  %v7314_v63 = vor.u32 %v9352_v52, %v7313_v51  ;;  %v7427_v41 = vld [vmem:[#allocation11 + $0xa74] sm:$0xf0]  ;;  %v9481_v49 = vld [vmem:[#allocation11 + $0xd9c] sm:$0xf]  ;;  %v7565_v33 = vld [vmem:[#allocation11 + $0xb70] sm:$0xf] }
 0x1fc   :  { %v9892_v2 = vpack.c.bf16 %v2467_v58, %v2467_v58  ;;  %v7754_v58 = vor.u32 %v9463_v45, %v7753_v44  ;;  %v7010_v45 = vor.u32 %v9272_v61, %v7007_v31  ;;  %v7839_v50 = vld [vmem:[#allocation11 + $0xdb4] sm:$0xf0]  ;;  %v7430_v51 = vor.u32 %v9377_v38, %v7427_v41  ;;  %v9415_v18 = vld [vmem:[#allocation11 + $0xb88] sm:$0xf0]  ;;  %v9297_v38 = vld [vmem:[#allocation11 + $0x7d8] sm:$0xf0] }
 0x1fd   :  { %4092 = vmatpush.bf16.msrb.mxu0 %v7090_v14  ;;  %v2449_v7 = vpop.f32.mrf.mxu2  ;;  %v9373_v14 = vld [vmem:[#allocation11 + $0xa38] sm:$0xf0]  ;;  %v7537_v31 = vld [vmem:[#allocation11 + $0xb38] sm:$0xf] }
 0x1fe   :  { %v2462_v13 = vpop.f32.mrf.mxu3  ;;  %3927 = vmatmul.bf16.vlgmr.msrb.gmra.mxu3 %v9892_v2  ;;  %v7398_v19 = vor.u32 %v9373_v14, %v7397_v12  ;;  %4057 = vmatmul.bf16.vlgmr.msra.gmra.mxu1 %v9879_v0  ;;  %v9286_v7 = vld [vmem:[#allocation11 + $0x784] sm:$0xf]  ;;  %v9449_v12 = vld [vmem:[#allocation11 + $0xc98] sm:$0xf0] }
 0x1ff   :  { %4023 = vmatpush.bf16.msrb.mxu3 %v7866_v3  ;;  %4062 = vmatpush.bf16.msra.mxu2 %v7646_v4  ;;  %v9397_v3 = vld [vmem:[#allocation11 + $0xafc] sm:$0xf]  ;;  %v7503_v4 = vld [vmem:[#allocation11 + $0xb14] sm:$0xf0]  ;;  %v7286_v13 = vor.u32 %v9345_v6, %v7285_v5 }
 0x200   :  { %4101 = vmatpush.bf16.msrb.mxu1 %v7426_v8  ;;  %4018 = vmatmul.bf16.vlgmr.msrb.gmra.mxu2 %v9885_v27  ;;  %v7063_v8 = vld [vmem:[#allocation11 + $0x79c] sm:$0xf0]  ;;  %v7506_v10 = vor.u32 %v9397_v3, %v7503_v4  ;;  %v9474_v3 = vld [vmem:[#allocation11 + $0xd64] sm:$0xf]  ;;  %v9453_v41 = vld [vmem:[#allocation11 + $0xcbc] sm:$0xf] }
 0x201   :  { %4093 = vmatpush.bf16.msrb.mxu0 %v7062_v24  ;;  %v9366_v24 = vld [vmem:[#allocation11 + $0xa00] sm:$0xf0]  ;;  %v7066_v14 = vor.u32 %v9286_v7, %v7063_v8  ;;  %v7811_v4 = vld [vmem:[#allocation11 + $0xd7c] sm:$0xf0]  ;;  %v7593_v7 = vld [vmem:[#allocation11 + $0xba8] sm:$0xf] }
 0x202   :  { %v7370_v32 = vor.u32 %v9366_v24, %v7369_v23  ;;  %v9383_v23 = vld [vmem:[#allocation11 + $0xa8c] sm:$0xf]  ;;  %v7447_v24 = vld [vmem:[#allocation11 + $0xaa4] sm:$0xf0]  ;;  %v9422_v8 = vld [vmem:[#allocation11 + $0xbc0] sm:$0xf0] }
 0x203   :  { %4024 = vmatpush.bf16.msrb.mxu3 %v7838_v17  ;;  %4063 = vmatpush.bf16.msra.mxu2 %v7618_v28  ;;  %v7257_v17 = vld [vmem:[#allocation11 + $0x908] sm:$0xf]  ;;  %v9338_v28 = vld [vmem:[#allocation11 + $0x920] sm:$0xf0]  ;;  %v7450_v40 = vor.u32 %v9383_v23, %v7447_v24  ;;  %v9304_v23 = vld [vmem:[#allocation11 + $0x810] sm:$0xf0]  ;;  %v7786_v24 = vor.u32 %v9467_v25, %v7783_v16 }
 0x204   :  { %4102 = vmatpush.bf16.msrb.mxu1 %v7398_v19  ;;  %v7669_v19 = vld [vmem:[#allocation11 + $0xc48] sm:$0xf]  ;;  %v7258_v26 = vor.u32 %v9338_v28, %v7257_v17  ;;  %v9328_v25 = vld [vmem:[#allocation11 + $0x8d4] sm:$0xf]  ;;  %v7231_v16 = vld [vmem:[#allocation11 + $0x8ec] sm:$0xf0] }
 0x205   :  { %4094 = vmatpush.bf16.msrb.mxu0 %v7034_v43  ;;  %v7562_v43 = vor.u32 %v9411_v35, %v7559_v36  ;;  %v7649_v35 = vld [vmem:[#allocation11 + $0xc18] sm:$0xf]  ;;  %v9436_v36 = vld [vmem:[#allocation11 + $0xc30] sm:$0xf0]  ;;  %v7670_v39 = vor.u32 %v9442_v22, %v7669_v19 }
 0x206   :  { %v9356_v19 = vld [vmem:[#allocation11 + $0x9b4] sm:$0xf]  ;;  %v7125_v22 = vld [vmem:[#allocation11 + $0x7f8] sm:$0xf] }
 0x207   :  { %4025 = vmatpush.bf16.msrb.mxu3 %v7810_v29  ;;  %4064 = vmatpush.bf16.msra.mxu2 %v7590_v30  ;;  %v7229_v29 = vld [vmem:[#allocation11 + $0x8d0] sm:$0xf]  ;;  %v9331_v30 = vld [vmem:[#allocation11 + $0x8e8] sm:$0xf0]  ;;  %v7126_v61 = vor.u32 %v9304_v23, %v7125_v22  ;;  %v7651_v22 = vld [vmem:[#allocation11 + $0xc34] sm:$0xf0] }
 0x208   :  { %4103 = vmatpush.bf16.msrb.mxu1 %v7370_v32  ;;  %v9488_v32 = vld [vmem:[#allocation11 + $0xdd4] sm:$0xf]  ;;  %v7230_v44 = vor.u32 %v9331_v30, %v7229_v29  ;;  %v7755_v29 = vld [vmem:[#allocation11 + $0xd0c] sm:$0xf0]  ;;  %v7433_v23 = vld [vmem:[#allocation11 + $0xa60] sm:$0xf] }
 0x209   :  { %4095 = vmatpush.bf16.msrb.mxu0 %v7006_v1  ;;  %v7094_v1 = vor.u32 %v9293_v53, %v7091_v56  ;;  %v7621_v53 = vld [vmem:[#allocation11 + $0xbe0] sm:$0xf]  ;;  %v9429_v56 = vld [vmem:[#allocation11 + $0xbf8] sm:$0xf0] }
 0x20b   :  { %4026 = vmatpush.bf16.msrb.mxu3 %v7782_v42  ;;  %4065 = vmatpush.bf16.msra.mxu2 %v7562_v43  ;;  %v7209_v42 = vld [vmem:[#allocation11 + $0x8a0] sm:$0xf]  ;;  %v9325_v43 = vld [vmem:[#allocation11 + $0x8b8] sm:$0xf0] }
 0x20c   :  { %4096 = vmatmul.bf16.vlgmr.msrb.gmra.mxu0 %v9874_v15  ;;  %4104 = vmatpush.bf16.msrb.mxu1 %v7342_v47  ;;  %v7210_v52 = vor.u32 %v9325_v43, %v7209_v42  ;;  %v7727_v42 = vld [vmem:[#allocation11 + $0xcd4] sm:$0xf0] }
 0x20d   :  { %4140 = vmatpush.bf16.msra.mxu0 %v7206_v9  ;;  %v7726_v9 = vor.u32 %v9456_v62, %v7725_v60  ;;  %v7181_v60 = vld [vmem:[#allocation11 + $0x868] sm:$0xf]  ;;  %v9318_v62 = vld [vmem:[#allocation11 + $0x880] sm:$0xf0] }
 0x20e   :  { %3979 = vmatmul.bf16.vlgmr.msra.gmra.mxu3 %v9892_v2  ;;  %v7182_v6 = vor.u32 %v9318_v62, %v7181_v60 }
 0x20f   :  { %4027 = vmatpush.bf16.msrb.mxu3 %v7754_v58  ;;  %4066 = vmatpush.bf16.msra.mxu2 %v7534_v59  ;;  %v9370_v58 = vld [vmem:[#allocation11 + $0xa24] sm:$0xf]  ;;  %v7399_v59 = vld [vmem:[#allocation11 + $0xa3c] sm:$0xf0] }
 0x210   :  { %4105 = vmatpush.bf16.msrb.mxu1 %v7314_v63  ;;  %v7842_v63 = vor.u32 %v9481_v49, %v7839_v50  ;;  %v7402_v5 = vor.u32 %v9370_v58, %v7399_v59  ;;  %v7287_v50 = vld [vmem:[#allocation11 + $0x95c] sm:$0xf0]  ;;  %v9446_v58 = vld [vmem:[#allocation11 + $0xc84] sm:$0xf] }
 0x211   :  { %4141 = vmatpush.bf16.msra.mxu0 %v7178_v20  ;;  %v7698_v20 = vor.u32 %v9449_v12, %v7697_v11  ;;  %v7153_v11 = vld [vmem:[#allocation11 + $0x830] sm:$0xf]  ;;  %v9311_v12 = vld [vmem:[#allocation11 + $0x848] sm:$0xf0]  ;;  %v7699_v59 = vld [vmem:[#allocation11 + $0xc9c] sm:$0xf0] }
 0x212   :  { %v7154_v28 = vor.u32 %v9311_v12, %v7153_v11  ;;  %v7453_v11 = vld [vmem:[#allocation11 + $0xa90] sm:$0xf]  ;;  %v9387_v12 = vld [vmem:[#allocation11 + $0xaa8] sm:$0xf0] }
 0x213   :  { %4028 = vmatpush.bf16.msrb.mxu3 %v7726_v9  ;;  %4067 = vmatpush.bf16.msra.mxu2 %v7506_v10  ;;  %v9363_v9 = vld [vmem:[#allocation11 + $0x9ec] sm:$0xf]  ;;  %v7371_v10 = vld [vmem:[#allocation11 + $0xa04] sm:$0xf0] }
 0x214   :  { %4106 = vmatpush.bf16.msrb.mxu1 %v7286_v13  ;;  %v7814_v13 = vor.u32 %v9474_v3, %v7811_v4  ;;  %v7374_v17 = vor.u32 %v9363_v9, %v7371_v10  ;;  %v9335_v3 = vld [vmem:[#allocation11 + $0x90c] sm:$0xf]  ;;  %v7259_v4 = vld [vmem:[#allocation11 + $0x924] sm:$0xf0] }
 0x215   :  { %4142 = vmatpush.bf16.msra.mxu0 %v7150_v34  ;;  %v7867_v34 = vld [vmem:[#allocation11 + $0xdec] sm:$0xf0]  ;;  %v7671_v10 = vld [vmem:[#allocation11 + $0xc64] sm:$0xf0] }
 0x216   :  { %v7870_v47 = vor.u32 %v9488_v32, %v7867_v34  ;;  %v9408_v32 = vld [vmem:[#allocation11 + $0xb50] sm:$0xf0]  ;;  %v9349_v34 = vld [vmem:[#allocation11 + $0x97c] sm:$0xf] }
 0x217   :  { %4029 = vmatpush.bf16.msrb.mxu3 %v7698_v20  ;;  %4068 = vmatpush.bf16.msra.mxu2 %v7478_v21  ;;  %v7343_v21 = vld [vmem:[#allocation11 + $0x9cc] sm:$0xf0] }
 0x218   :  { %4107 = vmatpush.bf16.msrb.mxu1 %v7258_v26  ;;  %v7566_v26 = vor.u32 %v9415_v18, %v7565_v33  ;;  %v7346_v30 = vor.u32 %v9356_v19, %v7343_v21  ;;  %v9276_v33 = vld [vmem:[#allocation11 + $0x730] sm:$0xf0]  ;;  %v7873_v18 = vld [vmem:[#allocation11 + $0xdd8] sm:$0xf]  ;;  %v9433_v21 = vld [vmem:[#allocation11 + $0xc1c] sm:$0xf] }
 0x219   :  { %4143 = vmatpush.bf16.msra.mxu0 %v7122_v48  ;;  %v7650_v48 = vor.u32 %v9436_v36, %v7649_v35  ;;  %v7315_v35 = vld [vmem:[#allocation11 + $0x994] sm:$0xf0]  ;;  %v7097_v36 = vld [vmem:[#allocation11 + $0x7c0] sm:$0xf]  ;;  %v9492_v19 = vld [vmem:[#allocation11 + $0xdf0] sm:$0xf0] }
 0x21a   :  { %v7318_v43 = vor.u32 %v9349_v34, %v7315_v35  ;;  %v7654_v34 = vor.u32 %v9433_v21, %v7651_v22  ;;  %v7845_v35 = vld [vmem:[#allocation11 + $0xda0] sm:$0xf]  ;;  %v9405_v22 = vld [vmem:[#allocation11 + $0xb3c] sm:$0xf] }
 0x21b   :  { %4030 = vmatpush.bf16.msrb.mxu3 %v7670_v39  ;;  %4069 = vmatpush.bf16.msra.mxu2 %v7450_v40  ;;  %v9903_v20 = vpop.f32.mrf.mxu0  ;;  %v7538_v40 = vor.u32 %v9408_v32, %v7537_v31  ;;  %v7874_v32 = vor.u32 %v9492_v19, %v7873_v18  ;;  %v9464_v18 = vld [vmem:[#allocation11 + $0xd10] sm:$0xf0] }
 0x21c   :  { %4108 = vmatpush.bf16.msrb.mxu1 %v7230_v44  ;;  %v7098_v44 = vor.u32 %v9297_v38, %v7097_v36  ;;  %v9485_v36 = vld [vmem:[#allocation11 + $0xdb8] sm:$0xf0] }
 0x21d   :  { %4144 = vmatpush.bf16.msra.mxu0 %v7094_v1  ;;  %v7622_v1 = vor.u32 %v9429_v56, %v7621_v53  ;;  %v7730_v53 = vor.u32 %v9453_v41, %v7727_v42  ;;  %v7623_v41 = vld [vmem:[#allocation11 + $0xbfc] sm:$0xf0]  ;;  %v7405_v42 = vld [vmem:[#allocation11 + $0xa28] sm:$0xf] }
 0x21e   :  { %4070 = vmatmul.bf16.vlgmr.msra.gmra.mxu2 %v9885_v27  ;;  %4031 = vmatmul.bf16.vlgmr.msrb.gmra.mxu3 %v9892_v2 }
 0x21f   :  { %4075 = vmatpush.bf16.msra.mxu3 %v7870_v47  ;;  %4114 = vmatpush.bf16.msrb.mxu2 %v7650_v48  ;;  %v9401_v47 = vld [vmem:[#allocation11 + $0xb18] sm:$0xf0]  ;;  %v9342_v48 = vld [vmem:[#allocation11 + $0x944] sm:$0xf] }
 0x220   :  { %4153 = vmatpush.bf16.msra.mxu1 %v7430_v51  ;;  %v7069_v51 = vld [vmem:[#allocation11 + $0x788] sm:$0xf]  ;;  %v7290_v60 = vor.u32 %v9342_v48, %v7287_v50  ;;  %v7846_v48 = vor.u32 %v9485_v36, %v7845_v35  ;;  %v9398_v36 = vld [vmem:[#allocation11 + $0xb04] sm:$0xf] }
 0x221   :  { %4145 = vmatpush.bf16.msra.mxu0 %v7066_v14  ;;  %4109 = vmatmul.bf16.vlgmr.msrb.gmra.mxu1 %v9879_v0  ;;  %v7594_v14 = vor.u32 %v9422_v8, %v7593_v7  ;;  %v9439_v7 = vld [vmem:[#allocation11 + $0xc4c] sm:$0xf]  ;;  %v7702_v8 = vor.u32 %v9446_v58, %v7699_v59  ;;  %v7817_v50 = vld [vmem:[#allocation11 + $0xd68] sm:$0xf]  ;;  %v7377_v59 = vld [vmem:[#allocation11 + $0x9f0] sm:$0xf] }
 0x222   :  { %v7595_v58 = vld [vmem:[#allocation11 + $0xbc4] sm:$0xf0] }
 0x223   :  { %4076 = vmatpush.bf16.msra.mxu3 %v7842_v63  ;;  %4115 = vmatpush.bf16.msrb.mxu2 %v7622_v1  ;;  %v3891_v49 = vpop.f32.mrf.mxu0  ;;  %v7481_v63 = vld [vmem:[#allocation11 + $0xac8] sm:$0xf]  ;;  %v9394_v1 = vld [vmem:[#allocation11 + $0xae0] sm:$0xf0] }
 0x224   :  { %4154 = vmatpush.bf16.msra.mxu1 %v7402_v5  ;;  %v7041_v5 = vld [vmem:[#allocation11 + $0x750] sm:$0xf]  ;;  %v7482_v9 = vor.u32 %v9394_v1, %v7481_v63  ;;  %v8956_v63 = vld [vmem:[#allocation11 + $0x130] sm:$0xf0] }
 0x225   :  { %4146 = vmatpush.bf16.msra.mxu0 %v7038_v55  ;;  %v9460_v55 = vld [vmem:[#allocation11 + $0xcf4] sm:$0xf] }
 0x226   :  { %v7758_v39 = vor.u32 %v9460_v55, %v7755_v29  ;;  %v9381_v55 = vld [vmem:[#allocation11 + $0xa78] sm:$0xf0]  ;;  %v8081_v29 = vld [vmem:[#allocation11 + $0x188] sm:$0xf] }
 0x227   :  { %4077 = vmatpush.bf16.msra.mxu3 %v7814_v13  ;;  %4116 = vmatpush.bf16.msrb.mxu2 %v7594_v14  ;;  %v7262_v13 = vor.u32 %v9335_v3, %v7259_v4  ;;  %v7434_v38 = vor.u32 %v9381_v55, %v7433_v23  ;;  %v7789_v4 = vld [vmem:[#allocation11 + $0xd30] sm:$0xf]  ;;  %v7539_v23 = vld [vmem:[#allocation11 + $0xb54] sm:$0xf0]  ;;  %v8942_v55 = vld [vmem:[#allocation11 + $0xc0] sm:$0xf0] }
 0x228   :  { %4155 = vmatpush.bf16.msra.mxu1 %v7374_v17  ;;  %v7013_v17 = vld [vmem:[#allocation11 + $0x718] sm:$0xf] }
 0x229   :  { %4147 = vmatpush.bf16.msra.mxu0 %v7010_v45  ;;  %v7509_v45 = vld [vmem:[#allocation11 + $0xb00] sm:$0xf]  ;;  %v7014_v31 = vor.u32 %v9276_v33, %v7013_v17  ;;  %v7761_v33 = vld [vmem:[#allocation11 + $0xcf8] sm:$0xf] }
 0x22a   :  { %v7510_v56 = vor.u32 %v9401_v47, %v7509_v45  ;;  %v8963_v45 = vld [vmem:[#allocation11 + $0x168] sm:$0xf0] }
 0x22b   :  { %4078 = vmatpush.bf16.msra.mxu3 %v7786_v24  ;;  %4117 = vmatpush.bf16.msrb.mxu2 %v7566_v26  ;;  %v7674_v24 = vor.u32 %v9439_v7, %v7671_v10  ;;  %v7454_v26 = vor.u32 %v9387_v12, %v7453_v11  ;;  %v7567_v10 = vld [vmem:[#allocation11 + $0xb8c] sm:$0xf0]  ;;  %v7349_v11 = vld [vmem:[#allocation11 + $0x9b8] sm:$0xf] }
 0x22c   :  { %4148 = vmatmul.bf16.vlgmr.msra.gmra.mxu0 %v9874_v15  ;;  %4156 = vmatpush.bf16.msra.mxu1 %v7346_v30  ;;  %v8970_v30 = vld [vmem:[#allocation11 + $0x1a0] sm:$0xf0] }
 0x22d   :  { %4192 = vmatpush.bf16.msrb.mxu0 %v7210_v52  ;;  %v9290_v52 = vld [vmem:[#allocation11 + $0x7a0] sm:$0xf0] }
 0x22e   :  { %v7070_v62 = vor.u32 %v9290_v52, %v7069_v51  ;;  %v9478_v51 = vld [vmem:[#allocation11 + $0xd80] sm:$0xf0] }
 0x22f   :  { %4079 = vmatpush.bf16.msra.mxu3 %v7758_v39  ;;  %4118 = vmatpush.bf16.msrb.mxu2 %v7538_v40  ;;  %v8082_v39 = vor.u32 %v8970_v30, %v8081_v29  ;;  %v9426_v40 = vld [vmem:[#allocation11 + $0xbe4] sm:$0xf]  ;;  %v7818_v1 = vor.u32 %v9478_v51, %v7817_v50  ;;  %v7762_v29 = vor.u32 %v9464_v18, %v7761_v33  ;;  %v9391_v51 = vld [vmem:[#allocation11 + $0xacc] sm:$0xf]  ;;  %v8305_v33 = vld [vmem:[#allocation11 + $0x348] sm:$0xf] }
 0x230   :  { %4157 = vmatpush.bf16.msra.mxu1 %v7318_v43  ;;  %v9374_v43 = vld [vmem:[#allocation11 + $0xa40] sm:$0xf0]  ;;  %v7626_v49 = vor.u32 %v9426_v40, %v7623_v41  ;;  %v7542_v30 = vor.u32 %v9405_v22, %v7539_v23  ;;  %v7941_v41 = vld [vmem:[#allocation11 + $0x70] sm:$0xf]  ;;  %v8967_v22 = vld [vmem:[#allocation11 + $0x18c] sm:$0xf] }
 0x231   :  { %4193 = vmatpush.bf16.msrb.mxu0 %v7182_v6  ;;  %v9283_v6 = vld [vmem:[#allocation11 + $0x768] sm:$0xf0]  ;;  %v7406_v52 = vor.u32 %v9374_v43, %v7405_v42  ;;  %v9346_v40 = vld [vmem:[#allocation11 + $0x960] sm:$0xf0]  ;;  %v8083_v23 = vld [vmem:[#allocation11 + $0x1a4] sm:$0xf0] }
 0x232   :  { %v7042_v14 = vor.u32 %v9283_v6, %v7041_v5  ;;  %v9471_v5 = vld [vmem:[#allocation11 + $0xd48] sm:$0xf0] }
 0x233   :  { %4080 = vmatpush.bf16.msra.mxu3 %v7730_v53  ;;  %4119 = vmatpush.bf16.msrb.mxu2 %v7510_v56  ;;  %v9419_v56 = vld [vmem:[#allocation11 + $0xbac] sm:$0xf] }
 0x234   :  { %4158 = vmatpush.bf16.msra.mxu1 %v7290_v60  ;;  %v9367_v60 = vld [vmem:[#allocation11 + $0xa08] sm:$0xf0]  ;;  %v7598_v3 = vor.u32 %v9419_v56, %v7595_v58  ;;  %v7913_v58 = vld [vmem:[#allocation11 + $0x38] sm:$0xf] }
 0x235   :  { %4194 = vmatpush.bf16.msrb.mxu0 %v7154_v28  ;;  %v9905_v28 = vpop.f32.mrf.mxu0  ;;  %v7378_v6 = vor.u32 %v9367_v60, %v7377_v59  ;;  %v8935_v42 = vld [vmem:[#allocation11 + $0x88] sm:$0xf0]  ;;  %v8928_v59 = vld [vmem:[#allocation11 + $0x50] sm:$0xf0]  ;;  %v7677_v60 = vld [vmem:[#allocation11 + $0xc50] sm:$0xf] }
 0x236   :  { %v7942_v50 = vor.u32 %v8935_v42, %v7941_v41  ;;  %v9339_v56 = vld [vmem:[#allocation11 + $0x928] sm:$0xf0] }
 0x237   :  { %4081 = vmatpush.bf16.msra.mxu3 %v7702_v8  ;;  %4120 = vmatpush.bf16.msrb.mxu2 %v7482_v9  ;;  %v9412_v9 = vld [vmem:[#allocation11 + $0xb74] sm:$0xf]  ;;  %v9475_v42 = vld [vmem:[#allocation11 + $0xd6c] sm:$0xf] }
 0x238   :  { %4159 = vmatpush.bf16.msra.mxu1 %v7262_v13  ;;  %v9360_v13 = vld [vmem:[#allocation11 + $0x9d0] sm:$0xf0]  ;;  %v7570_v17 = vor.u32 %v9412_v9, %v7567_v10  ;;  %v7885_v10 = vld [vmem:[#allocation11] sm:$0xf] }
 0x239   :  { %4195 = vmatpush.bf16.msrb.mxu0 %v7126_v61  ;;  %v7234_v61 = vor.u32 %v9328_v25, %v7231_v16  ;;  %v7790_v16 = vor.u32 %v9471_v5, %v7789_v4  ;;  %v7350_v19 = vor.u32 %v9360_v13, %v7349_v11  ;;  %v7455_v4 = vld [vmem:[#allocation11 + $0xaac] sm:$0xf0]  ;;  %v9332_v9 = vld [vmem:[#allocation11 + $0x8f0] sm:$0xf0]  ;;  %v8921_v13 = vld [vmem:[#allocation11 + $0x18] sm:$0xf0] }
 0x23b   :  { %4082 = vmatpush.bf16.msra.mxu3 %v7674_v24  ;;  %4121 = vmatpush.bf16.msrb.mxu2 %v7454_v26  ;;  %v3902_v8 = vpop.f32.mrf.mxu1  ;;  %v7321_v24 = vld [vmem:[#allocation11 + $0x980] sm:$0xf]  ;;  %v7969_v26 = vld [vmem:[#allocation11 + $0xa8] sm:$0xf] }
 0x23c   :  { %4160 = vmatpush.bf16.msra.mxu1 %v7234_v61  ;;  %v9912_v12 = vadd.f32 %v3902_v8, %v9903_v20  ;;  %v9353_v20 = vld [vmem:[#allocation11 + $0x998] sm:$0xf0]  ;;  %v7733_v61 = vld [vmem:[#allocation11 + $0xcc0] sm:$0xf]  ;;  %v7237_v8 = vld [vmem:[#allocation11 + $0x8d8] sm:$0xf] }
 0x23d   :  { %4196 = vmatpush.bf16.msrb.mxu0 %v7098_v44  ;;  %v8053_v44 = vld [vmem:[#allocation11 + $0x150] sm:$0xf]  ;;  %v3943_v47 = vpop.f32.mrf.mxu0 }
 0x23e   :  { %v8054_v53 = vor.u32 %v8963_v45, %v8053_v44  ;;  %4083 = vmatmul.bf16.vlgmr.msra.gmra.mxu3 %v9892_v2  ;;  %4122 = vmatmul.bf16.vlgmr.msrb.gmra.mxu2 %v9885_v27  ;;  %v7705_v47 = vld [vmem:[#allocation11 + $0xc88] sm:$0xf] }
 0x23f   :  { %4127 = vmatpush.bf16.msrb.mxu3 %v7874_v32  ;;  %4166 = vmatpush.bf16.msra.mxu2 %v7654_v34  ;;  %v7322_v32 = vor.u32 %v9353_v20, %v7321_v24  ;;  %v7970_v34 = vor.u32 %v8942_v55, %v7969_v26  ;;  %v7238_v24 = vor.u32 %v9332_v9, %v7237_v8 }
 0x240   :  { %4205 = vmatpush.bf16.msrb.mxu1 %v7434_v38  ;;  %v7511_v38 = vld [vmem:[#allocation11 + $0xb1c] sm:$0xf0]  ;;  %v7886_v20 = vor.u32 %v8921_v13, %v7885_v10 }
 0x241   :  { %4197 = vmatpush.bf16.msrb.mxu0 %v7070_v62  ;;  %v8025_v62 = vld [vmem:[#allocation11 + $0x118] sm:$0xf]  ;;  %4161 = vmatmul.bf16.vlgmr.msra.gmra.mxu1 %v9879_v0  ;;  %v7514_v45 = vor.u32 %v9398_v36, %v7511_v38  ;;  %v9019_v36 = vld [vmem:[#allocation11 + $0x328] sm:$0xf0]  ;;  %v8960_v38 = vld [vmem:[#allocation11 + $0x154] sm:$0xf] }
 0x242   :  { %v8026_v7 = vor.u32 %v8956_v63, %v8025_v62 }
 0x243   :  { %4128 = vmatpush.bf16.msrb.mxu3 %v7846_v48  ;;  %4167 = vmatpush.bf16.msra.mxu2 %v7626_v49  ;;  %v3904_v35 = vpop.f32.mrf.mxu1  ;;  %v9450_v48 = vld [vmem:[#allocation11 + $0xca0] sm:$0xf0] }
 0x244   :  { %4206 = vmatpush.bf16.msrb.mxu1 %v7406_v52  ;;  %v7483_v52 = vld [vmem:[#allocation11 + $0xae4] sm:$0xf0]  ;;  %v7706_v62 = vor.u32 %v9450_v48, %v7705_v47  ;;  %v8277_v35 = vld [vmem:[#allocation11 + $0x310] sm:$0xf] }
 0x245   :  { %4198 = vmatpush.bf16.msrb.mxu0 %v7042_v14  ;;  %v7997_v14 = vld [vmem:[#allocation11 + $0xe0] sm:$0xf]  ;;  %v7486_v63 = vor.u32 %v9391_v51, %v7483_v52  ;;  %v7601_v48 = vld [vmem:[#allocation11 + $0xbb0] sm:$0xf]  ;;  %v9012_v51 = vld [vmem:[#allocation11 + $0x2f0] sm:$0xf0] }
 0x246   :  { %v8953_v52 = vld [vmem:[#allocation11 + $0x11c] sm:$0xf] }
 0x247   :  { %4129 = vmatpush.bf16.msrb.mxu3 %v7818_v1  ;;  %4168 = vmatpush.bf16.msra.mxu2 %v7598_v3  ;;  %v9443_v1 = vld [vmem:[#allocation11 + $0xc68] sm:$0xf0]  ;;  %v9384_v3 = vld [vmem:[#allocation11 + $0xa94] sm:$0xf] }
 0x248   :  { %4207 = vmatpush.bf16.msrb.mxu1 %v7378_v6  ;;  %v7914_v6 = vor.u32 %v8928_v59, %v7913_v58  ;;  %v7678_v18 = vor.u32 %v9443_v1, %v7677_v60  ;;  %v9468_v59 = vld [vmem:[#allocation11 + $0xd34] sm:$0xf]  ;;  %v7791_v60 = vld [vmem:[#allocation11 + $0xd4c] sm:$0xf0]  ;;  %v7573_v1 = vld [vmem:[#allocation11 + $0xb78] sm:$0xf] }
 0x249   :  { %4199 = vmatpush.bf16.msrb.mxu0 %v7014_v31  ;;  %v9914_v25 = vpop.f32.mrf.mxu0  ;;  %v9457_v31 = vld [vmem:[#allocation11 + $0xcd8] sm:$0xf0]  ;;  %v7794_v10 = vor.u32 %v9468_v59, %v7791_v60  ;;  %v7679_v59 = vld [vmem:[#allocation11 + $0xc6c] sm:$0xf0]  ;;  %v7461_v60 = vld [vmem:[#allocation11 + $0xa98] sm:$0xf] }
 0x24a   :  { %v7734_v44 = vor.u32 %v9457_v31, %v7733_v61  ;;  %v8086_v31 = vor.u32 %v8967_v22, %v8083_v23  ;;  %v8939_v22 = vld [vmem:[#allocation11 + $0xac] sm:$0xf]  ;;  %v7971_v23 = vld [vmem:[#allocation11 + $0xc4] sm:$0xf0] }
 0x24b   :  { %4130 = vmatpush.bf16.msrb.mxu3 %v7790_v16  ;;  %4169 = vmatpush.bf16.msra.mxu2 %v7570_v17  ;;  %v7657_v16 = vld [vmem:[#allocation11 + $0xc20] sm:$0xf]  ;;  %v9437_v17 = vld [vmem:[#allocation11 + $0xc38] sm:$0xf0] }
 0x24c   :  { %4200 = vmatmul.bf16.vlgmr.msrb.gmra.mxu0 %v9874_v15  ;;  %v8949_v15 = vld [vmem:[#allocation11 + $0xf8] sm:$0xf0]  ;;  %4208 = vmatpush.bf16.msrb.mxu1 %v7350_v19  ;;  %v7458_v19 = vor.u32 %v9384_v3, %v7455_v4  ;;  %v7658_v55 = vor.u32 %v9437_v17, %v7657_v16  ;;  %v9416_v3 = vld [vmem:[#allocation11 + $0xb90] sm:$0xf0]  ;;  %v8221_v4 = vld [vmem:[#allocation11 + $0x2a0] sm:$0xf] }
 0x24d   :  { %5396 = vmatpush.bf16.msra.mxu0 %v8082_v39  ;;  %v7998_v21 = vor.u32 %v8949_v15, %v7997_v14  ;;  %v7293_v39 = vld [vmem:[#allocation11 + $0x948] sm:$0xf]  ;;  %v9489_v14 = vld [vmem:[#allocation11 + $0xddc] sm:$0xf]  ;;  %v7875_v15 = vld [vmem:[#allocation11 + $0xdf4] sm:$0xf0]  ;;  %v7574_v13 = vor.u32 %v9416_v3, %v7573_v1 }
 0x24e   :  { %v7294_v49 = vor.u32 %v9346_v40, %v7293_v39  ;;  %v7878_v26 = vor.u32 %v9489_v14, %v7875_v15  ;;  %v8055_v39 = vld [vmem:[#allocation11 + $0x16c] sm:$0xf0]  ;;  %v9461_v14 = vld [vmem:[#allocation11 + $0xcfc] sm:$0xf]  ;;  %v7763_v15 = vld [vmem:[#allocation11 + $0xd14] sm:$0xf0] }
 0x24f   :  { %4131 = vmatpush.bf16.msrb.mxu3 %v7762_v29  ;;  %4170 = vmatpush.bf16.msra.mxu2 %v7542_v30  ;;  %v9482_v29 = vld [vmem:[#allocation11 + $0xda4] sm:$0xf]  ;;  %v7847_v30 = vld [vmem:[#allocation11 + $0xdbc] sm:$0xf0]  ;;  %v8058_v47 = vor.u32 %v8960_v38, %v8055_v39 }
 0x250   :  { %4209 = vmatpush.bf16.msrb.mxu1 %v7322_v32  ;;  %v7629_v32 = vld [vmem:[#allocation11 + $0xbe8] sm:$0xf]  ;;  %v8109_v3 = vld [vmem:[#allocation11 + $0x1c0] sm:$0xf] }
 0x251   :  { %5397 = vmatpush.bf16.msra.mxu0 %v8054_v53  ;;  %v3995_v43 = vpop.f32.mrf.mxu0  ;;  %v7265_v53 = vld [vmem:[#allocation11 + $0x910] sm:$0xf] }
 0x252   :  { %v7266_v5 = vor.u32 %v9339_v56, %v7265_v53  ;;  %v7819_v43 = vld [vmem:[#allocation11 + $0xd84] sm:$0xf0]  ;;  %v8027_v53 = vld [vmem:[#allocation11 + $0x134] sm:$0xf0] }
 0x253   :  { %4132 = vmatpush.bf16.msrb.mxu3 %v7734_v44  ;;  %4171 = vmatpush.bf16.msra.mxu2 %v7514_v45  ;;  %v8278_v45 = vor.u32 %v9019_v36, %v8277_v35  ;;  %v7822_v56 = vor.u32 %v9475_v42, %v7819_v43  ;;  %v8932_v35 = vld [vmem:[#allocation11 + $0x74] sm:$0xf]  ;;  %v7943_v36 = vld [vmem:[#allocation11 + $0x8c] sm:$0xf0] }
 0x254   :  { %4210 = vmatpush.bf16.msrb.mxu1 %v7294_v49  ;;  %v9423_v49 = vld [vmem:[#allocation11 + $0xbc8] sm:$0xf0]  ;;  %v7946_v43 = vor.u32 %v8932_v35, %v7943_v36  ;;  %v8061_v35 = vld [vmem:[#allocation11 + $0x158] sm:$0xf]  ;;  %v8964_v36 = vld [vmem:[#allocation11 + $0x170] sm:$0xf0] }
 0x255   :  { %5398 = vmatpush.bf16.msra.mxu0 %v8026_v7  ;;  %v3954_v7 = vpop.f32.mrf.mxu1  ;;  %v7602_v58 = vor.u32 %v9423_v49, %v7601_v48  ;;  %v8137_v48 = vld [vmem:[#allocation11 + $0x1f8] sm:$0xf]  ;;  %v8984_v49 = vld [vmem:[#allocation11 + $0x210] sm:$0xf0] }
 0x256   :  { %v9917_v11 = vadd.f32 %v3954_v7, %v9905_v28  ;;  %v1214_v28 = vmax.f32 %v9853_v37, 0.0  ;;  %v7850_v37 = vor.u32 %v9482_v29, %v7847_v30  ;;  %v7999_v7 = vld [vmem:[#allocation11 + $0xfc] sm:$0xf0]  ;;  %v7974_v30 = vor.u32 %v8939_v22, %v7971_v23 }
 0x257   :  { %4133 = vmatpush.bf16.msrb.mxu3 %v7706_v62  ;;  %4172 = vmatpush.bf16.msra.mxu2 %v7486_v63  ;;  %v8030_v63 = vor.u32 %v8953_v52, %v8027_v53  ;;  %v9440_v53 = vld [vmem:[#allocation11 + $0xc54] sm:$0xf]  ;;  %v1215_v22 = vmax.f32 %v9860_v46, 0.0 }
 0x258   :  { %4211 = vmatpush.bf16.msrb.mxu1 %v7266_v5  ;;  %v9920_v44 = vpack.c.bf16 %v1214_v28, %v1214_v28  ;;  %v9005_v5 = vld [vmem:[#allocation11 + $0x2b8] sm:$0xf0] }
 0x259   :  { %5399 = vmatpush.bf16.msra.mxu0 %v7998_v21  ;;  %v9026_v21 = vld [vmem:[#allocation11 + $0x360] sm:$0xf0]  ;;  %v8222_v16 = vor.u32 %v9005_v5, %v8221_v4  ;;  %v8977_v4 = vld [vmem:[#allocation11 + $0x1d8] sm:$0xf0] }
 0x25a   :  { %v8306_v61 = vor.u32 %v9026_v21, %v8305_v33  ;;  %v7545_v33 = vld [vmem:[#allocation11 + $0xb40] sm:$0xf]  ;;  %v8998_v21 = vld [vmem:[#allocation11 + $0x280] sm:$0xf0] }
 0x25b   :  { %4134 = vmatpush.bf16.msrb.mxu3 %v7678_v18  ;;  %4173 = vmatpush.bf16.msra.mxu2 %v7458_v19  ;;  %v9409_v18 = vld [vmem:[#allocation11 + $0xb58] sm:$0xf0]  ;;  %v8193_v19 = vld [vmem:[#allocation11 + $0x268] sm:$0xf]  ;;  %v8918_v5 = vld [vmem:[#allocation11 + $0x4] sm:$0xf] }
 0x25c   :  { %4212 = vmatpush.bf16.msrb.mxu1 %v7238_v24  ;;  %v7546_v28 = vor.u32 %v9409_v18, %v7545_v33  ;;  %v8194_v29 = vor.u32 %v8998_v21, %v8193_v19  ;;  %v8089_v33 = vld [vmem:[#allocation11 + $0x190] sm:$0xf]  ;;  %v8971_v18 = vld [vmem:[#allocation11 + $0x1a8] sm:$0xf0]  ;;  %v8110_v19 = vor.u32 %v8977_v4, %v8109_v3 }
 0x25d   :  { %5400 = vmatpush.bf16.msra.mxu0 %v7970_v34  ;;  %v9430_v34 = vld [vmem:[#allocation11 + $0xc00] sm:$0xf0]  ;;  %v3956_v40 = vpop.f32.mrf.mxu1 }
 0x25e   :  { %v7630_v41 = vor.u32 %v9430_v34, %v7629_v32  ;;  %4135 = vmatmul.bf16.vlgmr.msrb.gmra.mxu3 %v9892_v2  ;;  %4174 = vmatmul.bf16.vlgmr.msra.gmra.mxu2 %v9885_v27  ;;  %v8165_v32 = vld [vmem:[#allocation11 + $0x230] sm:$0xf]  ;;  %v8991_v34 = vld [vmem:[#allocation11 + $0x248] sm:$0xf0] }
 0x25f   :  { %4179 = vmatpush.bf16.msra.mxu3 %v7878_v26  ;;  %4218 = vmatpush.bf16.msrb.mxu2 %v7658_v55  ;;  %v9454_v26 = vld [vmem:[#allocation11 + $0xcc4] sm:$0xf]  ;;  %v7735_v55 = vld [vmem:[#allocation11 + $0xcdc] sm:$0xf0]  ;;  %v8166_v42 = vor.u32 %v8991_v34, %v8165_v32  ;;  %v8279_v34 = vld [vmem:[#allocation11 + $0x32c] sm:$0xf0] }
 0x260   :  { %5409 = vmatpush.bf16.msra.mxu1 %v8306_v61  ;;  %v7517_v61 = vld [vmem:[#allocation11 + $0xb08] sm:$0xf] }
 0x261   :  { %5401 = vmatpush.bf16.msra.mxu0 %v7942_v50  ;;  %v8249_v50 = vld [vmem:[#allocation11 + $0x2d8] sm:$0xf]  ;;  %4213 = vmatmul.bf16.vlgmr.msrb.gmra.mxu1 %v9879_v0  ;;  %v3915_v24 = vpop.f32.mrf.mxu2 }
 0x262   :  { %v8250_v62 = vor.u32 %v9012_v51, %v8249_v50  ;;  %v8925_v50 = vld [vmem:[#allocation11 + $0x3c] sm:$0xf]  ;;  %v7915_v51 = vld [vmem:[#allocation11 + $0x54] sm:$0xf0] }
 0x263   :  { %4180 = vmatpush.bf16.msra.mxu3 %v7850_v37  ;;  %4219 = vmatpush.bf16.msrb.mxu2 %v7630_v41  ;;  %v9447_v37 = vld [vmem:[#allocation11 + $0xc8c] sm:$0xf]  ;;  %v7707_v41 = vld [vmem:[#allocation11 + $0xca4] sm:$0xf0]  ;;  %v7918_v1 = vor.u32 %v8925_v50, %v7915_v51  ;;  %v7797_v51 = vld [vmem:[#allocation11 + $0xd38] sm:$0xf] }
 0x264   :  { %5410 = vmatpush.bf16.msra.mxu1 %v8278_v45  ;;  %v7489_v45 = vld [vmem:[#allocation11 + $0xad0] sm:$0xf] }
 0x265   :  { %5402 = vmatpush.bf16.msra.mxu0 %v7914_v6  ;;  %v8946_v6 = vld [vmem:[#allocation11 + $0xe4] sm:$0xf]  ;;  %v4006_v0 = vpop.f32.mrf.mxu1 }
 0x266   :  { %v9929_v9 = vadd.f32 %v4006_v0, %v9914_v25  ;;  %v8002_v17 = vor.u32 %v8946_v6, %v7999_v7  ;;  %v9932_v25 = vadd.f32 %v3915_v24, %v9912_v12  ;;  %v7738_v12 = vor.u32 %v9454_v26, %v7735_v55  ;;  %v7887_v6 = vld [vmem:[#allocation11 + $0x1c] sm:$0xf0]  ;;  %v9493_v0 = vld [vmem:[#allocation11 + $0xdf8] sm:$0xf0] }
 0x267   :  { %4181 = vmatpush.bf16.msra.mxu3 %v7822_v56  ;;  %4220 = vmatpush.bf16.msrb.mxu2 %v7602_v58  ;;  %v7710_v56 = vor.u32 %v9447_v37, %v7707_v41  ;;  %v7881_v7 = vld [vmem:[#allocation11 + $0xde0] sm:$0xf]  ;;  %v7890_v21 = vor.u32 %v8918_v5, %v7887_v6  ;;  %v8090_v55 = vor.u32 %v8971_v18, %v8089_v33  ;;  %v8995_v33 = vld [vmem:[#allocation11 + $0x26c] sm:$0xf] }
 0x268   :  { %5411 = vmatpush.bf16.msra.mxu1 %v8250_v62  ;;  %v9388_v62 = vld [vmem:[#allocation11 + $0xab0] sm:$0xf0]  ;;  %v7882_v23 = vor.u32 %v9493_v0, %v7881_v7  ;;  %v8062_v41 = vor.u32 %v8964_v36, %v8061_v35  ;;  %v7769_v0 = vld [vmem:[#allocation11 + $0xd00] sm:$0xf] }
 0x269   :  { %5403 = vmatpush.bf16.msra.mxu0 %v7886_v20  ;;  %v9926_v8 = vpop.f32.mrf.mxu0  ;;  %v7766_v20 = vor.u32 %v9461_v14, %v7763_v15  ;;  %v3917_v52 = vpop.f32.mrf.mxu2  ;;  %v9023_v14 = vld [vmem:[#allocation11 + $0x34c] sm:$0xf]  ;;  %v7682_v15 = vor.u32 %v9440_v53, %v7679_v59  ;;  %v8445_v59 = vld [vmem:[#allocation11 + $0x460] sm:$0xf] }
 0x26a   :  { %v9472_v52 = vld [vmem:[#allocation11 + $0xd50] sm:$0xf0] }
 0x26b   :  { %4182 = vmatpush.bf16.msra.mxu3 %v7794_v10  ;;  %4221 = vmatpush.bf16.msrb.mxu2 %v7574_v13  ;;  %v8529_v10 = vld [vmem:[#allocation11 + $0x508] sm:$0xf]  ;;  %v9082_v13 = vld [vmem:[#allocation11 + $0x520] sm:$0xf0]  ;;  %v7798_v6 = vor.u32 %v9472_v52, %v7797_v51 }
 0x26c   :  { %5404 = vmatmul.bf16.vlgmr.msra.gmra.mxu0 %v9920_v44  ;;  %5412 = vmatpush.bf16.msra.mxu1 %v8222_v16  ;;  %v7462_v16 = vor.u32 %v9388_v62, %v7461_v60  ;;  %v8530_v24 = vor.u32 %v9082_v13, %v8529_v10  ;;  %v9002_v60 = vld [vmem:[#allocation11 + $0x2a4] sm:$0xf]  ;;  %v8223_v62 = vld [vmem:[#allocation11 + $0x2bc] sm:$0xf0]  ;;  %v9465_v10 = vld [vmem:[#allocation11 + $0xd18] sm:$0xf0] }
 0x26d   :  { %5448 = vmatpush.bf16.msrb.mxu0 %v8086_v31  ;;  %v9402_v31 = vld [vmem:[#allocation11 + $0xb20] sm:$0xf0]  ;;  %v4008_v39 = vpop.f32.mrf.mxu1  ;;  %v8226_v13 = vor.u32 %v9002_v60, %v8223_v62  ;;  %v8111_v62 = vld [vmem:[#allocation11 + $0x1dc] sm:$0xf0] }
 0x26e   :  { %v7518_v40 = vor.u32 %v9402_v31, %v7517_v61  ;;  %v9075_v61 = vld [vmem:[#allocation11 + $0x4e8] sm:$0xf0]  ;;  %v9016_v31 = vld [vmem:[#allocation11 + $0x314] sm:$0xf]  ;;  %v7825_v39 = vld [vmem:[#allocation11 + $0xd70] sm:$0xf] }
 0x26f   :  { %4183 = vmatpush.bf16.msra.mxu3 %v7766_v20  ;;  %4222 = vmatpush.bf16.msrb.mxu2 %v7546_v28  ;;  %v7853_v20 = vld [vmem:[#allocation11 + $0xda8] sm:$0xf]  ;;  %v9486_v28 = vld [vmem:[#allocation11 + $0xdc0] sm:$0xf0]  ;;  %v8282_v37 = vor.u32 %v9016_v31, %v8279_v34  ;;  %v8167_v31 = vld [vmem:[#allocation11 + $0x24c] sm:$0xf0] }
 0x270   :  { %5413 = vmatpush.bf16.msra.mxu1 %v8194_v29  ;;  %v7854_v46 = vor.u32 %v9486_v28, %v7853_v20  ;;  %v9458_v20 = vld [vmem:[#allocation11 + $0xce0] sm:$0xf0]  ;;  %v8936_v34 = vld [vmem:[#allocation11 + $0x90] sm:$0xf0] }
 0x271   :  { %5449 = vmatpush.bf16.msrb.mxu0 %v8058_v47  ;;  %v4047_v38 = vpop.f32.mrf.mxu0  ;;  %v9395_v47 = vld [vmem:[#allocation11 + $0xae8] sm:$0xf0]  ;;  %v3967_v29 = vpop.f32.mrf.mxu2  ;;  %v8974_v60 = vld [vmem:[#allocation11 + $0x1c4] sm:$0xf] }
 0x272   :  { %v7490_v58 = vor.u32 %v9395_v47, %v7489_v45  ;;  %v9936_v32 = vadd.f32 %v3967_v29, %v9917_v11  ;;  %v9068_v11 = vld [vmem:[#allocation11 + $0x4b0] sm:$0xf0]  ;;  %v8251_v45 = vld [vmem:[#allocation11 + $0x2f4] sm:$0xf0]  ;;  %v8033_v47 = vld [vmem:[#allocation11 + $0x120] sm:$0xf] }
 0x273   :  { %4184 = vmatpush.bf16.msra.mxu3 %v7738_v12  ;;  %4223 = vmatpush.bf16.msrb.mxu2 %v7518_v40  ;;  %v9479_v12 = vld [vmem:[#allocation11 + $0xd88] sm:$0xf0]  ;;  %v9938_v40 = vpack.c.bf16 %v1215_v22, %v1215_v22 }
 0x274   :  { %5414 = vmatpush.bf16.msra.mxu1 %v8166_v42  ;;  %v8473_v42 = vld [vmem:[#allocation11 + $0x498] sm:$0xf]  ;;  %v8943_v22 = vld [vmem:[#allocation11 + $0xc8] sm:$0xf0] }
 0x275   :  { %5450 = vmatpush.bf16.msrb.mxu0 %v8030_v63  ;;  %v8138_v63 = vor.u32 %v8984_v49, %v8137_v48  ;;  %v8957_v48 = vld [vmem:[#allocation11 + $0x138] sm:$0xf0]  ;;  %v7826_v49 = vor.u32 %v9479_v12, %v7825_v39  ;;  %v8474_v50 = vor.u32 %v9068_v11, %v8473_v42  ;;  %v9047_v29 = vld [vmem:[#allocation11 + $0x408] sm:$0xf0]  ;;  %v7713_v12 = vld [vmem:[#allocation11 + $0xc90] sm:$0xf] }
 0x277   :  { %4185 = vmatpush.bf16.msra.mxu3 %v7710_v56  ;;  %4224 = vmatpush.bf16.msrb.mxu2 %v7490_v58  ;;  %v8034_v56 = vor.u32 %v8957_v48, %v8033_v47  ;;  %v8981_v47 = vld [vmem:[#allocation11 + $0x1fc] sm:$0xf]  ;;  %v8139_v48 = vld [vmem:[#allocation11 + $0x214] sm:$0xf0] }
 0x278   :  { %5415 = vmatpush.bf16.msra.mxu1 %v8138_v63  ;;  %v8005_v63 = vld [vmem:[#allocation11 + $0xe8] sm:$0xf] }
 0x279   :  { %5451 = vmatpush.bf16.msrb.mxu0 %v8002_v17  ;;  %v8307_v17 = vld [vmem:[#allocation11 + $0x364] sm:$0xf0]  ;;  %v3969_v58 = vpop.f32.mrf.mxu2 }
 0x27a   :  { %v8310_v26 = vor.u32 %v9023_v14, %v8307_v17  ;;  %v9054_v17 = vld [vmem:[#allocation11 + $0x440] sm:$0xf0]  ;;  %v9033_v58 = vld [vmem:[#allocation11 + $0x398] sm:$0xf0] }
 0x27b   :  { %4186 = vmatpush.bf16.msra.mxu3 %v7682_v15  ;;  %4225 = vmatpush.bf16.msrb.mxu2 %v7462_v16  ;;  %v4058_v3 = vpop.f32.mrf.mxu1  ;;  %v8417_v16 = vld [vmem:[#allocation11 + $0x428] sm:$0xf] }
 0x27c   :  { %5416 = vmatpush.bf16.msra.mxu1 %v8110_v19  ;;  %v9947_v5 = vadd.f32 %v4058_v3, %v9926_v8  ;;  %v8195_v19 = vld [vmem:[#allocation11 + $0x284] sm:$0xf0]  ;;  %v7770_v8 = vor.u32 %v9465_v10, %v7769_v0  ;;  %v8922_v3 = vld [vmem:[#allocation11 + $0x20] sm:$0xf0]  ;;  %v9079_v0 = vld [vmem:[#allocation11 + $0x50c] sm:$0xf] }
 0x27d   :  { %5452 = vmatpush.bf16.msrb.mxu0 %v7974_v30  ;;  %v8501_v30 = vld [vmem:[#allocation11 + $0x4d0] sm:$0xf]  ;;  %v8198_v28 = vor.u32 %v8995_v33, %v8195_v19  ;;  %v8531_v10 = vld [vmem:[#allocation11 + $0x524] sm:$0xf0]  ;;  %v8114_v19 = vor.u32 %v8974_v60, %v8111_v62 }
 0x27e   :  { %v8502_v38 = vor.u32 %v9075_v61, %v8501_v30  ;;  %4187 = vmatmul.bf16.vlgmr.msra.gmra.mxu3 %v9892_v2  ;;  %4226 = vmatmul.bf16.vlgmr.msrb.gmra.mxu2 %v9885_v27  ;;  %v9061_v27 = vld [vmem:[#allocation11 + $0x478] sm:$0xf0]  ;;  %v8988_v30 = vld [vmem:[#allocation11 + $0x234] sm:$0xf]  ;;  %v8091_v33 = vld [vmem:[#allocation11 + $0x1ac] sm:$0xf0] }
 0x27f   :  { %4231 = vmatpush.bf16.msrb.mxu3 %v7882_v23  ;;  %5422 = vmatpush.bf16.msra.mxu2 %v8530_v24  ;;  %v8446_v7 = vor.u32 %v9061_v27, %v8445_v59  ;;  %v8418_v23 = vor.u32 %v9054_v17, %v8417_v16  ;;  %v7741_v24 = vld [vmem:[#allocation11 + $0xcc8] sm:$0xf]  ;;  %v8142_v59 = vor.u32 %v8981_v47, %v8139_v48  ;;  %v9027_v16 = vld [vmem:[#allocation11 + $0x368] sm:$0xf0]  ;;  %v8968_v17 = vld [vmem:[#allocation11 + $0x194] sm:$0xf] }
 0x280   :  { %5461 = vmatpush.bf16.msrb.mxu1 %v8310_v26  ;;  %v8035_v47 = vld [vmem:[#allocation11 + $0x13c] sm:$0xf0]  ;;  %v8007_v60 = vld [vmem:[#allocation11 + $0x104] sm:$0xf0] }
 0x281   :  { %5453 = vmatpush.bf16.msrb.mxu0 %v7946_v43  ;;  %v9009_v43 = vld [vmem:[#allocation11 + $0x2dc] sm:$0xf]  ;;  %5417 = vmatmul.bf16.vlgmr.msra.gmra.mxu1 %v9938_v40  ;;  %v3928_v15 = vpop.f32.mrf.mxu3 }
 0x282   :  { %v8254_v53 = vor.u32 %v9009_v43, %v8251_v45  ;;  %v9950_v18 = vadd.f32 %v3928_v15, %v9932_v25  ;;  %v7949_v25 = vld [vmem:[#allocation11 + $0x78] sm:$0xf]  ;;  %v9040_v45 = vld [vmem:[#allocation11 + $0x3d0] sm:$0xf0] }
 0x283   :  { %4232 = vmatpush.bf16.msrb.mxu3 %v7854_v46  ;;  %5423 = vmatpush.bf16.msra.mxu2 %v8502_v38  ;;  %v4019_v61 = vpop.f32.mrf.mxu2  ;;  %v4060_v36 = vpop.f32.mrf.mxu1  ;;  %v7742_v38 = vor.u32 %v9458_v20, %v7741_v24  ;;  %v7950_v42 = vor.u32 %v8936_v34, %v7949_v25  ;;  %v8361_v43 = vld [vmem:[#allocation11 + $0x3b8] sm:$0xf]  ;;  %v8534_v24 = vor.u32 %v9079_v0, %v8531_v10  ;;  %v9020_v25 = vld [vmem:[#allocation11 + $0x330] sm:$0xf0]  ;;  %v8961_v34 = vld [vmem:[#allocation11 + $0x15c] sm:$0xf] }
 0x284   :  { %5462 = vmatpush.bf16.msrb.mxu1 %v8282_v37  ;;  %v9953_v35 = vadd.f32 %v4019_v61, %v9929_v9  ;;  %v9451_v37 = vld [vmem:[#allocation11 + $0xca8] sm:$0xf0]  ;;  %v8929_v9 = vld [vmem:[#allocation11 + $0x58] sm:$0xf0]  ;;  %v8362_v52 = vor.u32 %v9040_v45, %v8361_v43  ;;  %v8503_v61 = vld [vmem:[#allocation11 + $0x4ec] sm:$0xf0] }
 0x285   :  { %5454 = vmatpush.bf16.msrb.mxu0 %v7918_v1  ;;  %v8950_v1 = vld [vmem:[#allocation11 + $0x100] sm:$0xf0]  ;;  %v7714_v51 = vor.u32 %v9451_v37, %v7713_v12  ;;  %v8063_v36 = vld [vmem:[#allocation11 + $0x174] sm:$0xf0]  ;;  %v9013_v43 = vld [vmem:[#allocation11 + $0x2f8] sm:$0xf0] }
 0x286   :  { %v8006_v14 = vor.u32 %v8950_v1, %v8005_v63  ;;  %v7893_v63 = vld [vmem:[#allocation11 + $0x8] sm:$0xf]  ;;  %v8066_v37 = vor.u32 %v8961_v34, %v8063_v36  ;;  %v8954_v45 = vld [vmem:[#allocation11 + $0x124] sm:$0xf]  ;;  %v7951_v34 = vld [vmem:[#allocation11 + $0x94] sm:$0xf0] }
 0x287   :  { %4233 = vmatpush.bf16.msrb.mxu3 %v7826_v49  ;;  %5424 = vmatpush.bf16.msra.mxu2 %v8474_v50  ;;  %v7921_v49 = vld [vmem:[#allocation11 + $0x40] sm:$0xf]  ;;  %v7685_v50 = vld [vmem:[#allocation11 + $0xc58] sm:$0xf]  ;;  %v9110_v0 = vld [vmem:[#allocation11 + $0x600] sm:$0xf0] }
 0x288   :  { %5463 = vmatpush.bf16.msrb.mxu1 %v8254_v53  ;;  %v9444_v53 = vld [vmem:[#allocation11 + $0xc70] sm:$0xf0]  ;;  %v7922_v27 = vor.u32 %v8929_v9, %v7921_v49 }
 0x289   :  { %5455 = vmatpush.bf16.msrb.mxu0 %v7890_v21  ;;  %v9944_v4 = vpop.f32.mrf.mxu0  ;;  %v7977_v21 = vld [vmem:[#allocation11 + $0xb0] sm:$0xf]  ;;  %v3930_v11 = vpop.f32.mrf.mxu3 }
 0x28a   :  { %v7978_v26 = vor.u32 %v8943_v22, %v7977_v21  ;;  %v7894_v21 = vor.u32 %v8922_v3, %v7893_v63  ;;  %v8257_v11 = vld [vmem:[#allocation11 + $0x2e0] sm:$0xf] }
 0x28b   :  { %4234 = vmatpush.bf16.msrb.mxu3 %v7798_v6  ;;  %5425 = vmatpush.bf16.msra.mxu2 %v8446_v7  ;;  %v4021_v1 = vpop.f32.mrf.mxu2  ;;  %v8753_v6 = vld [vmem:[#allocation11 + $0x6c8] sm:$0xf]  ;;  %v9138_v7 = vld [vmem:[#allocation11 + $0x6e0] sm:$0xf0] }
 0x28c   :  { %5456 = vmatmul.bf16.vlgmr.msrb.gmra.mxu0 %v9920_v44  ;;  %5464 = vmatpush.bf16.msrb.mxu1 %v8226_v13  ;;  %v8313_v13 = vld [vmem:[#allocation11 + $0x350] sm:$0xf] }
 0x28d   :  { %5500 = vmatpush.bf16.msra.mxu0 %v8090_v55  ;;  %v8389_v55 = vld [vmem:[#allocation11 + $0x3f0] sm:$0xf] }
 0x28e   :  { %v8390_v39 = vor.u32 %v9047_v29, %v8389_v55  ;;  %v8314_v55 = vor.u32 %v9027_v16, %v8313_v13  ;;  %v8094_v29 = vor.u32 %v8968_v17, %v8091_v33  ;;  %v8201_v16 = vld [vmem:[#allocation11 + $0x270] sm:$0xf]  ;;  %v8999_v17 = vld [vmem:[#allocation11 + $0x288] sm:$0xf0]  ;;  %v8940_v33 = vld [vmem:[#allocation11 + $0xb4] sm:$0xf] }
 0x28f   :  { %4235 = vmatpush.bf16.msrb.mxu3 %v7770_v8  ;;  %5426 = vmatpush.bf16.msra.mxu2 %v8418_v23  ;;  %v1216_v8 = vmax.f32 %v9862_v54, 0.0  ;;  %v8754_v23 = vor.u32 %v9138_v7, %v8753_v6  ;;  %v8641_v7 = vld [vmem:[#allocation11 + $0x5e8] sm:$0xf] }
 0x290   :  { %5465 = vmatpush.bf16.msrb.mxu1 %v8198_v28  ;;  %v8725_v28 = vld [vmem:[#allocation11 + $0x690] sm:$0xf] }
 0x291   :  { %5501 = vmatpush.bf16.msra.mxu0 %v8062_v41  ;;  %v4099_v46 = vpop.f32.mrf.mxu0  ;;  %v8170_v41 = vor.u32 %v8988_v30, %v8167_v31  ;;  %v3980_v22 = vpop.f32.mrf.mxu3  ;;  %v9072_v30 = vld [vmem:[#allocation11 + $0x4d4] sm:$0xf]  ;;  %v8285_v31 = vld [vmem:[#allocation11 + $0x318] sm:$0xf]  ;;  %v9959_v54 = vpack.c.bf16 %v1216_v8, %v1216_v8  ;;  %v9103_v8 = vld [vmem:[#allocation11 + $0x5c8] sm:$0xf0] }
 0x292   :  { %v9957_v20 = vadd.f32 %v3980_v22, %v9936_v32  ;;  %v8506_v46 = vor.u32 %v9072_v30, %v8503_v61  ;;  %v8286_v12 = vor.u32 %v9020_v25, %v8285_v31  ;;  %v8613_v22 = vld [vmem:[#allocation11 + $0x5b0] sm:$0xf]  ;;  %v8992_v31 = vld [vmem:[#allocation11 + $0x250] sm:$0xf0]  ;;  %v8933_v25 = vld [vmem:[#allocation11 + $0x7c] sm:$0xf] }
 0x293   :  { %4236 = vmatpush.bf16.msrb.mxu3 %v7742_v38  ;;  %5427 = vmatpush.bf16.msra.mxu2 %v8390_v39  ;;  %v8697_v38 = vld [vmem:[#allocation11 + $0x658] sm:$0xf]  ;;  %v9124_v39 = vld [vmem:[#allocation11 + $0x670] sm:$0xf0] }
 0x294   :  { %5466 = vmatpush.bf16.msrb.mxu1 %v8170_v41  ;;  %v9065_v41 = vld [vmem:[#allocation11 + $0x49c] sm:$0xf]  ;;  %v8698_v49 = vor.u32 %v9124_v39, %v8697_v38  ;;  %v8614_v38 = vor.u32 %v9103_v8, %v8613_v22  ;;  %v9128_v8 = vld [vmem:[#allocation11 + $0x694] sm:$0xf] }
 0x295   :  { %5502 = vmatpush.bf16.msra.mxu0 %v8034_v56  ;;  %v8333_v56 = vld [vmem:[#allocation11 + $0x380] sm:$0xf] }
 0x296   :  { %v8334_v15 = vor.u32 %v9033_v58, %v8333_v56  ;;  %v8447_v56 = vld [vmem:[#allocation11 + $0x47c] sm:$0xf0]  ;;  %v8229_v58 = vld [vmem:[#allocation11 + $0x2a8] sm:$0xf] }
 0x297   :  { %4237 = vmatpush.bf16.msrb.mxu3 %v7714_v51  ;;  %5428 = vmatpush.bf16.msra.mxu2 %v8362_v52  ;;  %v9117_v51 = vld [vmem:[#allocation11 + $0x638] sm:$0xf0]  ;;  %v8258_v52 = vor.u32 %v9013_v43, %v8257_v11  ;;  %v8363_v11 = vld [vmem:[#allocation11 + $0x3d4] sm:$0xf0]  ;;  %v8145_v43 = vld [vmem:[#allocation11 + $0x200] sm:$0xf] }
 0x298   :  { %5467 = vmatpush.bf16.msrb.mxu1 %v8142_v59  ;;  %v9006_v59 = vld [vmem:[#allocation11 + $0x2c0] sm:$0xf0] }
 0x299   :  { %5503 = vmatpush.bf16.msra.mxu0 %v8006_v14  ;;  %v7686_v14 = vor.u32 %v9444_v53, %v7685_v50  ;;  %v3982_v48 = vpop.f32.mrf.mxu3  ;;  %v8669_v50 = vld [vmem:[#allocation11 + $0x620] sm:$0xf]  ;;  %v9058_v53 = vld [vmem:[#allocation11 + $0x464] sm:$0xf]  ;;  %v8230_v10 = vor.u32 %v9006_v59, %v8229_v58  ;;  %v8117_v58 = vld [vmem:[#allocation11 + $0x1c8] sm:$0xf] }
 0x29a   :  { %v8670_v3 = vor.u32 %v9117_v51, %v8669_v50  ;;  %v8450_v6 = vor.u32 %v9058_v53, %v8447_v56  ;;  %v7923_v48 = vld [vmem:[#allocation11 + $0x5c] sm:$0xf0]  ;;  %v9089_v50 = vld [vmem:[#allocation11 + $0x558] sm:$0xf0]  ;;  %v9030_v51 = vld [vmem:[#allocation11 + $0x384] sm:$0xf] }
 0x29b   :  { %4238 = vmatpush.bf16.msrb.mxu3 %v7686_v14  ;;  %5429 = vmatpush.bf16.msra.mxu2 %v8334_v15  ;;  %v9051_v14 = vld [vmem:[#allocation11 + $0x42c] sm:$0xf]  ;;  %v8419_v15 = vld [vmem:[#allocation11 + $0x444] sm:$0xf0]  ;;  %v8978_v59 = vld [vmem:[#allocation11 + $0x1e0] sm:$0xf0] }
 0x29c   :  { %5468 = vmatpush.bf16.msrb.mxu1 %v8114_v19  ;;  %v7979_v19 = vld [vmem:[#allocation11 + $0xcc] sm:$0xf0] }
 0x29d   :  { %5504 = vmatpush.bf16.msra.mxu0 %v7978_v26  ;;  %v9131_v26 = vld [vmem:[#allocation11 + $0x6a8] sm:$0xf0] }
 0x29e   :  { %v8726_v32 = vor.u32 %v9131_v26, %v8725_v28  ;;  %4239 = vmatmul.bf16.vlgmr.msrb.gmra.mxu3 %v9892_v2  ;;  %5430 = vmatmul.bf16.vlgmr.msra.gmra.mxu2 %v9959_v54  ;;  %v8038_v2 = vor.u32 %v8954_v45, %v8035_v47  ;;  %v4110_v62 = vpop.f32.mrf.mxu1  ;;  %v9044_v26 = vld [vmem:[#allocation11 + $0x3f4] sm:$0xf]  ;;  %v8985_v45 = vld [vmem:[#allocation11 + $0x218] sm:$0xf0]  ;;  %v8926_v47 = vld [vmem:[#allocation11 + $0x44] sm:$0xf] }
 0x29f   :  { %5435 = vmatpush.bf16.msra.mxu3 %v8754_v23  ;;  %5474 = vmatpush.bf16.msrb.mxu2 %v8534_v24  ;;  %v9966_v63 = vadd.f32 %v4110_v62, %v9944_v4  ;;  %v8642_v4 = vor.u32 %v9110_v0, %v8641_v7  ;;  %v8202_v23 = vor.u32 %v8999_v17, %v8201_v16  ;;  %v7895_v62 = vld [vmem:[#allocation11 + $0x24] sm:$0xf0]  ;;  %v8537_v7 = vld [vmem:[#allocation11 + $0x510] sm:$0xf]  ;;  %v9083_v0 = vld [vmem:[#allocation11 + $0x528] sm:$0xf0] }
 0x2a0   :  { %5513 = vmatpush.bf16.msra.mxu1 %v8314_v55  ;;  %v7982_v24 = vor.u32 %v8940_v33, %v7979_v19  ;;  %v8391_v55 = vld [vmem:[#allocation11 + $0x40c] sm:$0xf0]  ;;  %v7926_v53 = vor.u32 %v8926_v47, %v7923_v48  ;;  %v8097_v16 = vld [vmem:[#allocation11 + $0x198] sm:$0xf]  ;;  %v8972_v17 = vld [vmem:[#allocation11 + $0x1b0] sm:$0xf0]  ;;  %v8118_v33 = vor.u32 %v8978_v59, %v8117_v58  ;;  %v8538_v22 = vor.u32 %v9083_v0, %v8537_v7 }
 0x2a1   :  { %5505 = vmatpush.bf16.msra.mxu0 %v7950_v42  ;;  %v8475_v42 = vld [vmem:[#allocation11 + $0x4b4] sm:$0xf0]  ;;  %5469 = vmatmul.bf16.vlgmr.msrb.gmra.mxu1 %v9938_v40  ;;  %v4071_v28 = vpop.f32.mrf.mxu2  ;;  %v4032_v61 = vpop.f32.mrf.mxu3  ;;  %v8394_v39 = vor.u32 %v9044_v26, %v8391_v55  ;;  %v9076_v55 = vld [vmem:[#allocation11 + $0x4f0] sm:$0xf0]  ;;  %v9114_v48 = vld [vmem:[#allocation11 + $0x624] sm:$0xf] }
 0x2a2   :  { %v8478_v9 = vor.u32 %v9065_v41, %v8475_v42  ;;  %v9971_v30 = vadd.f32 %v4071_v28, %v9947_v5  ;;  %v9974_v36 = vadd.f32 %v4032_v61, %v9953_v35  ;;  %v7954_v5 = vor.u32 %v8933_v25, %v7951_v34  ;;  %v9037_v42 = vld [vmem:[#allocation11 + $0x3bc] sm:$0xf]  ;;  %v8557_v35 = vld [vmem:[#allocation11 + $0x540] sm:$0xf]  ;;  %v8509_v26 = vld [vmem:[#allocation11 + $0x4d8] sm:$0xf] }
 0x2a3   :  { %5436 = vmatpush.bf16.msra.mxu3 %v8726_v32  ;;  %5475 = vmatpush.bf16.msrb.mxu2 %v8506_v46  ;;  %v8098_v28 = vor.u32 %v8972_v17, %v8097_v16  ;;  %v8287_v61 = vld [vmem:[#allocation11 + $0x334] sm:$0xf0]  ;;  %v8965_v25 = vld [vmem:[#allocation11 + $0x178] sm:$0xf0]  ;;  %v8944_v17 = vld [vmem:[#allocation11 + $0xd0] sm:$0xf0] }
 0x2a4   :  { %5514 = vmatpush.bf16.msra.mxu1 %v8286_v12  ;;  %v8585_v12 = vld [vmem:[#allocation11 + $0x578] sm:$0xf] }
 0x2a5   :  { %5506 = vmatpush.bf16.msra.mxu0 %v7922_v27  ;;  %v8947_v27 = vld [vmem:[#allocation11 + $0xec] sm:$0xf]  ;;  %v7985_v16 = vld [vmem:[#allocation11 + $0xb8] sm:$0xf] }
 0x2a6   :  { %v8010_v13 = vor.u32 %v8947_v27, %v8007_v60  ;;  %v4112_v32 = vpop.f32.mrf.mxu1  ;;  %v8919_v27 = vld [vmem:[#allocation11 + $0xc] sm:$0xf] }
 0x2a7   :  { %5437 = vmatpush.bf16.msra.mxu3 %v8698_v49  ;;  %5476 = vmatpush.bf16.msrb.mxu2 %v8478_v9  ;;  %v8366_v9 = vor.u32 %v9037_v42, %v8363_v11  ;;  %v7898_v19 = vor.u32 %v8919_v27, %v7895_v62  ;;  %v8510_v32 = vor.u32 %v9076_v55, %v8509_v26  ;;  %v8259_v42 = vld [vmem:[#allocation11 + $0x2fc] sm:$0xf0]  ;;  %v8041_v11 = vld [vmem:[#allocation11 + $0x128] sm:$0xf]  ;;  %v9107_v62 = vld [vmem:[#allocation11 + $0x5ec] sm:$0xf] }
 0x2a8   :  { %5515 = vmatpush.bf16.msra.mxu1 %v8258_v52  ;;  %v8335_v52 = vld [vmem:[#allocation11 + $0x39c] sm:$0xf0]  ;;  %v8989_v26 = vld [vmem:[#allocation11 + $0x23c] sm:$0xf] }
 0x2a9   :  { %5507 = vmatpush.bf16.msra.mxu0 %v7894_v21  ;;  %v9968_v1 = vpop.f32.mrf.mxu0  ;;  %v8422_v21 = vor.u32 %v9051_v14, %v8419_v15  ;;  %v4073_v56 = vpop.f32.mrf.mxu2  ;;  %v8338_v14 = vor.u32 %v9030_v51, %v8335_v52  ;;  %v8315_v15 = vld [vmem:[#allocation11 + $0x36c] sm:$0xf0]  ;;  %v9062_v51 = vld [vmem:[#allocation11 + $0x480] sm:$0xf0]  ;;  %v9003_v52 = vld [vmem:[#allocation11 + $0x2ac] sm:$0xf] }
 0x2aa   :  { %v4034_v60 = vpop.f32.mrf.mxu3  ;;  %v8951_v56 = vld [vmem:[#allocation11 + $0x108] sm:$0xf0] }
 0x2ab   :  { %5438 = vmatpush.bf16.msra.mxu3 %v8670_v3  ;;  %5477 = vmatpush.bf16.msrb.mxu2 %v8450_v6  ;;  %v9135_v3 = vld [vmem:[#allocation11 + $0x6cc] sm:$0xf]  ;;  %v8755_v6 = vld [vmem:[#allocation11 + $0x6e4] sm:$0xf0] }
 0x2ac   :  { %5508 = vmatmul.bf16.vlgmr.msra.gmra.mxu0 %v9920_v44  ;;  %5516 = vmatpush.bf16.msra.mxu1 %v8230_v10  ;;  %v9024_v10 = vld [vmem:[#allocation11 + $0x354] sm:$0xf] }
 0x2ad   :  { %5552 = vmatpush.bf16.msrb.mxu0 %v8094_v29  ;;  %v8173_v29 = vld [vmem:[#allocation11 + $0x238] sm:$0xf] }
 0x2ae   :  { %v8174_v41 = vor.u32 %v8992_v31, %v8173_v29  ;;  %v9017_v29 = vld [vmem:[#allocation11 + $0x31c] sm:$0xf]  ;;  %v8069_v31 = vld [vmem:[#allocation11 + $0x160] sm:$0xf] }
 0x2af   :  { %5439 = vmatpush.bf16.msra.mxu3 %v8642_v4  ;;  %5478 = vmatpush.bf16.msrb.mxu2 %v8422_v21  ;;  %v1217_v4 = vmax.f32 %v9869_v57, 0.0  ;;  %v8758_v21 = vor.u32 %v9135_v3, %v8755_v6  ;;  %v8643_v3 = vld [vmem:[#allocation11 + $0x604] sm:$0xf0] }
 0x2b0   :  { %5517 = vmatpush.bf16.msra.mxu1 %v8202_v23  ;;  %v8727_v23 = vld [vmem:[#allocation11 + $0x6ac] sm:$0xf0] }
 0x2b1   :  { %5553 = vmatpush.bf16.msrb.mxu0 %v8066_v37  ;;  %v4151_v46 = vpop.f32.mrf.mxu0  ;;  %v9096_v37 = vld [vmem:[#allocation11 + $0x590] sm:$0xf0]  ;;  %v9977_v34 = vpack.c.bf16 %v1217_v4, %v1217_v4  ;;  %v8730_v57 = vor.u32 %v9128_v8, %v8727_v23  ;;  %v7986_v8 = vor.u32 %v8944_v17, %v7985_v16  ;;  %v8099_v16 = vld [vmem:[#allocation11 + $0x1b4] sm:$0xf0] }
 0x2b2   :  { %v8586_v49 = vor.u32 %v9096_v37, %v8585_v12  ;;  %v9121_v46 = vld [vmem:[#allocation11 + $0x65c] sm:$0xf]  ;;  %v8070_v12 = vor.u32 %v8965_v25, %v8069_v31  ;;  %v8481_v37 = vld [vmem:[#allocation11 + $0x4a0] sm:$0xf]  ;;  %v9100_v4 = vld [vmem:[#allocation11 + $0x5b4] sm:$0xf] }
 0x2b3   :  { %5440 = vmatpush.bf16.msra.mxu3 %v8614_v38  ;;  %5479 = vmatpush.bf16.msrb.mxu2 %v8394_v39  ;;  %v8699_v38 = vld [vmem:[#allocation11 + $0x674] sm:$0xf0]  ;;  %v8290_v39 = vor.u32 %v9017_v29, %v8287_v61  ;;  %v7957_v31 = vld [vmem:[#allocation11 + $0x80] sm:$0xf]  ;;  %v8937_v25 = vld [vmem:[#allocation11 + $0x98] sm:$0xf0] }
 0x2b4   :  { %5518 = vmatpush.bf16.msra.mxu1 %v8174_v41  ;;  %v9069_v41 = vld [vmem:[#allocation11 + $0x4b8] sm:$0xf0]  ;;  %v8175_v61 = vld [vmem:[#allocation11 + $0x254] sm:$0xf0] }
 0x2b5   :  { %5554 = vmatpush.bf16.msrb.mxu0 %v8038_v2  ;;  %v8146_v2 = vor.u32 %v8985_v45, %v8145_v43  ;;  %v8958_v43 = vld [vmem:[#allocation11 + $0x140] sm:$0xf0]  ;;  %v8702_v45 = vor.u32 %v9121_v46, %v8699_v38  ;;  %v8482_v47 = vor.u32 %v9069_v41, %v8481_v37  ;;  %v8178_v37 = vor.u32 %v8989_v26, %v8175_v61  ;;  %v9021_v26 = vld [vmem:[#allocation11 + $0x338] sm:$0xf0] }
 0x2b6   :  { %v7958_v41 = vor.u32 %v8937_v25, %v7957_v31  ;;  %v8962_v61 = vld [vmem:[#allocation11 + $0x164] sm:$0xf]  ;;  %v8071_v31 = vld [vmem:[#allocation11 + $0x17c] sm:$0xf0] }
 0x2b7   :  { %5441 = vmatpush.bf16.msra.mxu3 %v8586_v49  ;;  %5480 = vmatpush.bf16.msrb.mxu2 %v8366_v9  ;;  %v8042_v9 = vor.u32 %v8958_v43, %v8041_v11  ;;  %v7929_v11 = vld [vmem:[#allocation11 + $0x48] sm:$0xf]  ;;  %v8930_v43 = vld [vmem:[#allocation11 + $0x60] sm:$0xf0] }
 0x2b8   :  { %5519 = vmatpush.bf16.msra.mxu1 %v8146_v2  ;;  %v8231_v2 = vld [vmem:[#allocation11 + $0x2c4] sm:$0xf0] }
 0x2b9   :  { %5555 = vmatpush.bf16.msrb.mxu0 %v8010_v13  ;;  %v8558_v13 = vor.u32 %v9089_v50, %v8557_v35  ;;  %v8671_v35 = vld [vmem:[#allocation11 + $0x63c] sm:$0xf0]  ;;  %v8453_v50 = vld [vmem:[#allocation11 + $0x468] sm:$0xf]  ;;  %v8234_v7 = vor.u32 %v9003_v52, %v8231_v2 }
 0x2ba   :  { %v8674_v27 = vor.u32 %v9114_v48, %v8671_v35  ;;  %v8454_v60 = vor.u32 %v9062_v51, %v8453_v50  ;;  %v8559_v35 = vld [vmem:[#allocation11 + $0x55c] sm:$0xf0]  ;;  %v7930_v51 = vor.u32 %v8930_v43, %v7929_v11  ;;  %v8677_v43 = vld [vmem:[#allocation11 + $0x628] sm:$0xf] }
 0x2bb   :  { %5442 = vmatpush.bf16.msra.mxu3 %v8558_v13  ;;  %5481 = vmatpush.bf16.msrb.mxu2 %v8338_v14  ;;  %v9055_v13 = vld [vmem:[#allocation11 + $0x448] sm:$0xf0]  ;;  %v8996_v14 = vld [vmem:[#allocation11 + $0x274] sm:$0xf] }
 0x2bc   :  { %5520 = vmatpush.bf16.msra.mxu1 %v8118_v33  ;;  %v8646_v33 = vor.u32 %v9107_v62, %v8643_v3  ;;  %v9139_v62 = vld [vmem:[#allocation11 + $0x6e8] sm:$0xf0]  ;;  %v9080_v3 = vld [vmem:[#allocation11 + $0x514] sm:$0xf] }
 0x2bd   :  { %5556 = vmatpush.bf16.msrb.mxu0 %v7982_v24  ;;  %v8318_v24 = vor.u32 %v9024_v10, %v8315_v15  ;;  %v8425_v10 = vld [vmem:[#allocation11 + $0x430] sm:$0xf] }
 0x2be   :  { %5443 = vmatmul.bf16.vlgmr.msra.gmra.mxu3 %v9977_v34  ;;  %5482 = vmatmul.bf16.vlgmr.msrb.gmra.mxu2 %v9959_v54  ;;  %v4162_v58 = vpop.f32.mrf.mxu1  ;;  %v8203_v15 = vld [vmem:[#allocation11 + $0x28c] sm:$0xf0] }
 0x2bf   :  { %5487 = vmatpush.bf16.msrb.mxu3 %v8758_v21  ;;  %5526 = vmatpush.bf16.msra.mxu2 %v8538_v22  ;;  %v9986_v6 = vadd.f32 %v4162_v58, %v9968_v1  ;;  %v8615_v21 = vld [vmem:[#allocation11 + $0x5cc] sm:$0xf0]  ;;  %v8206_v22 = vor.u32 %v8996_v14, %v8203_v15  ;;  %v9028_v14 = vld [vmem:[#allocation11 + $0x370] sm:$0xf0]  ;;  %v8969_v15 = vld [vmem:[#allocation11 + $0x19c] sm:$0xf] }
 0x2c0   :  { %5565 = vmatpush.bf16.msrb.mxu1 %v8318_v24  ;;  %v8397_v24 = vld [vmem:[#allocation11 + $0x3f8] sm:$0xf]  ;;  %v8618_v46 = vor.u32 %v9100_v4, %v8615_v21  ;;  %v7901_v58 = vld [vmem:[#allocation11 + $0x10] sm:$0xf] }
 0x2c1   :  { %5557 = vmatpush.bf16.msrb.mxu0 %v7954_v5  ;;  %v9010_v5 = vld [vmem:[#allocation11 + $0x2e4] sm:$0xf]  ;;  %5521 = vmatmul.bf16.vlgmr.msra.gmra.mxu1 %v9938_v40  ;;  %v4084_v1 = vpop.f32.mrf.mxu3  ;;  %v4123_v23 = vpop.f32.mrf.mxu2  ;;  %v8733_v21 = vld [vmem:[#allocation11 + $0x698] sm:$0xf] }
 0x2c2   :  { %v8262_v49 = vor.u32 %v9010_v5, %v8259_v42  ;;  %v9989_v55 = vadd.f32 %v4084_v1, %v9971_v30  ;;  %v9992_v29 = vadd.f32 %v4123_v23, %v9966_v63  ;;  %v8369_v30 = vld [vmem:[#allocation11 + $0x3c0] sm:$0xf]  ;;  %v9041_v5 = vld [vmem:[#allocation11 + $0x3d8] sm:$0xf0]  ;;  %v8982_v42 = vld [vmem:[#allocation11 + $0x204] sm:$0xf]  ;;  %v8102_v1 = vor.u32 %v8969_v15, %v8099_v16 }
 0x2c3   :  { %5488 = vmatpush.bf16.msrb.mxu3 %v8730_v57  ;;  %5527 = vmatpush.bf16.msra.mxu2 %v8510_v32  ;;  %v8147_v63 = vld [vmem:[#allocation11 + $0x21c] sm:$0xf0]  ;;  %v8370_v48 = vor.u32 %v9041_v5, %v8369_v30  ;;  %v9073_v23 = vld [vmem:[#allocation11 + $0x4dc] sm:$0xf]  ;;  %v9014_v30 = vld [vmem:[#allocation11 + $0x300] sm:$0xf0] }
 0x2c4   :  { %5566 = vmatpush.bf16.msrb.mxu1 %v8290_v39  ;;  %v9093_v39 = vld [vmem:[#allocation11 + $0x57c] sm:$0xf]  ;;  %v8150_v50 = vor.u32 %v8982_v42, %v8147_v63  ;;  %v8955_v5 = vld [vmem:[#allocation11 + $0x12c] sm:$0xf]  ;;  %v8043_v42 = vld [vmem:[#allocation11 + $0x144] sm:$0xf0] }
 0x2c5   :  { %5558 = vmatpush.bf16.msrb.mxu0 %v7926_v53  ;;  %v8013_v53 = vld [vmem:[#allocation11 + $0xf0] sm:$0xf]  ;;  %v9000_v15 = vld [vmem:[#allocation11 + $0x290] sm:$0xf0]  ;;  %v8941_v16 = vld [vmem:[#allocation11 + $0xbc] sm:$0xf] }
 0x2c6   :  { %v8014_v0 = vor.u32 %v8951_v56, %v8013_v53  ;;  %v4164_v57 = vpop.f32.mrf.mxu1  ;;  %v8975_v53 = vld [vmem:[#allocation11 + $0x1cc] sm:$0xf]  ;;  %v8119_v56 = vld [vmem:[#allocation11 + $0x1e4] sm:$0xf0] }
 0x2c7   :  { %5489 = vmatpush.bf16.msrb.mxu3 %v8702_v45  ;;  %5528 = vmatpush.bf16.msra.mxu2 %v8482_v47  ;;  %v9086_v45 = vld [vmem:[#allocation11 + $0x544] sm:$0xf]  ;;  %v8122_v17 = vor.u32 %v8975_v53, %v8119_v56 }
 0x2c8   :  { %5567 = vmatpush.bf16.msrb.mxu1 %v8262_v49  ;;  %v8341_v49 = vld [vmem:[#allocation11 + $0x388] sm:$0xf] }
 0x2c9   :  { %5559 = vmatpush.bf16.msrb.mxu0 %v7898_v19  ;;  %v9983_v59 = vpop.f32.mrf.mxu0  ;;  %v8426_v19 = vor.u32 %v9055_v13, %v8425_v10  ;;  %v4086_v52 = vpop.f32.mrf.mxu3  ;;  %v8562_v10 = vor.u32 %v9086_v45, %v8559_v35  ;;  %v9118_v45 = vld [vmem:[#allocation11 + $0x640] sm:$0xf0]  ;;  %v8046_v35 = vor.u32 %v8955_v5, %v8043_v42  ;;  %v8153_v5 = vld [vmem:[#allocation11 + $0x208] sm:$0xf]  ;;  %v8927_v42 = vld [vmem:[#allocation11 + $0x4c] sm:$0xf] }
 0x2ca   :  { %v4125_v2 = vpop.f32.mrf.mxu2  ;;  %v8015_v52 = vld [vmem:[#allocation11 + $0x10c] sm:$0xf0]  ;;  %v8678_v56 = vor.u32 %v9118_v45, %v8677_v43 }
 0x2cb   :  { %5490 = vmatpush.bf16.msrb.mxu3 %v8674_v27  ;;  %5529 = vmatpush.bf16.msra.mxu2 %v8454_v60  ;;  %v8923_v27 = vld [vmem:[#allocation11 + $0x28] sm:$0xf0]  ;;  %v8761_v60 = vld [vmem:[#allocation11 + $0x6d0] sm:$0xf] }
 0x2cc   :  { %5560 = vmatmul.bf16.vlgmr.msrb.gmra.mxu0 %v9920_v44  ;;  %5568 = vmatpush.bf16.msrb.mxu1 %v8234_v7  ;;  %v8539_v7 = vld [vmem:[#allocation11 + $0x52c] sm:$0xf0] }
 0x2cd   :  { %5604 = vmatpush.bf16.msra.mxu0 %v8098_v28  ;;  %v9048_v28 = vld [vmem:[#allocation11 + $0x410] sm:$0xf0]  ;;  %v8542_v4 = vor.u32 %v9080_v3, %v8539_v7 }
 0x2ce   :  { %v8398_v38 = vor.u32 %v9048_v28, %v8397_v24  ;;  %v8511_v24 = vld [vmem:[#allocation11 + $0x4f4] sm:$0xf0]  ;;  %v8293_v28 = vld [vmem:[#allocation11 + $0x320] sm:$0xf] }
 0x2cf   :  { %5491 = vmatpush.bf16.msrb.mxu3 %v8646_v33  ;;  %5530 = vmatpush.bf16.msra.mxu2 %v8426_v19  ;;  %v7902_v33 = vor.u32 %v8923_v27, %v7901_v58  ;;  %v8762_v19 = vor.u32 %v9139_v62, %v8761_v60  ;;  %v8514_v57 = vor.u32 %v9073_v23, %v8511_v24  ;;  %v8649_v60 = vld [vmem:[#allocation11 + $0x5f0] sm:$0xf]  ;;  %v9111_v62 = vld [vmem:[#allocation11 + $0x608] sm:$0xf0]  ;;  %v8399_v23 = vld [vmem:[#allocation11 + $0x414] sm:$0xf0] }
 0x2d0   :  { %5569 = vmatpush.bf16.msrb.mxu1 %v8206_v22  ;;  %v9132_v22 = vld [vmem:[#allocation11 + $0x6b0] sm:$0xf0]  ;;  %v8181_v24 = vld [vmem:[#allocation11 + $0x240] sm:$0xf] }
 0x2d1   :  { %5605 = vmatpush.bf16.msra.mxu0 %v8070_v12  ;;  %v4203_v32 = vpop.f32.mrf.mxu0  ;;  %v8587_v12 = vld [vmem:[#allocation11 + $0x594] sm:$0xf0]  ;;  %v8734_v25 = vor.u32 %v9132_v22, %v8733_v21  ;;  %v9104_v21 = vld [vmem:[#allocation11 + $0x5d0] sm:$0xf0] }
 0x2d2   :  { %v8590_v47 = vor.u32 %v9093_v39, %v8587_v12  ;;  %v8705_v32 = vld [vmem:[#allocation11 + $0x660] sm:$0xf]  ;;  %v8074_v39 = vor.u32 %v8962_v61, %v8071_v31  ;;  %v9066_v12 = vld [vmem:[#allocation11 + $0x4a4] sm:$0xf]  ;;  %v8993_v61 = vld [vmem:[#allocation11 + $0x258] sm:$0xf0] }
 0x2d3   :  { %5492 = vmatpush.bf16.msrb.mxu3 %v8618_v46  ;;  %5531 = vmatpush.bf16.msra.mxu2 %v8398_v38  ;;  %v9125_v46 = vld [vmem:[#allocation11 + $0x678] sm:$0xf0]  ;;  %v8294_v38 = vor.u32 %v9021_v26, %v8293_v28  ;;  %v8934_v31 = vld [vmem:[#allocation11 + $0x84] sm:$0xf] }
 0x2d4   :  { %5570 = vmatpush.bf16.msrb.mxu1 %v8178_v37  ;;  %v8483_v37 = vld [vmem:[#allocation11 + $0x4bc] sm:$0xf0]  ;;  %v8706_v63 = vor.u32 %v9125_v46, %v8705_v32 }
 0x2d5   :  { %5606 = vmatpush.bf16.msra.mxu0 %v8042_v9  ;;  %v9034_v9 = vld [vmem:[#allocation11 + $0x3a0] sm:$0xf0]  ;;  %v8486_v11 = vor.u32 %v9066_v12, %v8483_v37  ;;  %v9097_v12 = vld [vmem:[#allocation11 + $0x598] sm:$0xf0]  ;;  %v8182_v37 = vor.u32 %v8993_v61, %v8181_v24  ;;  %v8295_v24 = vld [vmem:[#allocation11 + $0x33c] sm:$0xf0] }
 0x2d6   :  { %v8342_v13 = vor.u32 %v9034_v9, %v8341_v49  ;;  %v8455_v49 = vld [vmem:[#allocation11 + $0x484] sm:$0xf0]  ;;  %v8237_v9 = vld [vmem:[#allocation11 + $0x2b0] sm:$0xf] }
 0x2d7   :  { %5493 = vmatpush.bf16.msrb.mxu3 %v8590_v47  ;;  %5532 = vmatpush.bf16.msra.mxu2 %v8370_v48  ;;  %v9059_v47 = vld [vmem:[#allocation11 + $0x46c] sm:$0xf]  ;;  %v8077_v61 = vld [vmem:[#allocation11 + $0x168] sm:$0xf] }
 0x2d8   :  { %5571 = vmatpush.bf16.msrb.mxu1 %v8150_v50  ;;  %v9007_v50 = vld [vmem:[#allocation11 + $0x2c8] sm:$0xf0]  ;;  %v8458_v58 = vor.u32 %v9059_v47, %v8455_v49  ;;  %v9090_v47 = vld [vmem:[#allocation11 + $0x560] sm:$0xf0] }
 0x2d9   :  { %5607 = vmatpush.bf16.msra.mxu0 %v8014_v0  ;;  %v8321_v0 = vld [vmem:[#allocation11 + $0x358] sm:$0xf]  ;;  %v8238_v27 = vor.u32 %v9007_v50, %v8237_v9 }
 0x2db   :  { %5494 = vmatpush.bf16.msrb.mxu3 %v8562_v10  ;;  %5533 = vmatpush.bf16.msra.mxu2 %v8342_v13  ;;  %v9052_v10 = vld [vmem:[#allocation11 + $0x434] sm:$0xf]  ;;  %v8427_v13 = vld [vmem:[#allocation11 + $0x44c] sm:$0xf0] }
 0x2dc   :  { %5572 = vmatpush.bf16.msrb.mxu1 %v8122_v17  ;;  %v7987_v17 = vld [vmem:[#allocation11 + $0xd4] sm:$0xf0] }
 0x2dd   :  { %5608 = vmatpush.bf16.msra.mxu0 %v7986_v8  ;;  %v8322_v8 = vor.u32 %v9028_v14, %v8321_v0  ;;  %v8209_v14 = vld [vmem:[#allocation11 + $0x278] sm:$0xf]  ;;  %v7990_v22 = vor.u32 %v8941_v16, %v7987_v17  ;;  %v8973_v16 = vld [vmem:[#allocation11 + $0x1b8] sm:$0xf0] }
 0x2de   :  { %5495 = vmatmul.bf16.vlgmr.msrb.gmra.mxu3 %v9977_v34  ;;  %5534 = vmatmul.bf16.vlgmr.msra.gmra.mxu2 %v9959_v54  ;;  %v4214_v2 = vpop.f32.mrf.mxu1 }
 0x2df   :  { %5539 = vmatpush.bf16.msra.mxu3 %v8762_v19  ;;  %5578 = vmatpush.bf16.msrb.mxu2 %v8542_v4  ;;  %v9999_v3 = vadd.f32 %v4214_v2, %v9983_v59  ;;  %v8430_v19 = vor.u32 %v9052_v10, %v8427_v13  ;;  %v8621_v4 = vld [vmem:[#allocation11 + $0x5b8] sm:$0xf]  ;;  %v8210_v59 = vor.u32 %v9000_v15, %v8209_v14  ;;  %v8979_v2 = vld [vmem:[#allocation11 + $0x1e8] sm:$0xf0]  ;;  %v8105_v15 = vld [vmem:[#allocation11 + $0x1a0] sm:$0xf] }
 0x2e0   :  { %5617 = vmatpush.bf16.msra.mxu1 %v8322_v8  ;;  %v8622_v46 = vor.u32 %v9104_v21, %v8621_v4  ;;  %v8323_v14 = vld [vmem:[#allocation11 + $0x374] sm:$0xf0]  ;;  %v9129_v21 = vld [vmem:[#allocation11 + $0x69c] sm:$0xf] }
 0x2e1   :  { %5609 = vmatpush.bf16.msra.mxu0 %v7958_v41  ;;  %v8265_v41 = vld [vmem:[#allocation11 + $0x2e8] sm:$0xf]  ;;  %5573 = vmatmul.bf16.vlgmr.msrb.gmra.mxu1 %v9938_v40  ;;  %v4136_v8 = vpop.f32.mrf.mxu3 }
 0x2e2   :  { %v8266_v48 = vor.u32 %v9014_v30, %v8265_v41  ;;  %v10005_v28 = vadd.f32 %v4136_v8, %v9992_v29  ;;  %v9038_v29 = vld [vmem:[#allocation11 + $0x3c4] sm:$0xf]  ;;  %v8371_v30 = vld [vmem:[#allocation11 + $0x3dc] sm:$0xf0]  ;;  %v8106_v8 = vor.u32 %v8973_v16, %v8105_v15  ;;  %v8945_v16 = vld [vmem:[#allocation11 + $0xd8] sm:$0xf0] }
 0x2e3   :  { %5540 = vmatpush.bf16.msra.mxu3 %v8734_v25  ;;  %5579 = vmatpush.bf16.msrb.mxu2 %v8514_v57  ;;  %v7959_v25 = vld [vmem:[#allocation11 + $0x9c] sm:$0xf0]  ;;  %v8374_v45 = vor.u32 %v9038_v29, %v8371_v30  ;;  %v8267_v29 = vld [vmem:[#allocation11 + $0x304] sm:$0xf0]  ;;  %v8049_v30 = vld [vmem:[#allocation11 + $0x130] sm:$0xf] }
 0x2e4   :  { %5618 = vmatpush.bf16.msra.mxu1 %v8294_v38  ;;  %v7962_v41 = vor.u32 %v8934_v31, %v7959_v25  ;;  %v8966_v31 = vld [vmem:[#allocation11 + $0x180] sm:$0xf0]  ;;  %v7993_v15 = vld [vmem:[#allocation11 + $0xc0] sm:$0xf] }
 0x2e5   :  { %5610 = vmatpush.bf16.msra.mxu0 %v7930_v51  ;;  %v8948_v51 = vld [vmem:[#allocation11 + $0xf4] sm:$0xf] }
 0x2e6   :  { %v8018_v0 = vor.u32 %v8948_v51, %v8015_v52  ;;  %v4216_v57 = vpop.f32.mrf.mxu1  ;;  %v8125_v52 = vld [vmem:[#allocation11 + $0x1d0] sm:$0xf] }
 0x2e7   :  { %5541 = vmatpush.bf16.msra.mxu3 %v8706_v63  ;;  %5580 = vmatpush.bf16.msrb.mxu2 %v8486_v11  ;;  %v7931_v63 = vld [vmem:[#allocation11 + $0x64] sm:$0xf0]  ;;  %v8126_v17 = vor.u32 %v8979_v2, %v8125_v52 }
 0x2e8   :  { %5619 = vmatpush.bf16.msra.mxu1 %v8266_v48  ;;  %v8565_v11 = vld [vmem:[#allocation11 + $0x548] sm:$0xf]  ;;  %v9031_v48 = vld [vmem:[#allocation11 + $0x38c] sm:$0xf]  ;;  %v7934_v9 = vor.u32 %v8927_v42, %v7931_v63 }
 0x2e9   :  { %5611 = vmatpush.bf16.msra.mxu0 %v7902_v33  ;;  %v5405_v53 = vpop.f32.mrf.mxu0  ;;  %v8650_v33 = vor.u32 %v9111_v62, %v8649_v60  ;;  %v4138_v50 = vpop.f32.mrf.mxu3  ;;  %v8545_v60 = vld [vmem:[#allocation11 + $0x518] sm:$0xf]  ;;  %v9084_v62 = vld [vmem:[#allocation11 + $0x530] sm:$0xf0]  ;;  %v8566_v10 = vor.u32 %v9090_v47, %v8565_v11  ;;  %v9115_v63 = vld [vmem:[#allocation11 + $0x62c] sm:$0xf] }
 0x2ea   :  { %v10002_v7 = vadd.f32 %v5405_v53, %v9950_v18  ;;  %v4175_v18 = vpop.f32.mrf.mxu2  ;;  %v8920_v53 = vld [vmem:[#allocation11 + $0x14] sm:$0xf]  ;;  %v8546_v4 = vor.u32 %v9084_v62, %v8545_v60  ;;  %v8679_v11 = vld [vmem:[#allocation11 + $0x644] sm:$0xf0]  ;;  %v8461_v47 = vld [vmem:[#allocation11 + $0x470] sm:$0xf] }
 0x2eb   :  { %5542 = vmatpush.bf16.msra.mxu3 %v8678_v56  ;;  %5581 = vmatpush.bf16.msrb.mxu2 %v8458_v58  ;;  %v10008_v26 = vadd.f32 %v4175_v18, %v9986_v6  ;;  %v8986_v6 = vld [vmem:[#allocation11 + $0x220] sm:$0xf0]  ;;  %v7903_v56 = vld [vmem:[#allocation11 + $0x2c] sm:$0xf0]  ;;  %v9136_v58 = vld [vmem:[#allocation11 + $0x6d4] sm:$0xf]  ;;  %v8682_v2 = vor.u32 %v9115_v63, %v8679_v11 }
 0x2ec   :  { %5612 = vmatmul.bf16.vlgmr.msra.gmra.mxu0 %v9920_v44  ;;  %5620 = vmatpush.bf16.msra.mxu1 %v8238_v27  ;;  %v8154_v49 = vor.u32 %v8986_v6, %v8153_v5  ;;  %v8763_v27 = vld [vmem:[#allocation11 + $0x6ec] sm:$0xf0]  ;;  %v8517_v18 = vld [vmem:[#allocation11 + $0x4e0] sm:$0xf]  ;;  %v8959_v5 = vld [vmem:[#allocation11 + $0x148] sm:$0xf0] }
 0x2ed   :  { %5656 = vmatpush.bf16.msrb.mxu0 %v8102_v1  ;;  %v9045_v1 = vld [vmem:[#allocation11 + $0x3fc] sm:$0xf]  ;;  %v8952_v50 = vld [vmem:[#allocation11 + $0x110] sm:$0xf0]  ;;  %v9087_v11 = vld [vmem:[#allocation11 + $0x54c] sm:$0xf] }
 0x2ee   :  { %v8402_v38 = vor.u32 %v9045_v1, %v8399_v23  ;;  %v9077_v1 = vld [vmem:[#allocation11 + $0x4f8] sm:$0xf0]  ;;  %v9018_v23 = vld [vmem:[#allocation11 + $0x324] sm:$0xf] }
 0x2ef   :  { %5543 = vmatpush.bf16.msra.mxu3 %v8650_v33  ;;  %5582 = vmatpush.bf16.msrb.mxu2 %v8430_v19  ;;  %v7906_v33 = vor.u32 %v8920_v53, %v7903_v56  ;;  %v8766_v19 = vor.u32 %v9136_v58, %v8763_v27  ;;  %v8518_v57 = vor.u32 %v9077_v1, %v8517_v18  ;;  %v9108_v56 = vld [vmem:[#allocation11 + $0x5f4] sm:$0xf]  ;;  %v8651_v58 = vld [vmem:[#allocation11 + $0x60c] sm:$0xf0]  ;;  %v9049_v18 = vld [vmem:[#allocation11 + $0x418] sm:$0xf0] }
 0x2f0   :  { %5621 = vmatpush.bf16.msra.mxu1 %v8210_v59  ;;  %v8735_v59 = vld [vmem:[#allocation11 + $0x6b4] sm:$0xf0]  ;;  %v8990_v1 = vld [vmem:[#allocation11 + $0x244] sm:$0xf] }
 0x2f1   :  { %5657 = vmatpush.bf16.msrb.mxu0 %v8074_v39  ;;  %v5407_v32 = vpop.f32.mrf.mxu0  ;;  %v8593_v39 = vld [vmem:[#allocation11 + $0x580] sm:$0xf]  ;;  %v8738_v25 = vor.u32 %v9129_v21, %v8735_v59  ;;  %v7994_v59 = vor.u32 %v8945_v16, %v7993_v15 }
 0x2f2   :  { %v8594_v43 = vor.u32 %v9097_v12, %v8593_v39  ;;  %v4177_v51 = vpop.f32.mrf.mxu2  ;;  %v9122_v32 = vld [vmem:[#allocation11 + $0x664] sm:$0xf]  ;;  %v8078_v39 = vor.u32 %v8966_v31, %v8077_v61  ;;  %v8489_v12 = vld [vmem:[#allocation11 + $0x4a8] sm:$0xf]  ;;  %v8183_v61 = vld [vmem:[#allocation11 + $0x25c] sm:$0xf0] }
 0x2f3   :  { %5544 = vmatpush.bf16.msra.mxu3 %v8622_v46  ;;  %5583 = vmatpush.bf16.msrb.mxu2 %v8402_v38  ;;  %v8707_v46 = vld [vmem:[#allocation11 + $0x67c] sm:$0xf0]  ;;  %v8298_v38 = vor.u32 %v9018_v23, %v8295_v24  ;;  %v7965_v31 = vld [vmem:[#allocation11 + $0x88] sm:$0xf] }
 0x2f4   :  { %5622 = vmatpush.bf16.msra.mxu1 %v8182_v37  ;;  %v9070_v37 = vld [vmem:[#allocation11 + $0x4c0] sm:$0xf0]  ;;  %v8710_v6 = vor.u32 %v9122_v32, %v8707_v46 }
 0x2f5   :  { %5658 = vmatpush.bf16.msrb.mxu0 %v8046_v35  ;;  %v8343_v35 = vld [vmem:[#allocation11 + $0x3a4] sm:$0xf0]  ;;  %v8490_v42 = vor.u32 %v9070_v37, %v8489_v12  ;;  %v8595_v12 = vld [vmem:[#allocation11 + $0x59c] sm:$0xf0]  ;;  %v8186_v37 = vor.u32 %v8990_v1, %v8183_v61 }
 0x2f6   :  { %v8346_v13 = vor.u32 %v9031_v48, %v8343_v35  ;;  %v9063_v48 = vld [vmem:[#allocation11 + $0x488] sm:$0xf0]  ;;  %v9004_v35 = vld [vmem:[#allocation11 + $0x2b4] sm:$0xf]  ;;  %v8713_v61 = vld [vmem:[#allocation11 + $0x668] sm:$0xf] }
 0x2f7   :  { %5545 = vmatpush.bf16.msra.mxu3 %v8594_v43  ;;  %5584 = vmatpush.bf16.msrb.mxu2 %v8374_v45  ;;  %v8050_v45 = vor.u32 %v8959_v5, %v8049_v30  ;;  %v8462_v53 = vor.u32 %v9063_v48, %v8461_v47  ;;  %v8983_v30 = vld [vmem:[#allocation11 + $0x20c] sm:$0xf]  ;;  %v7937_v5 = vld [vmem:[#allocation11 + $0x50] sm:$0xf] }
 0x2f8   :  { %5623 = vmatpush.bf16.msra.mxu1 %v8154_v49  ;;  %v8239_v49 = vld [vmem:[#allocation11 + $0x2cc] sm:$0xf0] }
 0x2f9   :  { %5659 = vmatpush.bf16.msrb.mxu0 %v8018_v0  ;;  %v9025_v0 = vld [vmem:[#allocation11 + $0x35c] sm:$0xf]  ;;  %v8242_v60 = vor.u32 %v9004_v35, %v8239_v49 }
 0x2fb   :  { %5546 = vmatpush.bf16.msra.mxu3 %v8566_v10  ;;  %5585 = vmatpush.bf16.msrb.mxu2 %v8346_v13  ;;  %v9056_v10 = vld [vmem:[#allocation11 + $0x450] sm:$0xf0]  ;;  %v8997_v13 = vld [vmem:[#allocation11 + $0x27c] sm:$0xf] }
 0x2fc   :  { %5624 = vmatpush.bf16.msra.mxu1 %v8126_v17  ;;  %v8654_v17 = vor.u32 %v9108_v56, %v8651_v58  ;;  %v8769_v56 = vld [vmem:[#allocation11 + $0x6d8] sm:$0xf]  ;;  %v9140_v58 = vld [vmem:[#allocation11 + $0x6f0] sm:$0xf0] }
 0x2fd   :  { %5660 = vmatpush.bf16.msrb.mxu0 %v7990_v22  ;;  %v8326_v22 = vor.u32 %v9025_v0, %v8323_v14  ;;  %v8433_v0 = vld [vmem:[#allocation11 + $0x438] sm:$0xf] }
 0x2fe   :  { %5547 = vmatmul.bf16.vlgmr.msra.gmra.mxu3 %v9977_v34  ;;  %5586 = vmatmul.bf16.vlgmr.msrb.gmra.mxu2 %v9959_v54  ;;  %v10014_v51 = vpop.f32.mrf.mxu1  ;;  %v8211_v14 = vld [vmem:[#allocation11 + $0x294] sm:$0xf0] }
 0x2ff   :  { %5591 = vmatpush.bf16.msrb.mxu3 %v8766_v19  ;;  %5630 = vmatpush.bf16.msra.mxu2 %v8546_v4  ;;  %v9101_v19 = vld [vmem:[#allocation11 + $0x5bc] sm:$0xf]  ;;  %v8623_v4 = vld [vmem:[#allocation11 + $0x5d4] sm:$0xf0]  ;;  %v8214_v21 = vor.u32 %v8997_v13, %v8211_v14  ;;  %v8329_v13 = vld [vmem:[#allocation11 + $0x360] sm:$0xf] }
 0x300   :  { %5669 = vmatpush.bf16.msrb.mxu1 %v8326_v22  ;;  %v8626_v46 = vor.u32 %v9101_v19, %v8623_v4  ;;  %v9029_v14 = vld [vmem:[#allocation11 + $0x378] sm:$0xf0]  ;;  %v8741_v19 = vld [vmem:[#allocation11 + $0x6a0] sm:$0xf] }
 0x301   :  { %5661 = vmatpush.bf16.msrb.mxu0 %v7962_v41  ;;  %v9011_v41 = vld [vmem:[#allocation11 + $0x2ec] sm:$0xf]  ;;  %5625 = vmatmul.bf16.vlgmr.msra.gmra.mxu1 %v9938_v40  ;;  %v4227_v22 = vpop.f32.mrf.mxu2  ;;  %v8330_v4 = vor.u32 %v9029_v14, %v8329_v13  ;;  %v8994_v13 = vld [vmem:[#allocation11 + $0x260] sm:$0xf0] }
 0x302   :  { %v8270_v43 = vor.u32 %v9011_v41, %v8267_v29  ;;  %v10023_v24 = vadd.f32 %v4227_v22, %v9999_v3  ;;  %v9042_v29 = vld [vmem:[#allocation11 + $0x3e0] sm:$0xf0]  ;;  %v8155_v3 = vld [vmem:[#allocation11 + $0x224] sm:$0xf0] }
 0x303   :  { %5592 = vmatpush.bf16.msrb.mxu3 %v8738_v25  ;;  %5631 = vmatpush.bf16.msra.mxu2 %v8518_v57  ;;  %v8938_v25 = vld [vmem:[#allocation11 + $0xa0] sm:$0xf0]  ;;  %v8158_v47 = vor.u32 %v8983_v30, %v8155_v3  ;;  %v8301_v22 = vld [vmem:[#allocation11 + $0x328] sm:$0xf]  ;;  %v8463_v30 = vld [vmem:[#allocation11 + $0x48c] sm:$0xf0] }
 0x304   :  { %5670 = vmatpush.bf16.msrb.mxu1 %v8298_v38  ;;  %v7966_v41 = vor.u32 %v8938_v25, %v7965_v31  ;;  %v9126_v25 = vld [vmem:[#allocation11 + $0x680] sm:$0xf0]  ;;  %v8245_v3 = vld [vmem:[#allocation11 + $0x2b8] sm:$0xf] }
 0x305   :  { %5662 = vmatpush.bf16.msrb.mxu0 %v7934_v9  ;;  %v8021_v9 = vld [vmem:[#allocation11 + $0xf8] sm:$0xf] }
 0x306   :  { %v8022_v62 = vor.u32 %v8952_v50, %v8021_v9  ;;  %v5420_v57 = vpop.f32.mrf.mxu1  ;;  %v9035_v9 = vld [vmem:[#allocation11 + $0x3a8] sm:$0xf0]  ;;  %v8976_v50 = vld [vmem:[#allocation11 + $0x1d4] sm:$0xf] }
 0x307   :  { %5593 = vmatpush.bf16.msrb.mxu3 %v8710_v6  ;;  %5632 = vmatpush.bf16.msra.mxu2 %v8490_v42  ;;  %v8931_v6 = vld [vmem:[#allocation11 + $0x68] sm:$0xf0] }
 0x308   :  { %5671 = vmatpush.bf16.msrb.mxu1 %v8270_v43  ;;  %v8567_v43 = vld [vmem:[#allocation11 + $0x564] sm:$0xf0]  ;;  %v7938_v48 = vor.u32 %v8931_v6, %v7937_v5  ;;  %v9067_v57 = vld [vmem:[#allocation11 + $0x4ac] sm:$0xf]  ;;  %v9008_v5 = vld [vmem:[#allocation11 + $0x2d0] sm:$0xf0] }
 0x309   :  { %5663 = vmatpush.bf16.msrb.mxu0 %v7906_v33  ;;  %v5457_v52 = vpop.f32.mrf.mxu0  ;;  %v8434_v33 = vor.u32 %v9056_v10, %v8433_v0  ;;  %v4229_v49 = vpop.f32.mrf.mxu2  ;;  %v8570_v0 = vor.u32 %v9087_v11, %v8567_v43 }
 0x30a   :  { %v10017_v27 = vadd.f32 %v5457_v52, %v9957_v20  ;;  %v4188_v20 = vpop.f32.mrf.mxu3  ;;  %v8127_v52 = vld [vmem:[#allocation11 + $0x1ec] sm:$0xf0]  ;;  %v8217_v49 = vld [vmem:[#allocation11 + $0x280] sm:$0xf] }
 0x30b   :  { %5594 = vmatpush.bf16.msrb.mxu3 %v8682_v2  ;;  %5633 = vmatpush.bf16.msra.mxu2 %v8462_v53  ;;  %v10020_v23 = vadd.f32 %v4188_v20, %v10008_v26  ;;  %v8377_v26 = vld [vmem:[#allocation11 + $0x3c8] sm:$0xf]  ;;  %v7909_v2 = vld [vmem:[#allocation11 + $0x18] sm:$0xf]  ;;  %v8924_v53 = vld [vmem:[#allocation11 + $0x30] sm:$0xf0]  ;;  %v8130_v15 = vor.u32 %v8976_v50, %v8127_v52 }
 0x30c   :  { %5664 = vmatmul.bf16.vlgmr.msrb.gmra.mxu0 %v9920_v44  ;;  %5672 = vmatpush.bf16.msrb.mxu1 %v8242_v60  ;;  %v8378_v63 = vor.u32 %v9042_v29, %v8377_v26  ;;  %v9081_v60 = vld [vmem:[#allocation11 + $0x51c] sm:$0xf]  ;;  %v7910_v16 = vor.u32 %v8924_v53, %v7909_v2  ;;  %v8519_v20 = vld [vmem:[#allocation11 + $0x4fc] sm:$0xf0]  ;;  %v9119_v26 = vld [vmem:[#allocation11 + $0x648] sm:$0xf0] }
 0x30d   :  { %5708 = vmatpush.bf16.msra.mxu0 %v8106_v8  ;;  %v8405_v8 = vld [vmem:[#allocation11 + $0x400] sm:$0xf]  ;;  %v9060_v29 = vld [vmem:[#allocation11 + $0x474] sm:$0xf] }
 0x30e   :  { %v8406_v38 = vor.u32 %v9049_v18, %v8405_v8  ;;  %v9022_v8 = vld [vmem:[#allocation11 + $0x340] sm:$0xf0]  ;;  %v8466_v11 = vor.u32 %v9060_v29, %v8463_v30  ;;  %v8629_v2 = vld [vmem:[#allocation11 + $0x5c0] sm:$0xf] }
 0x30f   :  { %5595 = vmatpush.bf16.msrb.mxu3 %v8654_v17  ;;  %5634 = vmatpush.bf16.msra.mxu2 %v8434_v33  ;;  %v8770_v17 = vor.u32 %v9140_v58, %v8769_v56  ;;  %v8302_v31 = vor.u32 %v9022_v8, %v8301_v22  ;;  %v8987_v22 = vld [vmem:[#allocation11 + $0x228] sm:$0xf0] }
 0x310   :  { %5673 = vmatpush.bf16.msrb.mxu1 %v8214_v21  ;;  %v9133_v21 = vld [vmem:[#allocation11 + $0x6b8] sm:$0xf0] }
 0x311   :  { %5709 = vmatpush.bf16.msra.mxu0 %v8078_v39  ;;  %v5459_v32 = vpop.f32.mrf.mxu0  ;;  %v9094_v39 = vld [vmem:[#allocation11 + $0x584] sm:$0xf]  ;;  %v8742_v18 = vor.u32 %v9133_v21, %v8741_v19  ;;  %v9039_v21 = vld [vmem:[#allocation11 + $0x3cc] sm:$0xf] }
 0x312   :  { %v8598_v42 = vor.u32 %v9094_v39, %v8595_v12  ;;  %v4190_v35 = vpop.f32.mrf.mxu3  ;;  %v8491_v32 = vld [vmem:[#allocation11 + $0x4c4] sm:$0xf0]  ;;  %v8714_v39 = vor.u32 %v9126_v25, %v8713_v61 }
 0x313   :  { %5596 = vmatpush.bf16.msrb.mxu3 %v8626_v46  ;;  %5635 = vmatpush.bf16.msra.mxu2 %v8406_v38  ;;  %v8273_v46 = vld [vmem:[#allocation11 + $0x2f0] sm:$0xf]  ;;  %v9015_v38 = vld [vmem:[#allocation11 + $0x308] sm:$0xf0]  ;;  %v8494_v12 = vor.u32 %v9067_v57, %v8491_v32  ;;  %v8435_v35 = vld [vmem:[#allocation11 + $0x454] sm:$0xf0] }
 0x314   :  { %5674 = vmatpush.bf16.msrb.mxu1 %v8186_v37  ;;  %v8685_v37 = vld [vmem:[#allocation11 + $0x630] sm:$0xf]  ;;  %v9032_v57 = vld [vmem:[#allocation11 + $0x394] sm:$0xf] }
 0x315   :  { %5710 = vmatpush.bf16.msra.mxu0 %v8050_v45  ;;  %v8349_v45 = vld [vmem:[#allocation11 + $0x390] sm:$0xf] }
 0x316   :  { %v8350_v10 = vor.u32 %v9035_v9, %v8349_v45  ;;  %v8246_v45 = vor.u32 %v9008_v5, %v8245_v3  ;;  %v9001_v9 = vld [vmem:[#allocation11 + $0x298] sm:$0xf0]  ;;  %v8351_v32 = vld [vmem:[#allocation11 + $0x3ac] sm:$0xf0] }
 0x317   :  { %5597 = vmatpush.bf16.msrb.mxu3 %v8598_v42  ;;  %5636 = vmatpush.bf16.msra.mxu2 %v8378_v63  ;;  %v8686_v63 = vor.u32 %v9119_v26, %v8685_v37  ;;  %v8218_v53 = vor.u32 %v9001_v9, %v8217_v49  ;;  %v8553_v37 = vld [vmem:[#allocation11 + $0x520] sm:$0xf]  ;;  %v8354_v29 = vor.u32 %v9032_v57, %v8351_v32  ;;  %v8497_v49 = vld [vmem:[#allocation11 + $0x4b0] sm:$0xf]  ;;  %v9071_v9 = vld [vmem:[#allocation11 + $0x4c8] sm:$0xf0] }
 0x318   :  { %5675 = vmatpush.bf16.msrb.mxu1 %v8158_v47  ;;  %v9112_v47 = vld [vmem:[#allocation11 + $0x610] sm:$0xf0]  ;;  %v8603_v32 = vld [vmem:[#allocation11 + $0x5a4] sm:$0xf0] }
 0x319   :  { %5711 = vmatpush.bf16.msra.mxu0 %v8022_v62  ;;  %v8547_v62 = vld [vmem:[#allocation11 + $0x534] sm:$0xf0] }
 0x31a   :  { %v8550_v33 = vor.u32 %v9081_v60, %v8547_v62  ;;  %v9105_v60 = vld [vmem:[#allocation11 + $0x5d8] sm:$0xf0]  ;;  %v9046_v62 = vld [vmem:[#allocation11 + $0x404] sm:$0xf] }
 0x31b   :  { %5598 = vmatpush.bf16.msrb.mxu3 %v8570_v0  ;;  %5637 = vmatpush.bf16.msra.mxu2 %v8350_v10  ;;  %v8189_v10 = vld [vmem:[#allocation11 + $0x248] sm:$0xf] }
 0x31c   :  { %5676 = vmatpush.bf16.msrb.mxu1 %v8130_v15  ;;  %v8190_v19 = vor.u32 %v8994_v13, %v8189_v10 }
 0x31d   :  { %5712 = vmatpush.bf16.msra.mxu0 %v7994_v59  ;;  %v9074_v59 = vld [vmem:[#allocation11 + $0x4e4] sm:$0xf] }
 0x31e   :  { %v8522_v1 = vor.u32 %v9074_v59, %v8519_v20  ;;  %5599 = vmatmul.bf16.vlgmr.msrb.gmra.mxu3 %v9977_v34  ;;  %5638 = vmatmul.bf16.vlgmr.msra.gmra.mxu2 %v9959_v54  ;;  %v10029_v6 = vpop.f32.mrf.mxu1  ;;  %v8379_v59 = vld [vmem:[#allocation11 + $0x3e4] sm:$0xf0]  ;;  %v8161_v20 = vld [vmem:[#allocation11 + $0x210] sm:$0xf] }
 0x31f   :  { %5643 = vmatpush.bf16.msra.mxu3 %v8770_v17  ;;  %5682 = vmatpush.bf16.msrb.mxu2 %v8550_v33  ;;  %v8601_v33 = vld [vmem:[#allocation11 + $0x588] sm:$0xf]  ;;  %v8382_v8 = vor.u32 %v9039_v21, %v8379_v59  ;;  %v8162_v61 = vor.u32 %v8987_v22, %v8161_v20  ;;  %v9102_v22 = vld [vmem:[#allocation11 + $0x5c4] sm:$0xf] }
 0x320   :  { %5721 = vmatpush.bf16.msra.mxu1 %v8330_v4  ;;  %v9098_v4 = vld [vmem:[#allocation11 + $0x5a0] sm:$0xf0] }
 0x321   :  { %5713 = vmatpush.bf16.msra.mxu0 %v7966_v41  ;;  %5677 = vmatmul.bf16.vlgmr.msrb.gmra.mxu1 %v9938_v40  ;;  %v8274_v41 = vor.u32 %v9015_v38, %v8273_v46  ;;  %v4240_v56 = vpop.f32.mrf.mxu3  ;;  %v10034_v58 = vpop.f32.mrf.mxu2  ;;  %v8133_v46 = vld [vmem:[#allocation11 + $0x1d8] sm:$0xf]  ;;  %v8980_v38 = vld [vmem:[#allocation11 + $0x1f0] sm:$0xf0] }
 0x322   :  { %v10037_v0 = vadd.f32 %v4240_v56, %v10023_v24  ;;  %v8602_v24 = vor.u32 %v9098_v4, %v8601_v33  ;;  %v8134_v30 = vor.u32 %v8980_v38, %v8133_v46  ;;  %v8469_v56 = vld [vmem:[#allocation11 + $0x478] sm:$0xf]  ;;  %v10047_v33 = vld [vmem:[#allocation13] sm:$0xff]  ;;  %v8385_v46 = vld [vmem:[#allocation11 + $0x3d0] sm:$0xf] }
 0x323   :  { %5644 = vmatpush.bf16.msra.mxu3 %v8742_v18  ;;  %5683 = vmatpush.bf16.msrb.mxu2 %v8522_v1  ;;  %v8573_v18 = vld [vmem:[#allocation11 + $0x550] sm:$0xf]  ;;  %v9091_v1 = vld [vmem:[#allocation11 + $0x568] sm:$0xf0]  ;;  %v5762_v20 = vperm.slane %v10047_v33, 0 }
 0x324   :  { %5722 = vmatpush.bf16.msra.mxu1 %v8302_v31  ;;  %v8574_v26 = vor.u32 %v9091_v1, %v8573_v18  ;;  %v8413_v18 = vld [vmem:[#allocation11 + $0x408] sm:$0xf]  ;;  %v9050_v1 = vld [vmem:[#allocation11 + $0x420] sm:$0xf0]  ;;  %v9043_v38 = vld [vmem:[#allocation11 + $0x3e8] sm:$0xf0] }
 0x325   :  { %5714 = vmatpush.bf16.msra.mxu0 %v7938_v48  ;;  %v9053_v48 = vld [vmem:[#allocation11 + $0x43c] sm:$0xf]  ;;  %v8414_v57 = vor.u32 %v9050_v1, %v8413_v18  ;;  %v5763_v1 = vperm.slane %v10047_v33, 1 }
 0x326   :  { %v8438_v52 = vor.u32 %v9053_v48, %v8435_v35  ;;  %v5472_v14 = vpop.f32.mrf.mxu1  ;;  %v9123_v48 = vld [vmem:[#allocation11 + $0x66c] sm:$0xf]  ;;  %v8715_v35 = vld [vmem:[#allocation11 + $0x684] sm:$0xf0] }
 0x327   :  { %5645 = vmatpush.bf16.msra.mxu3 %v8714_v39  ;;  %5684 = vmatpush.bf16.msrb.mxu2 %v8494_v12  ;;  %v9137_v39 = vld [vmem:[#allocation11 + $0x6dc] sm:$0xf]  ;;  %v8771_v12 = vld [vmem:[#allocation11 + $0x6f4] sm:$0xf0] }
 0x328   :  { %5723 = vmatpush.bf16.msra.mxu1 %v8274_v41  ;;  %v9085_v41 = vld [vmem:[#allocation11 + $0x538] sm:$0xf0]  ;;  %v8774_v3 = vor.u32 %v9137_v39, %v8771_v12 }
 0x329   :  { %5715 = vmatpush.bf16.msra.mxu0 %v7910_v16  ;;  %v5509_v42 = vpop.f32.mrf.mxu0  ;;  %v8630_v16 = vor.u32 %v9105_v60, %v8629_v2  ;;  %v4242_v31 = vpop.f32.mrf.mxu3  ;;  %v8554_v5 = vor.u32 %v9085_v41, %v8553_v37  ;;  %v9116_v2 = vld [vmem:[#allocation11 + $0x634] sm:$0xf]  ;;  %v9109_v14 = vld [vmem:[#allocation11 + $0x5fc] sm:$0xf]  ;;  %v8386_v37 = vor.u32 %v9043_v38, %v8385_v46 }
 0x32a   :  { %v10032_v43 = vadd.f32 %v5509_v42, %v9974_v36  ;;  %v8407_v36 = vld [vmem:[#allocation11 + $0x41c] sm:$0xf0]  ;;  %v5433_v25 = vpop.f32.mrf.mxu2  ;;  %v9130_v42 = vld [vmem:[#allocation11 + $0x6a4] sm:$0xf]  ;;  %v9064_v60 = vld [vmem:[#allocation11 + $0x490] sm:$0xf0] }
 0x32b   :  { %5646 = vmatpush.bf16.msra.mxu3 %v8686_v63  ;;  %5685 = vmatpush.bf16.msrb.mxu2 %v8466_v11  ;;  %v8410_v17 = vor.u32 %v9046_v62, %v8407_v36  ;;  %v8743_v63 = vld [vmem:[#allocation11 + $0x6bc] sm:$0xf0]  ;;  %v8525_v11 = vld [vmem:[#allocation11 + $0x4e8] sm:$0xf]  ;;  %v8470_v13 = vor.u32 %v9064_v60, %v8469_v56  ;;  %v9088_v41 = vld [vmem:[#allocation11 + $0x554] sm:$0xf] }
 0x32c   :  { %5716 = vmatmul.bf16.vlgmr.msra.gmra.mxu0 %v9920_v44  ;;  %v8657_v44 = vld [vmem:[#allocation11 + $0x5f8] sm:$0xf]  ;;  %5724 = vmatpush.bf16.msra.mxu1 %v8246_v45  ;;  %v8746_v45 = vor.u32 %v9130_v42, %v8743_v63  ;;  %v8777_v42 = vld [vmem:[#allocation11 + $0x6e0] sm:$0xf]  ;;  %v9141_v63 = vld [vmem:[#allocation11 + $0x6f8] sm:$0xf0] }
 0x32d   :  { %v8658_v50 = vor.u32 %v9112_v47, %v8657_v44  ;;  %v9078_v44 = vld [vmem:[#allocation11 + $0x500] sm:$0xf0]  ;;  %v9120_v56 = vld [vmem:[#allocation11 + $0x650] sm:$0xf0] }
 0x32e   :  { %v8526_v47 = vor.u32 %v9078_v44, %v8525_v11 }
 0x32f   :  { %5647 = vmatpush.bf16.msra.mxu3 %v8658_v50  ;;  %5686 = vmatpush.bf16.msrb.mxu2 %v8438_v52  ;;  %v8718_v50 = vor.u32 %v9123_v48, %v8715_v35  ;;  %v8498_v52 = vor.u32 %v9071_v9, %v8497_v49  ;;  %v9134_v48 = vld [vmem:[#allocation11 + $0x6c0] sm:$0xf0] }
 0x330   :  { %5725 = vmatpush.bf16.msra.mxu1 %v8218_v53  ;;  %v8687_v53 = vld [vmem:[#allocation11 + $0x64c] sm:$0xf0] }
 0x331   :  { %v5511_v15 = vpop.f32.mrf.mxu0  ;;  %v8690_v62 = vor.u32 %v9116_v2, %v8687_v53  ;;  %v8693_v53 = vld [vmem:[#allocation11 + $0x638] sm:$0xf] }
 0x332   :  { %v8659_v15 = vld [vmem:[#allocation11 + $0x614] sm:$0xf0] }
 0x333   :  { %5648 = vmatpush.bf16.msra.mxu3 %v8630_v16  ;;  %5687 = vmatpush.bf16.msrb.mxu2 %v8410_v17  ;;  %v9057_v17 = vld [vmem:[#allocation11 + $0x458] sm:$0xf0]  ;;  %v8662_v4 = vor.u32 %v9109_v14, %v8659_v15 }
 0x334   :  { %5726 = vmatpush.bf16.msra.mxu1 %v8190_v19  ;;  %v5419_v19 = vadd.f32 %v10014_v51, %v10002_v7  ;;  %v9113_v14 = vld [vmem:[#allocation11 + $0x618] sm:$0xf0] }
 0x336   :  { %v5432_v21 = vadd.f32 %v10034_v58, %v5419_v19  ;;  %v9095_v58 = vld [vmem:[#allocation11 + $0x58c] sm:$0xf]  ;;  %v5471_v19 = vadd.f32 %v10029_v6, %v10017_v27 }
 0x337   :  { %5649 = vmatpush.bf16.msra.mxu3 %v8602_v24  ;;  %5688 = vmatpush.bf16.msrb.mxu2 %v8382_v8  ;;  %v8631_v24 = vld [vmem:[#allocation11 + $0x5dc] sm:$0xf0]  ;;  %v8606_v12 = vor.u32 %v9095_v58, %v8603_v32 }
 0x338   :  { %5727 = vmatpush.bf16.msra.mxu1 %v8162_v61  ;;  %v8634_v31 = vor.u32 %v9102_v22, %v8631_v24  ;;  %v8637_v22 = vld [vmem:[#allocation11 + $0x5c8] sm:$0xf]  ;;  %v9106_v24 = vld [vmem:[#allocation11 + $0x5e0] sm:$0xf0] }
 0x33b   :  { %5650 = vmatpush.bf16.msra.mxu3 %v8574_v26  ;;  %5689 = vmatpush.bf16.msrb.mxu2 %v8354_v29  ;;  %v8575_v26 = vld [vmem:[#allocation11 + $0x56c] sm:$0xf0]  ;;  %v8357_v29 = vld [vmem:[#allocation11 + $0x398] sm:$0xf] }
 0x33c   :  { %5728 = vmatpush.bf16.msra.mxu1 %v8134_v30  ;;  %v8578_v11 = vor.u32 %v9088_v41, %v8575_v26 }
 0x33e   :  { %5651 = vmatmul.bf16.vlgmr.msra.gmra.mxu3 %v9977_v34  ;;  %5690 = vmatmul.bf16.vlgmr.msrb.gmra.mxu2 %v9959_v54  ;;  %v10042_v36 = vpop.f32.mrf.mxu1 }
 0x33f   :  { %5695 = vmatpush.bf16.msrb.mxu3 %v8774_v3  ;;  %5734 = vmatpush.bf16.msra.mxu2 %v8554_v5  ;;  %v9036_v5 = vld [vmem:[#allocation11 + $0x3b0] sm:$0xf0] }
 0x340   :  { %5729 = vmatmul.bf16.vlgmr.msra.gmra.mxu1 %v9938_v40  ;;  %v8441_v40 = vld [vmem:[#allocation11 + $0x440] sm:$0xf]  ;;  %v8358_v44 = vor.u32 %v9036_v5, %v8357_v29 }
 0x341   :  { %v8442_v59 = vor.u32 %v9057_v17, %v8441_v40  ;;  %v5444_v8 = vpop.f32.mrf.mxu3 }
 0x342   :  { %v5445_v61 = vadd.f32 %v5444_v8, %v5432_v21 }
 0x343   :  { %5696 = vmatpush.bf16.msrb.mxu3 %v8746_v45  ;;  %5735 = vmatpush.bf16.msra.mxu2 %v8526_v47  ;;  %v8778_v45 = vor.u32 %v9141_v63, %v8777_v42  ;;  %v8749_v47 = vld [vmem:[#allocation11 + $0x6a8] sm:$0xf] }
 0x344   :  { %v5776_v7 = vadd.f32 %v5762_v20, %v5445_v61  ;;  %v8750_v9 = vor.u32 %v9134_v48, %v8749_v47  ;;  %v5523_v47 = vadd.f32 %v10042_v36, %v10032_v43 }
 0x346   :  { %v5524_v51 = vpop.f32.mrf.mxu1  ;;  %v8779_v39 = vmul.f32 -1.442695, %v5776_v7  ;;  %v8638_v7 = vor.u32 %v9106_v24, %v8637_v22 }
 0x347   :  { %5697 = vmatpush.bf16.msrb.mxu3 %v8718_v50  ;;  %5736 = vmatpush.bf16.msra.mxu2 %v8498_v52  ;;  %v8721_v50 = vld [vmem:[#allocation11 + $0x670] sm:$0xf]  ;;  %v9127_v52 = vld [vmem:[#allocation11 + $0x688] sm:$0xf0] }
 0x348   :  { %9508 = vpow2.f32 %v8779_v39  ;;  %v8722_v2 = vor.u32 %v9127_v52, %v8721_v50  ;;  %v8581_v39 = vld [vmem:[#allocation11 + $0x558] sm:$0xf] }
 0x349   :  { %v5561_v10 = vpop.f32.mrf.mxu0  ;;  %v5446_v30 = vpop.f32.mrf.mxu3 }
 0x34a   :  { %v10045_v16 = vadd.f32 %v5561_v10, %v9989_v55  ;;  %v10053_v55 = vpop.f32.mrf.mxu2  ;;  %v8694_v10 = vor.u32 %v9120_v56, %v8693_v53 }
 0x34b   :  { %5698 = vmatpush.bf16.msrb.mxu3 %v8690_v62  ;;  %5737 = vmatpush.bf16.msra.mxu2 %v8470_v13  ;;  %v8665_v13 = vld [vmem:[#allocation11 + $0x600] sm:$0xf]  ;;  %v5484_v18 = vadd.f32 %v10053_v55, %v5471_v19 }
 0x34c   :  { %v8666_v20 = vor.u32 %v9113_v14, %v8665_v13 }
 0x34e   :  { %v9509_v35 = vpop.eup %9508 }
 0x34f   :  { %5699 = vmatpush.bf16.msrb.mxu3 %v8662_v4  ;;  %5738 = vmatpush.bf16.msra.mxu2 %v8442_v59  ;;  %v5804_v49 = vadd.f32 1.0, %v9509_v35 }
 0x351   :  { %v5563_v25 = vpop.f32.mrf.mxu0  ;;  %9510 = vrcp.f32 %v5804_v49  ;;  %v5822_v4 = vand.u32 2147483648, %v5804_v49  ;;  %v5820_v59 = vand.u32 2147483647, %v5804_v49  ;;  %vm5816_vm2 = vweird.f32 %v5804_v49 }
 0x352   :  { %v5485_v3 = vpop.f32.mrf.mxu2  ;;  %v8609_v25 = vld [vmem:[#allocation11 + $0x590] sm:$0xf] }
 0x353   :  { %5700 = vmatpush.bf16.msrb.mxu3 %v8634_v31  ;;  %5739 = vmatpush.bf16.msra.mxu2 %v8414_v57  ;;  %v5823_v61 = vor.u32 1.1754944e-38, %v5822_v4  ;;  %vm5821_vm4 = vcmp.eq.f32.partialorder %v5820_v59, 8.507059e+37  ;;  %v9099_v57 = vld [vmem:[#allocation11 + $0x5a8] sm:$0xf0] }
 0x354   :  { %v8610_v55 = vor.u32 %v9099_v57, %v8609_v25 }
 0x357   :  { %5701 = vmatpush.bf16.msrb.mxu3 %v8606_v12  ;;  %5740 = vmatpush.bf16.msra.mxu2 %v8386_v37  ;;  %v9511_v60 = vpop.eup %9510  ;;  %v9092_v12 = vld [vmem:[#allocation11 + $0x570] sm:$0xf0] }
 0x358   :  { %v5812_v62 = vmul.f32 %v9511_v60, %v5804_v49  ;;  %vm5817_vm1 = vweird.f32 %v9511_v60  ;;  %v8582_v26 = vor.u32 %v9092_v12, %v8581_v39 }
 0x359   :  { %vm5818_vm3 = vmor %vm5816_vm2, %vm5817_vm1 }
 0x35a   :  { %v5813_v15 = vsub.f32 1.0, %v5812_v62 }
 0x35b   :  { %5702 = vmatpush.bf16.msrb.mxu3 %v8578_v11  ;;  %5741 = vmatpush.bf16.msra.mxu2 %v8358_v44 }
 0x35c   :  { %v5814_v21 = vmul.f32 %v9511_v60, %v5813_v15 }
 0x35e   :  { %5703 = vmatmul.bf16.vlgmr.msrb.gmra.mxu3 %v9977_v34  ;;  %5742 = vmatmul.bf16.vlgmr.msra.gmra.mxu2 %v9959_v54  ;;  %v10057_v40 = vpop.f32.mrf.mxu1  ;;  %v5815_v8 = vadd.f32 %v9511_v60, %v5814_v21 }
 0x35f   :  { %5747 = vmatpush.bf16.msra.mxu3 %v8778_v45 }
 0x360   :  { %v5819_v31 = vsel %vm5818_vm3, %v9511_v60, %v5815_v8 }
 0x361   :  { %v5496_v27 = vpop.f32.mrf.mxu3  ;;  %v5535_v6 = vpop.f32.mrf.mxu2  ;;  %v5824_v51 = vsel %vm5821_vm4, %v5823_v61, %v5819_v31  ;;  %v5765_v61 = vperm.slane %v10047_v33, 3 }
 0x362   :  { %5916 = vst [vmem:[#allocation14] sm:$0xff] %v5824_v51 }
 0x363   :  { %5748 = vmatpush.bf16.msra.mxu3 %v8750_v9  ;;  %v5536_v9 = vadd.f32 %v5535_v6, %v5523_v47 }
 0x366   :  { %v5576_v32 = vpop.f32.mrf.mxu1 }
 0x367   :  { %5749 = vmatpush.bf16.msra.mxu3 %v8722_v2 }
 0x369   :  { %v5613_v17 = vpop.f32.mrf.mxu0  ;;  %v5498_v37 = vpop.f32.mrf.mxu3 }
 0x36a   :  { %v10062_v54 = vadd.f32 %v5613_v17, %v10005_v28  ;;  %v5497_v28 = vadd.f32 %v5496_v27, %v5484_v18  ;;  %v5537_v41 = vpop.f32.mrf.mxu2 }
 0x36b   :  { %5750 = vmatpush.bf16.msra.mxu3 %v8694_v10 }
 0x36c   :  { %v5777_v58 = vadd.f32 %v5763_v1, %v5497_v28 }
 0x36e   :  { %v8780_v38 = vmul.f32 -1.442695, %v5777_v58 }
 0x36f   :  { %5751 = vmatpush.bf16.msra.mxu3 %v8666_v20  ;;  %v5575_v20 = vadd.f32 %v10057_v40, %v10045_v16 }
 0x370   :  { %9512 = vpow2.f32 %v8780_v38 }
 0x371   :  { %v5615_v46 = vpop.f32.mrf.mxu0 }
 0x373   :  { %5752 = vmatpush.bf16.msra.mxu3 %v8638_v7 }
 0x376   :  { %v9513_v29 = vpop.eup %9512 }
 0x377   :  { %5753 = vmatpush.bf16.msra.mxu3 %v8610_v55  ;;  %v5805_v30 = vadd.f32 1.0, %v9513_v29 }
 0x379   :  { %9514 = vrcp.f32 %v5805_v30  ;;  %v5837_v44 = vand.u32 2147483648, %v5805_v30  ;;  %v5835_v35 = vand.u32 2147483647, %v5805_v30  ;;  %vm5831_vm6 = vweird.f32 %v5805_v30 }
 0x37b   :  { %5754 = vmatpush.bf16.msra.mxu3 %v8582_v26  ;;  %v5838_v50 = vor.u32 1.1754944e-38, %v5837_v44  ;;  %vm5836_vm8 = vcmp.eq.f32.partialorder %v5835_v35, 8.507059e+37 }
 0x37e   :  { %5755 = vmatmul.bf16.vlgmr.msra.gmra.mxu3 %v9977_v34  ;;  %v10067_v63 = vpop.f32.mrf.mxu1  ;;  %v5764_v34 = vperm.slane %v10047_v33, 2 }
 0x37f   :  { %v9515_v3 = vpop.eup %9514  ;;  %v5627_v26 = vadd.f32 %v10067_v63, %v10062_v54 }
 0x380   :  { %v5827_v5 = vmul.f32 %v9515_v3, %v5805_v30  ;;  %vm5832_vm5 = vweird.f32 %v9515_v3 }
 0x381   :  { %vm5833_vm7 = vmor %vm5831_vm6, %vm5832_vm5  ;;  %v5548_v52 = vpop.f32.mrf.mxu3  ;;  %v5587_v2 = vpop.f32.mrf.mxu2 }
 0x382   :  { %v5828_v42 = vsub.f32 1.0, %v5827_v5  ;;  %v5549_v56 = vadd.f32 %v5548_v52, %v5536_v9  ;;  %v5588_v1 = vadd.f32 %v5587_v2, %v5575_v20 }
 0x384   :  { %v5829_v48 = vmul.f32 %v9515_v3, %v5828_v42  ;;  %v5778_v60 = vadd.f32 %v5764_v34, %v5549_v56  ;;  %v5766_v42 = vperm.slane %v10047_v33, 4 }
 0x386   :  { %v5830_v49 = vadd.f32 %v9515_v3, %v5829_v48  ;;  %v5628_v62 = vpop.f32.mrf.mxu1  ;;  %v8781_v36 = vmul.f32 -1.442695, %v5778_v60 }
 0x388   :  { %v5834_v53 = vsel %vm5833_vm7, %v9515_v3, %v5830_v49  ;;  %9516 = vpow2.f32 %v8781_v36 }
 0x389   :  { %v5665_v11 = vpop.f32.mrf.mxu0  ;;  %v5550_v10 = vpop.f32.mrf.mxu3 }
 0x38a   :  { %v10070_v45 = vadd.f32 %v5665_v11, %v10020_v23  ;;  %v5839_v23 = vsel %vm5836_vm8, %v5838_v50, %v5834_v53  ;;  %v5589_v13 = vpop.f32.mrf.mxu2 }
 0x38b   :  { %5917 = vst [vmem:[#allocation14 + $0x8] sm:$0xff] %v5839_v23  ;;  %v5767_v13 = vperm.slane %v10047_v33, 5 }
 0x38e   :  { %v9517_v14 = vpop.eup %9516 }
 0x38f   :  { %v5806_v15 = vadd.f32 1.0, %v9517_v14 }
 0x391   :  { %v5667_v43 = vpop.f32.mrf.mxu0  ;;  %9518 = vrcp.f32 %v5806_v15  ;;  %v5852_v22 = vand.u32 2147483648, %v5806_v15  ;;  %v5850_v18 = vand.u32 2147483647, %v5806_v15  ;;  %vm5846_vm10 = vweird.f32 %v5806_v15 }
 0x393   :  { %v5853_v31 = vor.u32 1.1754944e-38, %v5852_v22  ;;  %vm5851_vm12 = vcmp.eq.f32.partialorder %v5850_v18, 8.507059e+37 }
 0x397   :  { %v9519_v17 = vpop.eup %9518 }
 0x398   :  { %v5842_v19 = vmul.f32 %v9519_v17, %v5806_v15  ;;  %vm5847_vm9 = vweird.f32 %v9519_v17 }
 0x399   :  { %vm5848_vm11 = vmor %vm5846_vm10, %vm5847_vm9 }
 0x39a   :  { %v5843_v21 = vsub.f32 1.0, %v5842_v19 }
 0x39c   :  { %v5844_v8 = vmul.f32 %v9519_v17, %v5843_v21 }
 0x39e   :  { %v10075_v4 = vpop.f32.mrf.mxu1  ;;  %v5845_v27 = vadd.f32 %v9519_v17, %v5844_v8 }
 0x39f   :  { %v5679_v60 = vadd.f32 %v10075_v4, %v10070_v45 }
 0x3a0   :  { %v5849_v51 = vsel %vm5848_vm11, %v9519_v17, %v5845_v27 }
 0x3a1   :  { %v5600_v6 = vpop.f32.mrf.mxu3  ;;  %v5639_v7 = vpop.f32.mrf.mxu2  ;;  %v5854_v16 = vsel %vm5851_vm12, %v5853_v31, %v5849_v51 }
 0x3a2   :  { %v5601_v28 = vadd.f32 %v5600_v6, %v5588_v1  ;;  %5918 = vst [vmem:[#allocation14 + $0x10] sm:$0xff] %v5854_v16  ;;  %v5640_v5 = vadd.f32 %v5639_v7, %v5627_v26 }
 0x3a4   :  { %v5779_v40 = vadd.f32 %v5765_v61, %v5601_v28 }
 0x3a6   :  { %v5680_v25 = vpop.f32.mrf.mxu1  ;;  %v8782_v57 = vmul.f32 -1.442695, %v5779_v40  ;;  %v5768_v40 = vperm.slane %v10047_v33, 6 }
 0x3a8   :  { %9520 = vpow2.f32 %v8782_v57 }
 0x3a9   :  { %v5717_v59 = vpop.f32.mrf.mxu0  ;;  %v5602_v58 = vpop.f32.mrf.mxu3 }
 0x3aa   :  { %v10080_v24 = vadd.f32 %v5717_v59, %v10037_v0  ;;  %v5641_v32 = vpop.f32.mrf.mxu2 }
 0x3ae   :  { %v9521_v46 = vpop.eup %9520 }
 0x3af   :  { %v5807_v38 = vadd.f32 1.0, %v9521_v46 }
 0x3b1   :  { %v5719_v0 = vpop.f32.mrf.mxu0  ;;  %9522 = vrcp.f32 %v5807_v38  ;;  %v5867_v41 = vand.u32 2147483648, %v5807_v38  ;;  %v5865_v30 = vand.u32 2147483647, %v5807_v38  ;;  %vm5861_vm14 = vweird.f32 %v5807_v38 }
 0x3b3   :  { %v5868_v11 = vor.u32 1.1754944e-38, %v5867_v41  ;;  %vm5866_vm0 = vcmp.eq.f32.partialorder %v5865_v30, 8.507059e+37 }
 0x3b7   :  { %v9523_v55 = vpop.eup %9522 }
 0x3b8   :  { %v5857_v39 = vmul.f32 %v9523_v55, %v5807_v38  ;;  %vm5862_vm13 = vweird.f32 %v9523_v55 }
 0x3b9   :  { %vm5863_vm15 = vmor %vm5861_vm14, %vm5862_vm13 }
 0x3ba   :  { %v5858_v12 = vsub.f32 1.0, %v5857_v39 }
 0x3bc   :  { %v5859_v29 = vmul.f32 %v9523_v55, %v5858_v12 }
 0x3bd   :  { %v5730_v37 = vpop.f32.mrf.mxu1 }
 0x3be   :  { %v5860_v3 = vadd.f32 %v9523_v55, %v5859_v29  ;;  %v5731_v31 = vadd.f32 %v5730_v37, %v10080_v24 }
 0x3c0   :  { %v5864_v48 = vsel %vm5863_vm15, %v9523_v55, %v5860_v3 }
 0x3c1   :  { %v5652_v44 = vpop.f32.mrf.mxu3  ;;  %v5691_v47 = vpop.f32.mrf.mxu2  ;;  %v5869_v49 = vsel %vm5866_vm0, %v5868_v11, %v5864_v48 }
 0x3c2   :  { %v5653_v35 = vadd.f32 %v5652_v44, %v5640_v5  ;;  %5919 = vst [vmem:[#allocation14 + $0x18] sm:$0xff] %v5869_v49  ;;  %v5692_v10 = vadd.f32 %v5691_v47, %v5679_v60 }
 0x3c4   :  { %v5780_v9 = vadd.f32 %v5766_v42, %v5653_v35 }
 0x3c5   :  { %v5732_v34 = vpop.f32.mrf.mxu1 }
 0x3c6   :  { %v8783_v54 = vmul.f32 -1.442695, %v5780_v9 }
 0x3c8   :  { %9524 = vpow2.f32 %v8783_v54 }
 0x3c9   :  { %v5654_v63 = vpop.f32.mrf.mxu3  ;;  %v5693_v50 = vpop.f32.mrf.mxu2 }
 0x3ce   :  { %v9525_v52 = vpop.eup %9524 }
 0x3cf   :  { %v5808_v2 = vadd.f32 1.0, %v9525_v52 }
 0x3d1   :  { %9526 = vrcp.f32 %v5808_v2  ;;  %v5882_v62 = vand.u32 2147483648, %v5808_v2  ;;  %v5880_v36 = vand.u32 2147483647, %v5808_v2  ;;  %vm5876_vm2 = vweird.f32 %v5808_v2 }
 0x3d3   :  { %v5883_v17 = vor.u32 1.1754944e-38, %v5882_v62  ;;  %vm5881_vm4 = vcmp.eq.f32.partialorder %v5880_v36, 8.507059e+37 }
 0x3d7   :  { %v9527_v53 = vpop.eup %9526 }
 0x3d8   :  { %v5872_v56 = vmul.f32 %v9527_v53, %v5808_v2  ;;  %vm5877_vm1 = vweird.f32 %v9527_v53 }
 0x3d9   :  { %vm5878_vm3 = vmor %vm5876_vm2, %vm5877_vm1 }
 0x3da   :  { %v5873_v23 = vsub.f32 1.0, %v5872_v56 }
 0x3dc   :  { %v5874_v43 = vmul.f32 %v9527_v53, %v5873_v23 }
 0x3de   :  { %v5875_v14 = vadd.f32 %v9527_v53, %v5874_v43 }
 0x3e0   :  { %v5879_v59 = vsel %vm5878_vm3, %v9527_v53, %v5875_v14 }
 0x3e1   :  { %v5704_v15 = vpop.f32.mrf.mxu3  ;;  %v5743_v21 = vpop.f32.mrf.mxu2  ;;  %v5884_v20 = vsel %vm5881_vm4, %v5883_v17, %v5879_v59 }
 0x3e2   :  { %v5705_v19 = vadd.f32 %v5704_v15, %v5692_v10  ;;  %5920 = vst [vmem:[#allocation14 + $0x20] sm:$0xff] %v5884_v20  ;;  %v5744_v16 = vadd.f32 %v5743_v21, %v5731_v31 }
 0x3e4   :  { %v5781_v22 = vadd.f32 %v5767_v13, %v5705_v19 }
 0x3e6   :  { %v8784_v45 = vmul.f32 -1.442695, %v5781_v22 }
 0x3e8   :  { %9528 = vpow2.f32 %v8784_v45 }
 0x3e9   :  { %v5706_v4 = vpop.f32.mrf.mxu3  ;;  %v5745_v8 = vpop.f32.mrf.mxu2 }
 0x3ee   :  { %v9529_v18 = vpop.eup %9528 }
 0x3ef   :  { %v5809_v1 = vadd.f32 1.0, %v9529_v18 }
 0x3f1   :  { %9530 = vrcp.f32 %v5809_v1  ;;  %v5897_v28 = vand.u32 2147483648, %v5809_v1  ;;  %v5895_v51 = vand.u32 2147483647, %v5809_v1  ;;  %vm5891_vm6 = vweird.f32 %v5809_v1 }
 0x3f3   :  { %v5898_v57 = vor.u32 1.1754944e-38, %v5897_v28  ;;  %vm5896_vm8 = vcmp.eq.f32.partialorder %v5895_v51, 8.507059e+37 }
 0x3f7   :  { %v9531_v61 = vpop.eup %9530 }
 0x3f8   :  { %v5887_v27 = vmul.f32 %v9531_v61, %v5809_v1  ;;  %vm5892_vm5 = vweird.f32 %v9531_v61 }
 0x3f9   :  { %vm5893_vm7 = vmor %vm5891_vm6, %vm5892_vm5 }
 0x3fa   :  { %v5888_v6 = vsub.f32 1.0, %v5887_v27 }
 0x3fc   :  { %v5889_v7 = vmul.f32 %v9531_v61, %v5888_v6 }
 0x3fe   :  { %v5890_v25 = vadd.f32 %v9531_v61, %v5889_v7 }
 0x400   :  { %v5894_v32 = vsel %vm5893_vm7, %v9531_v61, %v5890_v25 }
 0x401   :  { %v5756_v0 = vpop.f32.mrf.mxu3  ;;  %v5899_v46 = vsel %vm5896_vm8, %v5898_v57, %v5894_v32 }
 0x402   :  { %v5757_v58 = vadd.f32 %v5756_v0, %v5744_v16  ;;  %5921 = vst [vmem:[#allocation14 + $0x28] sm:$0xff] %v5899_v46 }
 0x404   :  { %v5782_v38 = vadd.f32 %v5768_v40, %v5757_v58 }
 0x406   :  { %v8785_v55 = vmul.f32 -1.442695, %v5782_v38 }
 0x408   :  { %9532 = vpow2.f32 %v8785_v55 }
 0x409   :  { %v5758_v24 = vpop.f32.mrf.mxu3 }
 0x40e   :  { %v9533_v39 = vpop.eup %9532 }
 0x40f   :  { %v5810_v12 = vadd.f32 1.0, %v9533_v39 }
 0x411   :  { %9534 = vrcp.f32 %v5810_v12  ;;  %v5912_v26 = vand.u32 2147483648, %v5810_v12  ;;  %v5910_v30 = vand.u32 2147483647, %v5810_v12  ;;  %vm5906_vm10 = vweird.f32 %v5810_v12 }
 0x413   :  { %v5913_v5 = vor.u32 1.1754944e-38, %v5912_v26  ;;  %vm5911_vm12 = vcmp.eq.f32.partialorder %v5910_v30, 8.507059e+37 }
 0x417   :  { %v9535_v37 = vpop.eup %9534 }
 0x418   :  { %v5902_v41 = vmul.f32 %v9535_v37, %v5810_v12  ;;  %vm5907_vm9 = vweird.f32 %v9535_v37 }
 0x419   :  { %vm5908_vm11 = vmor %vm5906_vm10, %vm5907_vm9 }
 0x41a   :  { %v5903_v33 = vsub.f32 1.0, %v5902_v41 }
 0x41c   :  { %v5904_v29 = vmul.f32 %v9535_v37, %v5903_v33 }
 0x41e   :  { %v5905_v3 = vadd.f32 %v9535_v37, %v5904_v29 }
 0x420   :  { %v5909_v42 = vsel %vm5908_vm11, %v9535_v37, %v5905_v3 }
 0x421   :  { %v5914_v11 = vsel %vm5911_vm12, %v5913_v5, %v5909_v42 }
 0x422   :  { %5922 = vst [vmem:[#allocation14 + $0x30] sm:$0xff] %v5914_v11 }
 0x423   :  { %5933 = dma.vmem_to_hbm [thread:$0]  %s5929_s6, 896, %s5931_s15, [#allocation4]  }
 0x424   :  { %9736 = dma.done.wait [#allocation4], 896  }
 0x425   :  { %9737 = vsyncadd [#allocation4], 4294966400 }
 0x426   :  { %5938 = vsyncpa [#allocation3], 1 }
 0x427   :  { %5939 = vsyncpa [#allocation6], 1 }
 0x428   :  { %5940 = vsyncpa [#allocation9], 1 }
 0x429   :  { %5941 = vsyncpa [#allocation12], 1 }
 0x42a   :  { %5942 = vsyncpa [#allocation4], 1 }

</bundles_post_ra>
